<compile_context>
chip_gen: v7x
topology: tpu7x:2x2x1
jax: 0.10.0
libtpu: 0.0.40
codegen_flags: <defaults>
</compile_context>

<pallas_src>
import math
import functools

import jax
import jax.numpy as jnp
from jax.experimental import pallas as pl
from jax.experimental.pallas import tpu as pltpu


def _layer_norm(x, g, b, eps=1e-5):
    # torch.nn.LayerNorm: biased variance over last dim, eps inside sqrt.
    mu = jnp.mean(x, axis=-1, keepdims=True)
    var = jnp.mean((x - mu) ** 2, axis=-1, keepdims=True)
    return (x - mu) * jax.lax.rsqrt(var + eps) * g + b


def _gelu_tanh(x):
    # Matches the GELU module: 0.5*x*(1+tanh(sqrt(2/pi)*(x+0.044715*x^3)))
    return 0.5 * x * (1.0 + jnp.tanh(math.sqrt(2.0 / math.pi) * (x + 0.044715 * x * x * x)))


def _pick_q_tile(seq_len, cap=256):
    # Query-tile length: full sequence when small, else a multiple-of-32 divisor.
    if seq_len <= cap:
        return seq_len
    for t in (256, 128, 64, 32):
        if seq_len % t == 0:
            return t
    return seq_len  # TODO(synk): pad ragged decoder lengths to a multiple of 128


def _pick_ffn_chunk(d_ff, cap=512):
    # Largest divisor of d_ff that is <= cap (prefer multiples of 128).
    if d_ff <= cap:
        return d_ff
    fallback = None
    for c in range(cap, 0, -1):
        if d_ff % c == 0:
            if c % 128 == 0:
                return c
            if fallback is None:
                fallback = c
    return fallback if fallback is not None else d_ff


def _vmem_limit_bytes(param_arrays, S_dec, S_op, S_tp, d_model, H, d_k, d_v,
                      tq, ffn_chunk, attn_dtype):
    attn_b = jnp.dtype(attn_dtype).itemsize
    # single-buffered resident weights
    weight_bytes = sum(int(a.size) * a.dtype.itemsize for a in param_arrays)
    # double-buffered data / output blocks
    data_block = (S_dec * d_model * 4 + (S_op + S_tp) * d_model * 2
                  + tq * (S_dec + S_op + S_tp) * 1)
    out_block = tq * d_model * 4 + H * tq * (S_dec + S_op + S_tp) * attn_b
    s_max = max(S_dec, S_op, S_tp)
    work = (3 * H * tq * s_max * 4                          # live softmax tensors
            + (S_dec + S_op + S_tp) * H * (d_k + d_v) * 4   # K/V projections
            + 2 * tq * ffn_chunk * 4                        # FFN hidden chunk
            + 8 * tq * d_model * 4)                         # residual / LN temporaries
    needed = weight_bytes + 2 * (data_block + out_block) + work
    cap = 128 * 1024 * 1024
    try:
        cap = int(pltpu.get_tpu_info().vmem_capacity_bytes)  # 64 MiB on v7x
    except Exception:
        pass
    return int(min(max(needed * 1.3, 32 * 1024 * 1024), 0.9 * cap))


def fusion_decoder_layer_kernel(
        n_heads, d_k, d_v, tq, ffn_chunk,
        # per-batch data blocks
        dec_ref, rev_ref, tpl_ref, ms_ref, mop_ref, mtp_ref,
        # self-attention params (K|V fused)
        wq_s_ref, bq_s_ref, wkv_s_ref, bkv_s_ref, wo_s_ref, bo_s_ref, ln1_g_ref, ln1_b_ref,
        # cross-attention params (OP = review, TP = template), fused layouts
        wq_x_ref, bq_x_ref, wkv_op_ref, bkv_op_ref, wkv_tp_ref, bkv_tp_ref,
        wo_x_ref, bo_x_ref, ln2_g_ref, ln2_b_ref,
        # FFN
        w1_ref, b1_ref, w2_ref, b2_ref, ln3_g_ref, ln3_b_ref,
        # outputs
        out_ref, attn_s_ref, attn_op_ref, attn_tp_ref):
    f32 = jnp.float32
    bf16 = jnp.bfloat16
    H = n_heads
    scale = 1.0 / math.sqrt(d_k)

    q0 = pl.multiple_of(pl.program_id(1) * tq, tq)

    x_full = dec_ref[0]                                # (S_dec, d_model) f32, K/V source
    if tq == x_full.shape[0]:
        x = x_full                                     # untiled: query tile == full seq
    else:
        x = dec_ref[0, pl.ds(q0, tq), :]               # (tq, d_model) query tile / residual
    xb_full = x_full.astype(bf16)
    xb = x.astype(bf16)

    m_s = ms_ref[0].astype(jnp.int32) != 0             # (tq, S_kv), 1 == masked
    m_op = mop_ref[0].astype(jnp.int32) != 0
    m_tp = mtp_ref[0].astype(jnp.int32) != 0

    def attention(q2, k2, v2, mask_b, attn_ref):
        # q2: (tq, H*d_k), k2: (Skv, H*d_k), v2: (Skv, H*d_v)   all f32
        sq, skv = q2.shape[0], k2.shape[0]
        qh = q2.reshape(sq, H, d_k).astype(bf16)
        kh = k2.reshape(skv, H, d_k).astype(bf16)
        vh = v2.reshape(skv, H, d_v).astype(bf16)
        # head-batched QK^T, no per-head stack copies
        s = jnp.einsum("qhd,khd->hqk", qh, kh, preferred_element_type=f32) * scale
        s = jnp.where(mask_b[None, :, :], -1000000000.0, s)
        s = s - jnp.max(s, axis=-1, keepdims=True)
        e = jnp.exp(s)
        # exact reciprocal on the (H, tq, 1) denominator -> stored maps match exact softmax
        p = e * (1.0 / jnp.sum(e, axis=-1, keepdims=True))
        attn_ref[0] = p.astype(attn_ref.dtype)
        # PV in the (q, h, d) layout so the flat reshape matches torch's
        # context.transpose(1,2).view(.., H*d_v)
        ctx = jnp.einsum("hqk,khd->qhd", p.astype(bf16), vh, preferred_element_type=f32)
        return ctx.reshape(sq, H * d_v)

    # ---------------- decoder self-attention + residual + LayerNorm ----------------
    kv_s = jnp.dot(xb_full, wkv_s_ref[...], preferred_element_type=f32) + bkv_s_ref[...]
    q_s = jnp.dot(xb, wq_s_ref[...], preferred_element_type=f32) + bq_s_ref[...]
    ctx_s = attention(q_s, kv_s[:, :H * d_k], kv_s[:, H * d_k:], m_s, attn_s_ref)
    # flat output projection: contraction K = H*d_v fills the MXU, no cross-head reduce
    mha_s = jnp.dot(ctx_s.astype(bf16), wo_s_ref[...], preferred_element_type=f32) + bo_s_ref[...]
    y1 = _layer_norm(mha_s + x, ln1_g_ref[...], ln1_b_ref[...])

    # -------- fused cross-attention over the two encoder memories (OP + TP) --------
    y1b = y1.astype(bf16)
    q_x = jnp.dot(y1b, wq_x_ref[...], preferred_element_type=f32) + bq_x_ref[...]
    kv_op = jnp.dot(rev_ref[0], wkv_op_ref[...], preferred_element_type=f32) + bkv_op_ref[...]
    kv_tp = jnp.dot(tpl_ref[0], wkv_tp_ref[...], preferred_element_type=f32) + bkv_tp_ref[...]
    ctx_op = attention(q_x[:, :H * d_k], kv_op[:, :H * d_k], kv_op[:, H * d_k:], m_op, attn_op_ref)
    ctx_tp = attention(q_x[:, H * d_k:], kv_tp[:, :H * d_k], kv_tp[:, H * d_k:], m_tp, attn_tp_ref)
    # linear(cat(ctx_OP, ctx_TP)) as ONE matmul with K = 2*H*d_v
    ctx_x = jnp.concatenate([ctx_op, ctx_tp], axis=-1).astype(bf16)
    mha_x = jnp.dot(ctx_x, wo_x_ref[...], preferred_element_type=f32) + bo_x_ref[...]
    y2 = _layer_norm(mha_x + y1, ln2_g_ref[...], ln2_b_ref[...])

    # ---------------- position-wise FFN (d_ff streamed) + residual + LN ----------------
    y2b = y2.astype(bf16)
    d_ff = w1_ref.shape[1]
    n_chunks = d_ff // ffn_chunk

    def ffn_chunk_out(c0):
        h1 = _gelu_tanh(jnp.dot(y2b, w1_ref[:, pl.ds(c0, ffn_chunk)],
                                preferred_element_type=f32) + b1_ref[:, pl.ds(c0, ffn_chunk)])
        return jnp.dot(h1.astype(bf16), w2_ref[pl.ds(c0, ffn_chunk), :],
                       preferred_element_type=f32)

    if n_chunks == 1:
        ffn = ffn_chunk_out(0)
    else:
        def body(c, acc):
            return acc + ffn_chunk_out(pl.multiple_of(c * ffn_chunk, ffn_chunk))
        ffn = jax.lax.fori_loop(0, n_chunks, body, jnp.zeros_like(y2))
    ffn = ffn + b2_ref[...]
    out_ref[0] = _layer_norm(ffn + y2, ln3_g_ref[...], ln3_b_ref[...]).astype(out_ref.dtype)


def fusion_decoder_layer(dec_inputs, review_enc, template_enc,
                         mask_self, mask_op, mask_tp, params,
                         *, n_heads, d_k, d_v, attn_dtype=jnp.bfloat16, q_block=None):
    B, S_dec, d_model = dec_inputs.shape
    S_op = review_enc.shape[1]
    S_tp = template_enc.shape[1]
    H = n_heads
    d_ff = params["w1"].shape[1]

    tq = _pick_q_tile(S_dec) if q_block is None else q_block
    assert S_dec % tq == 0, "q tile must divide S_dec"
    n_q = S_dec // tq
    ffn_chunk = _pick_ffn_chunk(d_ff)

    f32, bf16 = jnp.float32, jnp.bfloat16
    cat = jnp.concatenate
    p = params
    # Fused parameter set: shared-LHS projections concatenated along the output dim
    # (one wide matmul instead of 2-3 narrow ones), W_O flat (H*d_v, d_model),
    # weights bf16 (f32 accumulation in-kernel), biases / LN params f32.
    param_arrays = [
        p["wq_s"].astype(bf16), p["bq_s"].astype(f32),
        cat([p["wk_s"], p["wv_s"]], axis=1).astype(bf16),
        cat([p["bk_s"], p["bv_s"]], axis=1).astype(f32),
        p["wo_s"].astype(bf16), p["bo_s"].astype(f32),
        p["ln1_g"].astype(f32), p["ln1_b"].astype(f32),
        cat([p["wq_op"], p["wq_tp"]], axis=1).astype(bf16),
        cat([p["bq_op"], p["bq_tp"]], axis=1).astype(f32),
        cat([p["wk_op"], p["wv_op"]], axis=1).astype(bf16),
        cat([p["bk_op"], p["bv_op"]], axis=1).astype(f32),
        cat([p["wk_tp"], p["wv_tp"]], axis=1).astype(bf16),
        cat([p["bk_tp"], p["bv_tp"]], axis=1).astype(f32),
        cat([p["wo_op"], p["wo_tp"]], axis=0).astype(bf16), p["bo_x"].astype(f32),
        p["ln2_g"].astype(f32), p["ln2_b"].astype(f32),
        p["w1"].astype(bf16), p["b1"].astype(f32),
        p["w2"].astype(bf16), p["b2"].astype(f32),
        p["ln3_g"].astype(f32), p["ln3_b"].astype(f32),
    ]
    data_arrays = [dec_inputs.astype(f32),
                   review_enc.astype(bf16),
                   template_enc.astype(bf16),
                   mask_self.astype(jnp.int8),
                   mask_op.astype(jnp.int8),
                   mask_tp.astype(jnp.int8)]

    # Invariant parameters: unblocked, resident once in VMEM (single-buffered); the
    # default blocked path would double-buffer the whole weight set for no benefit.
    param_spec = pl.BlockSpec(memory_space=pltpu.MemorySpace.VMEM)
    in_specs = [
        pl.BlockSpec((1, S_dec, d_model), lambda b, q: (b, 0, 0)),  # full dec: K/V + q-tile
        pl.BlockSpec((1, S_op, d_model), lambda b, q: (b, 0, 0)),
        pl.BlockSpec((1, S_tp, d_model), lambda b, q: (b, 0, 0)),
        pl.BlockSpec((1, tq, S_dec), lambda b, q: (b, q, 0)),       # mask rows of this q-tile
        pl.BlockSpec((1, tq, S_op), lambda b, q: (b, q, 0)),
        pl.BlockSpec((1, tq, S_tp), lambda b, q: (b, q, 0)),
    ] + [param_spec] * len(param_arrays)

    out_shape = (
        jax.ShapeDtypeStruct((B, S_dec, d_model), jnp.float32),        # dec_outputs
        jax.ShapeDtypeStruct((B, H, S_dec, S_dec), attn_dtype),        # dec_self_attn
        jax.ShapeDtypeStruct((B, H, S_dec, S_op), attn_dtype),         # attn_OP
        jax.ShapeDtypeStruct((B, H, S_dec, S_tp), attn_dtype),         # attn_TP
    )
    out_specs = [
        pl.BlockSpec((1, tq, d_model), lambda b, q: (b, q, 0)),
        pl.BlockSpec((1, H, tq, S_dec), lambda b, q: (b, 0, q, 0)),
        pl.BlockSpec((1, H, tq, S_op), lambda b, q: (b, 0, q, 0)),
        pl.BlockSpec((1, H, tq, S_tp), lambda b, q: (b, 0, q, 0)),
    ]

    vmem_limit = _vmem_limit_bytes(param_arrays, S_dec, S_op, S_tp, d_model, H, d_k, d_v,
                                   tq, ffn_chunk, attn_dtype)

    grid_spec = pltpu.PrefetchScalarGridSpec(
        num_scalar_prefetch=0,
        grid=(B, n_q),                       # batch x query-tile, both megacore-shardable
        in_specs=in_specs,
        out_specs=out_specs,
    )

    kernel = functools.partial(fusion_decoder_layer_kernel, H, d_k, d_v, tq, ffn_chunk)
    return pl.pallas_call(
        kernel,
        out_shape=out_shape,
        grid_spec=grid_spec,
        compiler_params=pltpu.CompilerParams(
            dimension_semantics=("parallel", "parallel"),
            vmem_limit_bytes=vmem_limit),
    )(*data_arrays, *param_arrays)


def make_params(key, d_model, d_ff, d_k, d_v, n_heads):
    H = n_heads
    keys = iter(jax.random.split(key, 64))

    def w(shape, s=0.02):
        return jax.random.normal(next(keys), shape, jnp.float32) * s

    def b(shape, s=0.01):
        return jax.random.normal(next(keys), shape, jnp.float32) * s

    ones = lambda: jnp.ones((1, d_model), jnp.float32)
    zeros = lambda: jnp.zeros((1, d_model), jnp.float32)
    return {
        # decoder self-attention
        "wq_s": w((d_model, H * d_k)), "bq_s": b((1, H * d_k)),
        "wk_s": w((d_model, H * d_k)), "bk_s": b((1, H * d_k)),
        "wv_s": w((d_model, H * d_v)), "bv_s": b((1, H * d_v)),
        "wo_s": w((H * d_v, d_model)), "bo_s": b((1, d_model)),
        "ln1_g": ones(), "ln1_b": zeros(),
        # cross-attention projections, OP (review) and TP (template)
        "wq_op": w((d_model, H * d_k)), "bq_op": b((1, H * d_k)),
        "wk_op": w((d_model, H * d_k)), "bk_op": b((1, H * d_k)),
        "wv_op": w((d_model, H * d_v)), "bv_op": b((1, H * d_v)),
        "wq_tp": w((d_model, H * d_k)), "bq_tp": b((1, H * d_k)),
        "wk_tp": w((d_model, H * d_k)), "bk_tp": b((1, H * d_k)),
        "wv_tp": w((d_model, H * d_v)), "bv_tp": b((1, H * d_v)),
        # cross-attention output projection (flat, split per source) + LN
        "wo_op": w((H * d_v, d_model)), "wo_tp": w((H * d_v, d_model)),
        "bo_x": b((1, d_model)),
        "ln2_g": ones(), "ln2_b": zeros(),
        # FFN
        "w1": w((d_model, d_ff)), "b1": b((1, d_ff)),
        "w2": w((d_ff, d_model)), "b2": b((1, d_model)),
        "ln3_g": ones(), "ln3_b": zeros(),
    }


def reference(dec_x, rev_x, tpl_x, m_self, m_op, m_tp, p, *, n_heads, d_k, d_v):
    # Pure-JAX f32 reference mirroring the PyTorch forward exactly.
    H = n_heads

    def split_heads(t, dh):
        B, S, _ = t.shape
        return t.reshape(B, S, H, dh).transpose(0, 2, 1, 3)

    def merge_heads(t):
        B, H_, S, dh = t.shape
        return t.transpose(0, 2, 1, 3).reshape(B, S, H_ * dh)

    def sdpa(q_in, kv_in, mask, wq, bq, wk, bk, wv, bv):
        q = split_heads(q_in @ wq + bq, d_k)
        k = split_heads(kv_in @ wk + bk, d_k)
        v = split_heads(kv_in @ wv + bv, d_v)
        s = jnp.einsum("bhqd,bhkd->bhqk", q, k) / math.sqrt(d_k)
        s = jnp.where(mask[:, None, :, :] != 0, -1000000000.0, s)
        a = jax.nn.softmax(s, axis=-1)
        ctx = jnp.einsum("bhqk,bhkd->bhqd", a, v)
        return ctx, a

    ctx_s, a_self = sdpa(dec_x, dec_x, m_self,
                         p["wq_s"], p["bq_s"], p["wk_s"], p["bk_s"], p["wv_s"], p["bv_s"])
    mha_s = merge_heads(ctx_s) @ p["wo_s"] + p["bo_s"]
    y1 = _layer_norm(mha_s + dec_x, p["ln1_g"], p["ln1_b"])

    ctx_op, a_op = sdpa(y1, rev_x, m_op,
                        p["wq_op"], p["bq_op"], p["wk_op"], p["bk_op"], p["wv_op"], p["bv_op"])
    ctx_tp, a_tp = sdpa(y1, tpl_x, m_tp,
                        p["wq_tp"], p["bq_tp"], p["wk_tp"], p["bk_tp"], p["wv_tp"], p["bv_tp"])
    mha_x = merge_heads(ctx_op) @ p["wo_op"] + merge_heads(ctx_tp) @ p["wo_tp"] + p["bo_x"]
    y2 = _layer_norm(mha_x + y1, p["ln2_g"], p["ln2_b"])

    h = _gelu_tanh(y2 @ p["w1"] + p["b1"])
    ffn = h @ p["w2"] + p["b2"]
    y3 = _layer_norm(ffn + y2, p["ln3_g"], p["ln3_b"])
    return y3, a_self, a_op, a_tp


if __name__ == "__main__":
    B, S_dec, S_op, S_tp = 2, 8, 16, 8
    d_model, d_ff, d_k, d_v, n_heads = 32, 64, 8, 8, 4

    key = jax.random.PRNGKey(0)
    k_dec, k_rev, k_tpl, k_p = jax.random.split(key, 4)
    dec_x = jax.random.normal(k_dec, (B, S_dec, d_model), jnp.float32)
    rev_x = jax.random.normal(k_rev, (B, S_op, d_model), jnp.float32)
    tpl_x = jax.random.normal(k_tpl, (B, S_tp, d_model), jnp.float32)

    # causal self-attention mask + some key padding on the cross-attention masks
    causal = (jnp.arange(S_dec)[None, :] > jnp.arange(S_dec)[:, None]).astype(jnp.int8)
    mask_self = jnp.broadcast_to(causal, (B, S_dec, S_dec)).astype(jnp.int8)
    mask_op = jnp.zeros((B, S_dec, S_op), jnp.int8).at[0, :, -4:].set(1)
    mask_tp = jnp.zeros((B, S_dec, S_tp), jnp.int8).at[1, :, -2:].set(1)

    params = make_params(k_p, d_model, d_ff, d_k, d_v, n_heads)

    out, a_self, a_op, a_tp = fusion_decoder_layer(
        dec_x, rev_x, tpl_x, mask_self, mask_op, mask_tp, params,
        n_heads=n_heads, d_k=d_k, d_v=d_v)
    out = jax.block_until_ready(out)
    a_self = jax.block_until_ready(a_self)

    r_out, r_self, r_op, r_tp = reference(
        dec_x, rev_x, tpl_x, mask_self, mask_op, mask_tp, params,
        n_heads=n_heads, d_k=d_k, d_v=d_v)

    assert out.shape == (B, S_dec, d_model)
    assert a_self.shape == (B, n_heads, S_dec, S_dec)
    assert a_op.shape == (B, n_heads, S_dec, S_op)
    assert a_tp.shape == (B, n_heads, S_dec, S_tp)

    # bf16 matmul operands vs. the f32 reference -> relaxed tolerance on the output;
    # attention maps are stored in bf16 (halved writeback) -> slightly wider tolerance.
    tol_out = dict(atol=5e-3, rtol=5e-3)
    tol_attn = dict(atol=1.5e-2, rtol=1.5e-2)
    assert jnp.allclose(out, r_out, **tol_out), float(jnp.max(jnp.abs(out - r_out)))
    assert jnp.allclose(a_self.astype(jnp.float32), r_self, **tol_attn), \
        float(jnp.max(jnp.abs(a_self.astype(jnp.float32) - r_self)))
    assert jnp.allclose(a_op.astype(jnp.float32), r_op, **tol_attn), \
        float(jnp.max(jnp.abs(a_op.astype(jnp.float32) - r_op)))
    assert jnp.allclose(a_tp.astype(jnp.float32), r_tp, **tol_attn), \
        float(jnp.max(jnp.abs(a_tp.astype(jnp.float32) - r_tp)))

    print("KERNEL_OK")
</pallas_src>

<mosaic_0001>
module attributes {stable_mosaic.version = 11 : i64} {
  func.func @fusion_decoder_layer_kernel(%arg0: i32, %arg1: i32, %arg2: memref<1x8x32xf32, #tpu.memory_space<vmem>>, %arg3: memref<1x16x32xbf16, #tpu.memory_space<vmem>>, %arg4: memref<1x8x32xbf16, #tpu.memory_space<vmem>>, %arg5: memref<1x8x8xi8, #tpu.memory_space<vmem>>, %arg6: memref<1x8x16xi8, #tpu.memory_space<vmem>>, %arg7: memref<1x8x8xi8, #tpu.memory_space<vmem>>, %arg8: memref<32x32xbf16, #tpu.memory_space<vmem>>, %arg9: memref<1x32xf32, #tpu.memory_space<vmem>>, %arg10: memref<32x64xbf16, #tpu.memory_space<vmem>>, %arg11: memref<1x64xf32, #tpu.memory_space<vmem>>, %arg12: memref<32x32xbf16, #tpu.memory_space<vmem>>, %arg13: memref<1x32xf32, #tpu.memory_space<vmem>>, %arg14: memref<1x32xf32, #tpu.memory_space<vmem>>, %arg15: memref<1x32xf32, #tpu.memory_space<vmem>>, %arg16: memref<32x64xbf16, #tpu.memory_space<vmem>>, %arg17: memref<1x64xf32, #tpu.memory_space<vmem>>, %arg18: memref<32x64xbf16, #tpu.memory_space<vmem>>, %arg19: memref<1x64xf32, #tpu.memory_space<vmem>>, %arg20: memref<32x64xbf16, #tpu.memory_space<vmem>>, %arg21: memref<1x64xf32, #tpu.memory_space<vmem>>, %arg22: memref<64x32xbf16, #tpu.memory_space<vmem>>, %arg23: memref<1x32xf32, #tpu.memory_space<vmem>>, %arg24: memref<1x32xf32, #tpu.memory_space<vmem>>, %arg25: memref<1x32xf32, #tpu.memory_space<vmem>>, %arg26: memref<32x64xbf16, #tpu.memory_space<vmem>>, %arg27: memref<1x64xf32, #tpu.memory_space<vmem>>, %arg28: memref<64x32xbf16, #tpu.memory_space<vmem>>, %arg29: memref<1x32xf32, #tpu.memory_space<vmem>>, %arg30: memref<1x32xf32, #tpu.memory_space<vmem>>, %arg31: memref<1x32xf32, #tpu.memory_space<vmem>>, %arg32: memref<1x8x32xf32, #tpu.memory_space<vmem>>, %arg33: memref<1x4x8x8xbf16, #tpu.memory_space<vmem>>, %arg34: memref<1x4x8x16xbf16, #tpu.memory_space<vmem>>, %arg35: memref<1x4x8x8xbf16, #tpu.memory_space<vmem>>) attributes {dimension_semantics = [#tpu.dimension_semantics<parallel>, #tpu.dimension_semantics<parallel>], iteration_bounds = array<i64: 2, 1>, scalar_prefetch = 0 : i64, scratch_operands = 0 : i64, tpu.core_type = #tpu.core_type<tc>, window_params = [{transform_indices = @transform_0, window_bounds = array<i64: 1, 8, 32>}, {transform_indices = @transform_1, window_bounds = array<i64: 1, 16, 32>}, {transform_indices = @transform_2, window_bounds = array<i64: 1, 8, 32>}, {transform_indices = @transform_3, window_bounds = array<i64: 1, 8, 8>}, {transform_indices = @transform_4, window_bounds = array<i64: 1, 8, 16>}, {transform_indices = @transform_5, window_bounds = array<i64: 1, 8, 8>}, {pipeline_mode = #tpu.pipeline_mode<synchronous>, transform_indices = @transform_6, window_bounds = array<i64: 32, 32>}, {pipeline_mode = #tpu.pipeline_mode<synchronous>, transform_indices = @transform_7, window_bounds = array<i64: 1, 32>}, {pipeline_mode = #tpu.pipeline_mode<synchronous>, transform_indices = @transform_8, window_bounds = array<i64: 32, 64>}, {pipeline_mode = #tpu.pipeline_mode<synchronous>, transform_indices = @transform_9, window_bounds = array<i64: 1, 64>}, {pipeline_mode = #tpu.pipeline_mode<synchronous>, transform_indices = @transform_10, window_bounds = array<i64: 32, 32>}, {pipeline_mode = #tpu.pipeline_mode<synchronous>, transform_indices = @transform_11, window_bounds = array<i64: 1, 32>}, {pipeline_mode = #tpu.pipeline_mode<synchronous>, transform_indices = @transform_12, window_bounds = array<i64: 1, 32>}, {pipeline_mode = #tpu.pipeline_mode<synchronous>, transform_indices = @transform_13, window_bounds = array<i64: 1, 32>}, {pipeline_mode = #tpu.pipeline_mode<synchronous>, transform_indices = @transform_14, window_bounds = array<i64: 32, 64>}, {pipeline_mode = #tpu.pipeline_mode<synchronous>, transform_indices = @transform_15, window_bounds = array<i64: 1, 64>}, {pipeline_mode = #tpu.pipeline_mode<synchronous>, transform_indices = @transform_16, window_bounds = array<i64: 32, 64>}, {pipeline_mode = #tpu.pipeline_mode<synchronous>, transform_indices = @transform_17, window_bounds = array<i64: 1, 64>}, {pipeline_mode = #tpu.pipeline_mode<synchronous>, transform_indices = @transform_18, window_bounds = array<i64: 32, 64>}, {pipeline_mode = #tpu.pipeline_mode<synchronous>, transform_indices = @transform_19, window_bounds = array<i64: 1, 64>}, {pipeline_mode = #tpu.pipeline_mode<synchronous>, transform_indices = @transform_20, window_bounds = array<i64: 64, 32>}, {pipeline_mode = #tpu.pipeline_mode<synchronous>, transform_indices = @transform_21, window_bounds = array<i64: 1, 32>}, {pipeline_mode = #tpu.pipeline_mode<synchronous>, transform_indices = @transform_22, window_bounds = array<i64: 1, 32>}, {pipeline_mode = #tpu.pipeline_mode<synchronous>, transform_indices = @transform_23, window_bounds = array<i64: 1, 32>}, {pipeline_mode = #tpu.pipeline_mode<synchronous>, transform_indices = @transform_24, window_bounds = array<i64: 32, 64>}, {pipeline_mode = #tpu.pipeline_mode<synchronous>, transform_indices = @transform_25, window_bounds = array<i64: 1, 64>}, {pipeline_mode = #tpu.pipeline_mode<synchronous>, transform_indices = @transform_26, window_bounds = array<i64: 64, 32>}, {pipeline_mode = #tpu.pipeline_mode<synchronous>, transform_indices = @transform_27, window_bounds = array<i64: 1, 32>}, {pipeline_mode = #tpu.pipeline_mode<synchronous>, transform_indices = @transform_28, window_bounds = array<i64: 1, 32>}, {pipeline_mode = #tpu.pipeline_mode<synchronous>, transform_indices = @transform_29, window_bounds = array<i64: 1, 32>}, {transform_indices = @transform_30, window_bounds = array<i64: 1, 8, 32>}, {transform_indices = @transform_31, window_bounds = array<i64: 1, 4, 8, 8>}, {transform_indices = @transform_32, window_bounds = array<i64: 1, 4, 8, 16>}, {transform_indices = @transform_33, window_bounds = array<i64: 1, 4, 8, 8>}]} {
    %c0 = arith.constant 0 : index
    %c0_0 = arith.constant 0 : index
    %c0_1 = arith.constant 0 : index
    %0 = vector.load %arg2[%c0, %c0_0, %c0_1] : memref<1x8x32xf32, #tpu.memory_space<vmem>>, vector<1x8x32xf32>
    %1 = vector.shape_cast %0 : vector<1x8x32xf32> to vector<8x32xf32>
    %2 = arith.truncf %1 : vector<8x32xf32> to vector<8x32xbf16>
    %3 = arith.truncf %1 : vector<8x32xf32> to vector<8x32xbf16>
    %c0_2 = arith.constant 0 : index
    %c0_3 = arith.constant 0 : index
    %c0_4 = arith.constant 0 : index
    %4 = vector.load %arg5[%c0_2, %c0_3, %c0_4] : memref<1x8x8xi8, #tpu.memory_space<vmem>>, vector<1x8x8xi8>
    %5 = vector.shape_cast %4 : vector<1x8x8xi8> to vector<8x8xi8>
    %6 = arith.extsi %5 : vector<8x8xi8> to vector<8x8xi32>
    %c0_i32 = arith.constant 0 : i32
    %7 = vector.broadcast %c0_i32 : i32 to vector<8x8xi32>
    %8 = arith.cmpi ne, %6, %7 : vector<8x8xi32>
    %c0_5 = arith.constant 0 : index
    %c0_6 = arith.constant 0 : index
    %c0_7 = arith.constant 0 : index
    %9 = vector.load %arg6[%c0_5, %c0_6, %c0_7] : memref<1x8x16xi8, #tpu.memory_space<vmem>>, vector<1x8x16xi8>
    %10 = vector.shape_cast %9 : vector<1x8x16xi8> to vector<8x16xi8>
    %11 = arith.extsi %10 : vector<8x16xi8> to vector<8x16xi32>
    %c0_i32_8 = arith.constant 0 : i32
    %12 = vector.broadcast %c0_i32_8 : i32 to vector<8x16xi32>
    %13 = arith.cmpi ne, %11, %12 : vector<8x16xi32>
    %c0_9 = arith.constant 0 : index
    %c0_10 = arith.constant 0 : index
    %c0_11 = arith.constant 0 : index
    %14 = vector.load %arg7[%c0_9, %c0_10, %c0_11] : memref<1x8x8xi8, #tpu.memory_space<vmem>>, vector<1x8x8xi8>
    %15 = vector.shape_cast %14 : vector<1x8x8xi8> to vector<8x8xi8>
    %16 = arith.extsi %15 : vector<8x8xi8> to vector<8x8xi32>
    %c0_i32_12 = arith.constant 0 : i32
    %17 = vector.broadcast %c0_i32_12 : i32 to vector<8x8xi32>
    %18 = arith.cmpi ne, %16, %17 : vector<8x8xi32>
    %c0_13 = arith.constant 0 : index
    %c0_14 = arith.constant 0 : index
    %19 = vector.load %arg10[%c0_13, %c0_14] : memref<32x64xbf16, #tpu.memory_space<vmem>>, vector<32x64xbf16>
    %cst = arith.constant dense<0.000000e+00> : vector<8x64xf32>
    %20 = tpu.matmul %2, %19, %cst {dimension_numbers = #tpu.dot_dimension_numbers<[1], [0], [0], [1], [0, 0, 1, 1], [], []>} : vector<8x32xbf16>, vector<32x64xbf16>, vector<8x64xf32> -> vector<8x64xf32>
    %c0_15 = arith.constant 0 : index
    %c0_16 = arith.constant 0 : index
    %21 = vector.load %arg11[%c0_15, %c0_16] : memref<1x64xf32, #tpu.memory_space<vmem>>, vector<1x64xf32>
    %22 = vector.broadcast %21 : vector<1x64xf32> to vector<8x64xf32>
    %23 = arith.addf %20, %22 : vector<8x64xf32>
    %c0_17 = arith.constant 0 : index
    %c0_18 = arith.constant 0 : index
    %24 = vector.load %arg8[%c0_17, %c0_18] : memref<32x32xbf16, #tpu.memory_space<vmem>>, vector<32x32xbf16>
    %cst_19 = arith.constant dense<0.000000e+00> : vector<8x32xf32>
    %25 = tpu.matmul %3, %24, %cst_19 {dimension_numbers = #tpu.dot_dimension_numbers<[1], [0], [0], [1], [0, 0, 1, 1], [], []>} : vector<8x32xbf16>, vector<32x32xbf16>, vector<8x32xf32> -> vector<8x32xf32>
    %c0_20 = arith.constant 0 : index
    %c0_21 = arith.constant 0 : index
    %26 = vector.load %arg9[%c0_20, %c0_21] : memref<1x32xf32, #tpu.memory_space<vmem>>, vector<1x32xf32>
    %27 = vector.broadcast %26 : vector<1x32xf32> to vector<8x32xf32>
    %28 = arith.addf %25, %27 : vector<8x32xf32>
    %29 = vector.extract_strided_slice %23 {offsets = [0, 0], sizes = [8, 32], strides = [1, 1]} : vector<8x64xf32> to vector<8x32xf32>
    %30 = vector.extract_strided_slice %23 {offsets = [0, 32], sizes = [8, 32], strides = [1, 1]} : vector<8x64xf32> to vector<8x32xf32>
    %31 = vector.shape_cast %28 : vector<8x32xf32> to vector<8x4x8xf32>
    %32 = arith.truncf %31 : vector<8x4x8xf32> to vector<8x4x8xbf16>
    %33 = vector.shape_cast %29 : vector<8x32xf32> to vector<8x4x8xf32>
    %34 = arith.truncf %33 : vector<8x4x8xf32> to vector<8x4x8xbf16>
    %35 = vector.shape_cast %30 : vector<8x32xf32> to vector<8x4x8xf32>
    %36 = arith.truncf %35 : vector<8x4x8xf32> to vector<8x4x8xbf16>
    "tpu.trace_start"() <{level = 10 : i32, message = "qhd,khd->hqk"}> : () -> ()
    %cst_22 = arith.constant dense<0.000000e+00> : vector<4x8x8xf32>
    %37 = tpu.matmul %32, %34, %cst_22 {dimension_numbers = #tpu.dot_dimension_numbers<[2], [2], [0], [0], [0, 1, 0, 0, 1, 0], [1], [1]>} : vector<8x4x8xbf16>, vector<8x4x8xbf16>, vector<4x8x8xf32> -> vector<4x8x8xf32>
    "tpu.trace_stop"() : () -> ()
    %cst_23 = arith.constant 0.353553385 : f32
    %38 = vector.broadcast %cst_23 : f32 to vector<4x8x8xf32>
    %39 = arith.mulf %37, %38 : vector<4x8x8xf32>
    %40 = vector.shape_cast %8 : vector<8x8xi1> to vector<1x8x8xi1>
    %cst_24 = arith.constant -1.000000e+09 : f32
    %41 = vector.shape_cast %40 : vector<1x8x8xi1> to vector<1x8x8xi1>
    %42 = vector.broadcast %41 : vector<1x8x8xi1> to vector<4x8x8xi1>
    %43 = vector.broadcast %cst_24 : f32 to vector<4x8x8xf32>
    %44 = arith.select %42, %43, %39 : vector<4x8x8xi1>, vector<4x8x8xf32>
    %cst_25 = arith.constant dense<0xFF800000> : vector<4x8xf32>
    %45 = vector.multi_reduction <maximumf>, %44, %cst_25 [2] : vector<4x8x8xf32> to vector<4x8xf32>
    %46 = vector.shape_cast %45 : vector<4x8xf32> to vector<4x8x1xf32>
    %47 = vector.broadcast %46 : vector<4x8x1xf32> to vector<4x8x8xf32>
    %48 = arith.subf %44, %47 : vector<4x8x8xf32>
    %49 = math.exp %48 : vector<4x8x8xf32>
    %cst_26 = arith.constant dense<0.000000e+00> : vector<4x8xf32>
    %50 = vector.multi_reduction <add>, %49, %cst_26 [2] : vector<4x8x8xf32> to vector<4x8xf32>
    %51 = vector.shape_cast %50 : vector<4x8xf32> to vector<4x8x1xf32>
    %cst_27 = arith.constant 1.000000e+00 : f32
    %52 = vector.broadcast %cst_27 : f32 to vector<4x8x1xf32>
    %53 = arith.divf %52, %51 : vector<4x8x1xf32>
    %54 = vector.broadcast %53 : vector<4x8x1xf32> to vector<4x8x8xf32>
    %55 = arith.mulf %49, %54 : vector<4x8x8xf32>
    %56 = arith.truncf %55 : vector<4x8x8xf32> to vector<4x8x8xbf16>
    %c0_28 = arith.constant 0 : index
    %c0_29 = arith.constant 0 : index
    %c0_30 = arith.constant 0 : index
    %c0_31 = arith.constant 0 : index
    %57 = vector.load %arg33[%c0_28, %c0_29, %c0_30, %c0_31] : memref<1x4x8x8xbf16, #tpu.memory_space<vmem>>, vector<1x4x8x8xbf16>
    %58 = vector.shape_cast %57 : vector<1x4x8x8xbf16> to vector<4x8x8xbf16>
    %59 = vector.shape_cast %56 : vector<4x8x8xbf16> to vector<1x4x8x8xbf16>
    tpu.vector_store %arg33[%c0_28, %c0_29, %c0_30, %c0_31], %59 {strides = array<i32>} : memref<1x4x8x8xbf16, #tpu.memory_space<vmem>>, vector<1x4x8x8xbf16>,
    %60 = arith.truncf %55 : vector<4x8x8xf32> to vector<4x8x8xbf16>
    "tpu.trace_start"() <{level = 10 : i32, message = "hqk,khd->qhd"}> : () -> ()
    %cst_32 = arith.constant dense<0.000000e+00> : vector<4x8x8xf32>
    %61 = tpu.matmul %36, %60, %cst_32 {dimension_numbers = #tpu.dot_dimension_numbers<[0], [2], [2], [1], [0, 1, 0, 2, 1, 1], [1], [0]>} : vector<8x4x8xbf16>, vector<4x8x8xbf16>, vector<4x8x8xf32> -> vector<4x8x8xf32>
    %62 = tpu.transpose %61, [2, 0, 1] : vector<4x8x8xf32> -> vector<8x4x8xf32>
    "tpu.trace_stop"() : () -> ()
    %63 = vector.shape_cast %62 : vector<8x4x8xf32> to vector<8x32xf32>
    %64 = arith.truncf %63 : vector<8x32xf32> to vector<8x32xbf16>
    %c0_33 = arith.constant 0 : index
    %c0_34 = arith.constant 0 : index
    %65 = vector.load %arg12[%c0_33, %c0_34] : memref<32x32xbf16, #tpu.memory_space<vmem>>, vector<32x32xbf16>
    %cst_35 = arith.constant dense<0.000000e+00> : vector<8x32xf32>
    %66 = tpu.matmul %64, %65, %cst_35 {dimension_numbers = #tpu.dot_dimension_numbers<[1], [0], [0], [1], [0, 0, 1, 1], [], []>} : vector<8x32xbf16>, vector<32x32xbf16>, vector<8x32xf32> -> vector<8x32xf32>
    %c0_36 = arith.constant 0 : index
    %c0_37 = arith.constant 0 : index
    %67 = vector.load %arg13[%c0_36, %c0_37] : memref<1x32xf32, #tpu.memory_space<vmem>>, vector<1x32xf32>
    %68 = vector.broadcast %67 : vector<1x32xf32> to vector<8x32xf32>
    %69 = arith.addf %66, %68 : vector<8x32xf32>
    %70 = arith.addf %69, %1 : vector<8x32xf32>
    %c0_38 = arith.constant 0 : index
    %c0_39 = arith.constant 0 : index
    %71 = vector.load %arg14[%c0_38, %c0_39] : memref<1x32xf32, #tpu.memory_space<vmem>>, vector<1x32xf32>
    %c0_40 = arith.constant 0 : index
    %c0_41 = arith.constant 0 : index
    %72 = vector.load %arg15[%c0_40, %c0_41] : memref<1x32xf32, #tpu.memory_space<vmem>>, vector<1x32xf32>
    %cst_42 = arith.constant dense<0.000000e+00> : vector<8xf32>
    %73 = vector.multi_reduction <add>, %70, %cst_42 [1] : vector<8x32xf32> to vector<8xf32>
    %74 = vector.shape_cast %73 : vector<8xf32> to vector<8x1xf32>
    %cst_43 = arith.constant 3.200000e+01 : f32
    %75 = vector.broadcast %cst_43 : f32 to vector<8x1xf32>
    %76 = arith.divf %74, %75 : vector<8x1xf32>
    %77 = vector.broadcast %76 : vector<8x1xf32> to vector<8x32xf32>
    %78 = arith.subf %70, %77 : vector<8x32xf32>
    %79 = arith.mulf %78, %78 : vector<8x32xf32>
    %cst_44 = arith.constant dense<0.000000e+00> : vector<8xf32>
    %80 = vector.multi_reduction <add>, %79, %cst_44 [1] : vector<8x32xf32> to vector<8xf32>
    %81 = vector.shape_cast %80 : vector<8xf32> to vector<8x1xf32>
    %cst_45 = arith.constant 3.200000e+01 : f32
    %82 = vector.broadcast %cst_45 : f32 to vector<8x1xf32>
    %83 = arith.divf %81, %82 : vector<8x1xf32>
    %84 = vector.broadcast %76 : vector<8x1xf32> to vector<8x32xf32>
    %85 = arith.subf %70, %84 : vector<8x32xf32>
    %cst_46 = arith.constant 9.99999974E-6 : f32
    %86 = vector.broadcast %cst_46 : f32 to vector<8x1xf32>
    %87 = arith.addf %83, %86 : vector<8x1xf32>
    %88 = math.rsqrt %87 : vector<8x1xf32>
    %89 = vector.broadcast %88 : vector<8x1xf32> to vector<8x32xf32>
    %90 = arith.mulf %85, %89 : vector<8x32xf32>
    %91 = vector.broadcast %71 : vector<1x32xf32> to vector<8x32xf32>
    %92 = arith.mulf %90, %91 : vector<8x32xf32>
    %93 = vector.broadcast %72 : vector<1x32xf32> to vector<8x32xf32>
    %94 = arith.addf %92, %93 : vector<8x32xf32>
    %95 = arith.truncf %94 : vector<8x32xf32> to vector<8x32xbf16>
    %c0_47 = arith.constant 0 : index
    %c0_48 = arith.constant 0 : index
    %96 = vector.load %arg16[%c0_47, %c0_48] : memref<32x64xbf16, #tpu.memory_space<vmem>>, vector<32x64xbf16>
    %cst_49 = arith.constant dense<0.000000e+00> : vector<8x64xf32>
    %97 = tpu.matmul %95, %96, %cst_49 {dimension_numbers = #tpu.dot_dimension_numbers<[1], [0], [0], [1], [0, 0, 1, 1], [], []>} : vector<8x32xbf16>, vector<32x64xbf16>, vector<8x64xf32> -> vector<8x64xf32>
    %c0_50 = arith.constant 0 : index
    %c0_51 = arith.constant 0 : index
    %98 = vector.load %arg17[%c0_50, %c0_51] : memref<1x64xf32, #tpu.memory_space<vmem>>, vector<1x64xf32>
    %99 = vector.broadcast %98 : vector<1x64xf32> to vector<8x64xf32>
    %100 = arith.addf %97, %99 : vector<8x64xf32>
    %c0_52 = arith.constant 0 : index
    %c0_53 = arith.constant 0 : index
    %c0_54 = arith.constant 0 : index
    %101 = vector.load %arg3[%c0_52, %c0_53, %c0_54] : memref<1x16x32xbf16, #tpu.memory_space<vmem>>, vector<1x16x32xbf16>
    %102 = vector.shape_cast %101 : vector<1x16x32xbf16> to vector<16x32xbf16>
    %c0_55 = arith.constant 0 : index
    %c0_56 = arith.constant 0 : index
    %103 = vector.load %arg18[%c0_55, %c0_56] : memref<32x64xbf16, #tpu.memory_space<vmem>>, vector<32x64xbf16>
    %cst_57 = arith.constant dense<0.000000e+00> : vector<16x64xf32>
    %104 = tpu.matmul %102, %103, %cst_57 {dimension_numbers = #tpu.dot_dimension_numbers<[1], [0], [0], [1], [0, 0, 1, 1], [], []>} : vector<16x32xbf16>, vector<32x64xbf16>, vector<16x64xf32> -> vector<16x64xf32>
    %c0_58 = arith.constant 0 : index
    %c0_59 = arith.constant 0 : index
    %105 = vector.load %arg19[%c0_58, %c0_59] : memref<1x64xf32, #tpu.memory_space<vmem>>, vector<1x64xf32>
    %106 = vector.broadcast %105 : vector<1x64xf32> to vector<16x64xf32>
    %107 = arith.addf %104, %106 : vector<16x64xf32>
    %c0_60 = arith.constant 0 : index
    %c0_61 = arith.constant 0 : index
    %c0_62 = arith.constant 0 : index
    %108 = vector.load %arg4[%c0_60, %c0_61, %c0_62] : memref<1x8x32xbf16, #tpu.memory_space<vmem>>, vector<1x8x32xbf16>
    %109 = vector.shape_cast %108 : vector<1x8x32xbf16> to vector<8x32xbf16>
    %c0_63 = arith.constant 0 : index
    %c0_64 = arith.constant 0 : index
    %110 = vector.load %arg20[%c0_63, %c0_64] : memref<32x64xbf16, #tpu.memory_space<vmem>>, vector<32x64xbf16>
    %cst_65 = arith.constant dense<0.000000e+00> : vector<8x64xf32>
    %111 = tpu.matmul %109, %110, %cst_65 {dimension_numbers = #tpu.dot_dimension_numbers<[1], [0], [0], [1], [0, 0, 1, 1], [], []>} : vector<8x32xbf16>, vector<32x64xbf16>, vector<8x64xf32> -> vector<8x64xf32>
    %c0_66 = arith.constant 0 : index
    %c0_67 = arith.constant 0 : index
    %112 = vector.load %arg21[%c0_66, %c0_67] : memref<1x64xf32, #tpu.memory_space<vmem>>, vector<1x64xf32>
    %113 = vector.broadcast %112 : vector<1x64xf32> to vector<8x64xf32>
    %114 = arith.addf %111, %113 : vector<8x64xf32>
    %115 = vector.extract_strided_slice %100 {offsets = [0, 0], sizes = [8, 32], strides = [1, 1]} : vector<8x64xf32> to vector<8x32xf32>
    %116 = vector.extract_strided_slice %107 {offsets = [0, 0], sizes = [16, 32], strides = [1, 1]} : vector<16x64xf32> to vector<16x32xf32>
    %117 = vector.extract_strided_slice %107 {offsets = [0, 32], sizes = [16, 32], strides = [1, 1]} : vector<16x64xf32> to vector<16x32xf32>
    %118 = vector.shape_cast %115 : vector<8x32xf32> to vector<8x4x8xf32>
    %119 = arith.truncf %118 : vector<8x4x8xf32> to vector<8x4x8xbf16>
    %120 = vector.shape_cast %116 : vector<16x32xf32> to vector<16x4x8xf32>
    %121 = arith.truncf %120 : vector<16x4x8xf32> to vector<16x4x8xbf16>
    %122 = vector.shape_cast %117 : vector<16x32xf32> to vector<16x4x8xf32>
    %123 = arith.truncf %122 : vector<16x4x8xf32> to vector<16x4x8xbf16>
    "tpu.trace_start"() <{level = 10 : i32, message = "qhd,khd->hqk"}> : () -> ()
    %cst_68 = arith.constant dense<0.000000e+00> : vector<4x8x16xf32>
    %124 = tpu.matmul %119, %121, %cst_68 {dimension_numbers = #tpu.dot_dimension_numbers<[2], [2], [0], [0], [0, 1, 0, 0, 1, 0], [1], [1]>} : vector<8x4x8xbf16>, vector<16x4x8xbf16>, vector<4x8x16xf32> -> vector<4x8x16xf32>
    "tpu.trace_stop"() : () -> ()
    %cst_69 = arith.constant 0.353553385 : f32
    %125 = vector.broadcast %cst_69 : f32 to vector<4x8x16xf32>
    %126 = arith.mulf %124, %125 : vector<4x8x16xf32>
    %127 = vector.shape_cast %13 : vector<8x16xi1> to vector<1x8x16xi1>
    %cst_70 = arith.constant -1.000000e+09 : f32
    %128 = vector.shape_cast %127 : vector<1x8x16xi1> to vector<1x8x16xi1>
    %129 = vector.broadcast %128 : vector<1x8x16xi1> to vector<4x8x16xi1>
    %130 = vector.broadcast %cst_70 : f32 to vector<4x8x16xf32>
    %131 = arith.select %129, %130, %126 : vector<4x8x16xi1>, vector<4x8x16xf32>
    %cst_71 = arith.constant dense<0xFF800000> : vector<4x8xf32>
    %132 = vector.multi_reduction <maximumf>, %131, %cst_71 [2] : vector<4x8x16xf32> to vector<4x8xf32>
    %133 = vector.shape_cast %132 : vector<4x8xf32> to vector<4x8x1xf32>
    %134 = vector.broadcast %133 : vector<4x8x1xf32> to vector<4x8x16xf32>
    %135 = arith.subf %131, %134 : vector<4x8x16xf32>
    %136 = math.exp %135 : vector<4x8x16xf32>
    %cst_72 = arith.constant dense<0.000000e+00> : vector<4x8xf32>
    %137 = vector.multi_reduction <add>, %136, %cst_72 [2] : vector<4x8x16xf32> to vector<4x8xf32>
    %138 = vector.shape_cast %137 : vector<4x8xf32> to vector<4x8x1xf32>
    %cst_73 = arith.constant 1.000000e+00 : f32
    %139 = vector.broadcast %cst_73 : f32 to vector<4x8x1xf32>
    %140 = arith.divf %139, %138 : vector<4x8x1xf32>
    %141 = vector.broadcast %140 : vector<4x8x1xf32> to vector<4x8x16xf32>
    %142 = arith.mulf %136, %141 : vector<4x8x16xf32>
    %143 = arith.truncf %142 : vector<4x8x16xf32> to vector<4x8x16xbf16>
    %c0_74 = arith.constant 0 : index
    %c0_75 = arith.constant 0 : index
    %c0_76 = arith.constant 0 : index
    %c0_77 = arith.constant 0 : index
    %144 = vector.load %arg34[%c0_74, %c0_75, %c0_76, %c0_77] : memref<1x4x8x16xbf16, #tpu.memory_space<vmem>>, vector<1x4x8x16xbf16>
    %145 = vector.shape_cast %144 : vector<1x4x8x16xbf16> to vector<4x8x16xbf16>
    %146 = vector.shape_cast %143 : vector<4x8x16xbf16> to vector<1x4x8x16xbf16>
    tpu.vector_store %arg34[%c0_74, %c0_75, %c0_76, %c0_77], %146 {strides = array<i32>} : memref<1x4x8x16xbf16, #tpu.memory_space<vmem>>, vector<1x4x8x16xbf16>,
    %147 = arith.truncf %142 : vector<4x8x16xf32> to vector<4x8x16xbf16>
    "tpu.trace_start"() <{level = 10 : i32, message = "hqk,khd->qhd"}> : () -> ()
    %cst_78 = arith.constant dense<0.000000e+00> : vector<4x8x8xf32>
    %148 = tpu.matmul %123, %147, %cst_78 {dimension_numbers = #tpu.dot_dimension_numbers<[0], [2], [2], [1], [0, 1, 0, 2, 1, 1], [1], [0]>} : vector<16x4x8xbf16>, vector<4x8x16xbf16>, vector<4x8x8xf32> -> vector<4x8x8xf32>
    %149 = tpu.transpose %148, [2, 0, 1] : vector<4x8x8xf32> -> vector<8x4x8xf32>
    "tpu.trace_stop"() : () -> ()
    %150 = vector.shape_cast %149 : vector<8x4x8xf32> to vector<8x32xf32>
    %151 = vector.extract_strided_slice %100 {offsets = [0, 32], sizes = [8, 32], strides = [1, 1]} : vector<8x64xf32> to vector<8x32xf32>
    %152 = vector.extract_strided_slice %114 {offsets = [0, 0], sizes = [8, 32], strides = [1, 1]} : vector<8x64xf32> to vector<8x32xf32>
    %153 = vector.extract_strided_slice %114 {offsets = [0, 32], sizes = [8, 32], strides = [1, 1]} : vector<8x64xf32> to vector<8x32xf32>
    %154 = vector.shape_cast %151 : vector<8x32xf32> to vector<8x4x8xf32>
    %155 = arith.truncf %154 : vector<8x4x8xf32> to vector<8x4x8xbf16>
    %156 = vector.shape_cast %152 : vector<8x32xf32> to vector<8x4x8xf32>
    %157 = arith.truncf %156 : vector<8x4x8xf32> to vector<8x4x8xbf16>
    %158 = vector.shape_cast %153 : vector<8x32xf32> to vector<8x4x8xf32>
    %159 = arith.truncf %158 : vector<8x4x8xf32> to vector<8x4x8xbf16>
    "tpu.trace_start"() <{level = 10 : i32, message = "qhd,khd->hqk"}> : () -> ()
    %cst_79 = arith.constant dense<0.000000e+00> : vector<4x8x8xf32>
    %160 = tpu.matmul %155, %157, %cst_79 {dimension_numbers = #tpu.dot_dimension_numbers<[2], [2], [0], [0], [0, 1, 0, 0, 1, 0], [1], [1]>} : vector<8x4x8xbf16>, vector<8x4x8xbf16>, vector<4x8x8xf32> -> vector<4x8x8xf32>
    "tpu.trace_stop"() : () -> ()
    %cst_80 = arith.constant 0.353553385 : f32
    %161 = vector.broadcast %cst_80 : f32 to vector<4x8x8xf32>
    %162 = arith.mulf %160, %161 : vector<4x8x8xf32>
    %163 = vector.shape_cast %18 : vector<8x8xi1> to vector<1x8x8xi1>
    %cst_81 = arith.constant -1.000000e+09 : f32
    %164 = vector.shape_cast %163 : vector<1x8x8xi1> to vector<1x8x8xi1>
    %165 = vector.broadcast %164 : vector<1x8x8xi1> to vector<4x8x8xi1>
    %166 = vector.broadcast %cst_81 : f32 to vector<4x8x8xf32>
    %167 = arith.select %165, %166, %162 : vector<4x8x8xi1>, vector<4x8x8xf32>
    %cst_82 = arith.constant dense<0xFF800000> : vector<4x8xf32>
    %168 = vector.multi_reduction <maximumf>, %167, %cst_82 [2] : vector<4x8x8xf32> to vector<4x8xf32>
    %169 = vector.shape_cast %168 : vector<4x8xf32> to vector<4x8x1xf32>
    %170 = vector.broadcast %169 : vector<4x8x1xf32> to vector<4x8x8xf32>
    %171 = arith.subf %167, %170 : vector<4x8x8xf32>
    %172 = math.exp %171 : vector<4x8x8xf32>
    %cst_83 = arith.constant dense<0.000000e+00> : vector<4x8xf32>
    %173 = vector.multi_reduction <add>, %172, %cst_83 [2] : vector<4x8x8xf32> to vector<4x8xf32>
    %174 = vector.shape_cast %173 : vector<4x8xf32> to vector<4x8x1xf32>
    %cst_84 = arith.constant 1.000000e+00 : f32
    %175 = vector.broadcast %cst_84 : f32 to vector<4x8x1xf32>
    %176 = arith.divf %175, %174 : vector<4x8x1xf32>
    %177 = vector.broadcast %176 : vector<4x8x1xf32> to vector<4x8x8xf32>
    %178 = arith.mulf %172, %177 : vector<4x8x8xf32>
    %179 = arith.truncf %178 : vector<4x8x8xf32> to vector<4x8x8xbf16>
    %c0_85 = arith.constant 0 : index
    %c0_86 = arith.constant 0 : index
    %c0_87 = arith.constant 0 : index
    %c0_88 = arith.constant 0 : index
    %180 = vector.load %arg35[%c0_85, %c0_86, %c0_87, %c0_88] : memref<1x4x8x8xbf16, #tpu.memory_space<vmem>>, vector<1x4x8x8xbf16>
    %181 = vector.shape_cast %180 : vector<1x4x8x8xbf16> to vector<4x8x8xbf16>
    %182 = vector.shape_cast %179 : vector<4x8x8xbf16> to vector<1x4x8x8xbf16>
    tpu.vector_store %arg35[%c0_85, %c0_86, %c0_87, %c0_88], %182 {strides = array<i32>} : memref<1x4x8x8xbf16, #tpu.memory_space<vmem>>, vector<1x4x8x8xbf16>,
    %183 = arith.truncf %178 : vector<4x8x8xf32> to vector<4x8x8xbf16>
    "tpu.trace_start"() <{level = 10 : i32, message = "hqk,khd->qhd"}> : () -> ()
    %cst_89 = arith.constant dense<0.000000e+00> : vector<4x8x8xf32>
    %184 = tpu.matmul %159, %183, %cst_89 {dimension_numbers = #tpu.dot_dimension_numbers<[0], [2], [2], [1], [0, 1, 0, 2, 1, 1], [1], [0]>} : vector<8x4x8xbf16>, vector<4x8x8xbf16>, vector<4x8x8xf32> -> vector<4x8x8xf32>
    %185 = tpu.transpose %184, [2, 0, 1] : vector<4x8x8xf32> -> vector<8x4x8xf32>
    "tpu.trace_stop"() : () -> ()
    %186 = vector.shape_cast %185 : vector<8x4x8xf32> to vector<8x32xf32>
    %187 = tpu.concatenate %150, %186 in 1 : vector<8x32xf32>, vector<8x32xf32> -> vector<8x64xf32>
    %188 = arith.truncf %187 : vector<8x64xf32> to vector<8x64xbf16>
    %c0_90 = arith.constant 0 : index
    %c0_91 = arith.constant 0 : index
    %189 = vector.load %arg22[%c0_90, %c0_91] : memref<64x32xbf16, #tpu.memory_space<vmem>>, vector<64x32xbf16>
    %cst_92 = arith.constant dense<0.000000e+00> : vector<8x32xf32>
    %190 = tpu.matmul %188, %189, %cst_92 {dimension_numbers = #tpu.dot_dimension_numbers<[1], [0], [0], [1], [0, 0, 1, 1], [], []>} : vector<8x64xbf16>, vector<64x32xbf16>, vector<8x32xf32> -> vector<8x32xf32>
    %c0_93 = arith.constant 0 : index
    %c0_94 = arith.constant 0 : index
    %191 = vector.load %arg23[%c0_93, %c0_94] : memref<1x32xf32, #tpu.memory_space<vmem>>, vector<1x32xf32>
    %192 = vector.broadcast %191 : vector<1x32xf32> to vector<8x32xf32>
    %193 = arith.addf %190, %192 : vector<8x32xf32>
    %194 = arith.addf %193, %94 : vector<8x32xf32>
    %c0_95 = arith.constant 0 : index
    %c0_96 = arith.constant 0 : index
    %195 = vector.load %arg24[%c0_95, %c0_96] : memref<1x32xf32, #tpu.memory_space<vmem>>, vector<1x32xf32>
    %c0_97 = arith.constant 0 : index
    %c0_98 = arith.constant 0 : index
    %196 = vector.load %arg25[%c0_97, %c0_98] : memref<1x32xf32, #tpu.memory_space<vmem>>, vector<1x32xf32>
    %cst_99 = arith.constant dense<0.000000e+00> : vector<8xf32>
    %197 = vector.multi_reduction <add>, %194, %cst_99 [1] : vector<8x32xf32> to vector<8xf32>
    %198 = vector.shape_cast %197 : vector<8xf32> to vector<8x1xf32>
    %cst_100 = arith.constant 3.200000e+01 : f32
    %199 = vector.broadcast %cst_100 : f32 to vector<8x1xf32>
    %200 = arith.divf %198, %199 : vector<8x1xf32>
    %201 = vector.broadcast %200 : vector<8x1xf32> to vector<8x32xf32>
    %202 = arith.subf %194, %201 : vector<8x32xf32>
    %203 = arith.mulf %202, %202 : vector<8x32xf32>
    %cst_101 = arith.constant dense<0.000000e+00> : vector<8xf32>
    %204 = vector.multi_reduction <add>, %203, %cst_101 [1] : vector<8x32xf32> to vector<8xf32>
    %205 = vector.shape_cast %204 : vector<8xf32> to vector<8x1xf32>
    %cst_102 = arith.constant 3.200000e+01 : f32
    %206 = vector.broadcast %cst_102 : f32 to vector<8x1xf32>
    %207 = arith.divf %205, %206 : vector<8x1xf32>
    %208 = vector.broadcast %200 : vector<8x1xf32> to vector<8x32xf32>
    %209 = arith.subf %194, %208 : vector<8x32xf32>
    %cst_103 = arith.constant 9.99999974E-6 : f32
    %210 = vector.broadcast %cst_103 : f32 to vector<8x1xf32>
    %211 = arith.addf %207, %210 : vector<8x1xf32>
    %212 = math.rsqrt %211 : vector<8x1xf32>
    %213 = vector.broadcast %212 : vector<8x1xf32> to vector<8x32xf32>
    %214 = arith.mulf %209, %213 : vector<8x32xf32>
    %215 = vector.broadcast %195 : vector<1x32xf32> to vector<8x32xf32>
    %216 = arith.mulf %214, %215 : vector<8x32xf32>
    %217 = vector.broadcast %196 : vector<1x32xf32> to vector<8x32xf32>
    %218 = arith.addf %216, %217 : vector<8x32xf32>
    %219 = arith.truncf %218 : vector<8x32xf32> to vector<8x32xbf16>
    %c0_104 = arith.constant 0 : index
    %c0_105 = arith.constant 0 : index
    %220 = vector.load %arg26[%c0_104, %c0_105] : memref<32x64xbf16, #tpu.memory_space<vmem>>, vector<32x64xbf16>
    %cst_106 = arith.constant dense<0.000000e+00> : vector<8x64xf32>
    %221 = tpu.matmul %219, %220, %cst_106 {dimension_numbers = #tpu.dot_dimension_numbers<[1], [0], [0], [1], [0, 0, 1, 1], [], []>} : vector<8x32xbf16>, vector<32x64xbf16>, vector<8x64xf32> -> vector<8x64xf32>
    %c0_107 = arith.constant 0 : index
    %c0_108 = arith.constant 0 : index
    %222 = vector.load %arg27[%c0_107, %c0_108] : memref<1x64xf32, #tpu.memory_space<vmem>>, vector<1x64xf32>
    %223 = vector.broadcast %222 : vector<1x64xf32> to vector<8x64xf32>
    %224 = arith.addf %221, %223 : vector<8x64xf32>
    %cst_109 = arith.constant 5.000000e-01 : f32
    %225 = vector.broadcast %cst_109 : f32 to vector<8x64xf32>
    %226 = arith.mulf %225, %224 : vector<8x64xf32>
    %cst_110 = arith.constant 4.471500e-02 : f32
    %227 = vector.broadcast %cst_110 : f32 to vector<8x64xf32>
    %228 = arith.mulf %227, %224 : vector<8x64xf32>
    %229 = arith.mulf %228, %224 : vector<8x64xf32>
    %230 = arith.mulf %229, %224 : vector<8x64xf32>
    %231 = arith.addf %224, %230 : vector<8x64xf32>
    %cst_111 = arith.constant 0.797884583 : f32
    %232 = vector.broadcast %cst_111 : f32 to vector<8x64xf32>
    %233 = arith.mulf %232, %231 : vector<8x64xf32>
    %234 = math.tanh %233 : vector<8x64xf32>
    %cst_112 = arith.constant 1.000000e+00 : f32
    %235 = vector.broadcast %cst_112 : f32 to vector<8x64xf32>
    %236 = arith.addf %235, %234 : vector<8x64xf32>
    %237 = arith.mulf %226, %236 : vector<8x64xf32>
    %238 = arith.truncf %237 : vector<8x64xf32> to vector<8x64xbf16>
    %c0_113 = arith.constant 0 : index
    %c0_114 = arith.constant 0 : index
    %239 = vector.load %arg28[%c0_113, %c0_114] : memref<64x32xbf16, #tpu.memory_space<vmem>>, vector<64x32xbf16>
    %cst_115 = arith.constant dense<0.000000e+00> : vector<8x32xf32>
    %240 = tpu.matmul %238, %239, %cst_115 {dimension_numbers = #tpu.dot_dimension_numbers<[1], [0], [0], [1], [0, 0, 1, 1], [], []>} : vector<8x64xbf16>, vector<64x32xbf16>, vector<8x32xf32> -> vector<8x32xf32>
    %c0_116 = arith.constant 0 : index
    %c0_117 = arith.constant 0 : index
    %241 = vector.load %arg29[%c0_116, %c0_117] : memref<1x32xf32, #tpu.memory_space<vmem>>, vector<1x32xf32>
    %242 = vector.broadcast %241 : vector<1x32xf32> to vector<8x32xf32>
    %243 = arith.addf %240, %242 : vector<8x32xf32>
    %244 = arith.addf %243, %218 : vector<8x32xf32>
    %c0_118 = arith.constant 0 : index
    %c0_119 = arith.constant 0 : index
    %245 = vector.load %arg30[%c0_118, %c0_119] : memref<1x32xf32, #tpu.memory_space<vmem>>, vector<1x32xf32>
    %c0_120 = arith.constant 0 : index
    %c0_121 = arith.constant 0 : index
    %246 = vector.load %arg31[%c0_120, %c0_121] : memref<1x32xf32, #tpu.memory_space<vmem>>, vector<1x32xf32>
    %cst_122 = arith.constant dense<0.000000e+00> : vector<8xf32>
    %247 = vector.multi_reduction <add>, %244, %cst_122 [1] : vector<8x32xf32> to vector<8xf32>
    %248 = vector.shape_cast %247 : vector<8xf32> to vector<8x1xf32>
    %cst_123 = arith.constant 3.200000e+01 : f32
    %249 = vector.broadcast %cst_123 : f32 to vector<8x1xf32>
    %250 = arith.divf %248, %249 : vector<8x1xf32>
    %251 = vector.broadcast %250 : vector<8x1xf32> to vector<8x32xf32>
    %252 = arith.subf %244, %251 : vector<8x32xf32>
    %253 = arith.mulf %252, %252 : vector<8x32xf32>
    %cst_124 = arith.constant dense<0.000000e+00> : vector<8xf32>
    %254 = vector.multi_reduction <add>, %253, %cst_124 [1] : vector<8x32xf32> to vector<8xf32>
    %255 = vector.shape_cast %254 : vector<8xf32> to vector<8x1xf32>
    %cst_125 = arith.constant 3.200000e+01 : f32
    %256 = vector.broadcast %cst_125 : f32 to vector<8x1xf32>
    %257 = arith.divf %255, %256 : vector<8x1xf32>
    %258 = vector.broadcast %250 : vector<8x1xf32> to vector<8x32xf32>
    %259 = arith.subf %244, %258 : vector<8x32xf32>
    %cst_126 = arith.constant 9.99999974E-6 : f32
    %260 = vector.broadcast %cst_126 : f32 to vector<8x1xf32>
    %261 = arith.addf %257, %260 : vector<8x1xf32>
    %262 = math.rsqrt %261 : vector<8x1xf32>
    %263 = vector.broadcast %262 : vector<8x1xf32> to vector<8x32xf32>
    %264 = arith.mulf %259, %263 : vector<8x32xf32>
    %265 = vector.broadcast %245 : vector<1x32xf32> to vector<8x32xf32>
    %266 = arith.mulf %264, %265 : vector<8x32xf32>
    %267 = vector.broadcast %246 : vector<1x32xf32> to vector<8x32xf32>
    %268 = arith.addf %266, %267 : vector<8x32xf32>
    %c0_127 = arith.constant 0 : index
    %c0_128 = arith.constant 0 : index
    %c0_129 = arith.constant 0 : index
    %269 = vector.load %arg32[%c0_127, %c0_128, %c0_129] : memref<1x8x32xf32, #tpu.memory_space<vmem>>, vector<1x8x32xf32>
    %270 = vector.shape_cast %269 : vector<1x8x32xf32> to vector<8x32xf32>
    %271 = vector.shape_cast %268 : vector<8x32xf32> to vector<1x8x32xf32>
    tpu.vector_store %arg32[%c0_127, %c0_128, %c0_129], %271 {strides = array<i32>} : memref<1x8x32xf32, #tpu.memory_space<vmem>>, vector<1x8x32xf32>,
    return
  }
  func.func @transform_0(%arg0: i32, %arg1: i32) -> (i32, i32, i32) {
    %c0_i32 = arith.constant 0 : i32
    %c0_i32_0 = arith.constant 0 : i32
    %c0_i32_1 = arith.constant 0 : i32
    return %arg0, %c0_i32, %c0_i32_0 : i32, i32, i32
  }
  func.func @transform_1(%arg0: i32, %arg1: i32) -> (i32, i32, i32) {
    %c0_i32 = arith.constant 0 : i32
    %c0_i32_0 = arith.constant 0 : i32
    %c0_i32_1 = arith.constant 0 : i32
    return %arg0, %c0_i32, %c0_i32_0 : i32, i32, i32
  }
  func.func @transform_2(%arg0: i32, %arg1: i32) -> (i32, i32, i32) {
    %c0_i32 = arith.constant 0 : i32
    %c0_i32_0 = arith.constant 0 : i32
    %c0_i32_1 = arith.constant 0 : i32
    return %arg0, %c0_i32, %c0_i32_0 : i32, i32, i32
  }
  func.func @transform_3(%arg0: i32, %arg1: i32) -> (i32, i32, i32) {
    %c0_i32 = arith.constant 0 : i32
    %c0_i32_0 = arith.constant 0 : i32
    return %arg0, %arg1, %c0_i32 : i32, i32, i32
  }
  func.func @transform_4(%arg0: i32, %arg1: i32) -> (i32, i32, i32) {
    %c0_i32 = arith.constant 0 : i32
    %c0_i32_0 = arith.constant 0 : i32
    return %arg0, %arg1, %c0_i32 : i32, i32, i32
  }
  func.func @transform_5(%arg0: i32, %arg1: i32) -> (i32, i32, i32) {
    %c0_i32 = arith.constant 0 : i32
    %c0_i32_0 = arith.constant 0 : i32
    return %arg0, %arg1, %c0_i32 : i32, i32, i32
  }
  func.func @transform_6(%arg0: i32, %arg1: i32) -> (i32, i32) {
    %c0_i32 = arith.constant 0 : i32
    %c0_i32_0 = arith.constant 0 : i32
    %c0_i32_1 = arith.constant 0 : i32
    return %c0_i32, %c0_i32_0 : i32, i32
  }
  func.func @transform_7(%arg0: i32, %arg1: i32) -> (i32, i32) {
    %c0_i32 = arith.constant 0 : i32
    %c0_i32_0 = arith.constant 0 : i32
    %c0_i32_1 = arith.constant 0 : i32
    return %c0_i32, %c0_i32_0 : i32, i32
  }
  func.func @transform_8(%arg0: i32, %arg1: i32) -> (i32, i32) {
    %c0_i32 = arith.constant 0 : i32
    %c0_i32_0 = arith.constant 0 : i32
    %c0_i32_1 = arith.constant 0 : i32
    return %c0_i32, %c0_i32_0 : i32, i32
  }
  func.func @transform_9(%arg0: i32, %arg1: i32) -> (i32, i32) {
    %c0_i32 = arith.constant 0 : i32
    %c0_i32_0 = arith.constant 0 : i32
    %c0_i32_1 = arith.constant 0 : i32
    return %c0_i32, %c0_i32_0 : i32, i32
  }
  func.func @transform_10(%arg0: i32, %arg1: i32) -> (i32, i32) {
    %c0_i32 = arith.constant 0 : i32
    %c0_i32_0 = arith.constant 0 : i32
    %c0_i32_1 = arith.constant 0 : i32
    return %c0_i32, %c0_i32_0 : i32, i32
  }
  func.func @transform_11(%arg0: i32, %arg1: i32) -> (i32, i32) {
    %c0_i32 = arith.constant 0 : i32
    %c0_i32_0 = arith.constant 0 : i32
    %c0_i32_1 = arith.constant 0 : i32
    return %c0_i32, %c0_i32_0 : i32, i32
  }
  func.func @transform_12(%arg0: i32, %arg1: i32) -> (i32, i32) {
    %c0_i32 = arith.constant 0 : i32
    %c0_i32_0 = arith.constant 0 : i32
    %c0_i32_1 = arith.constant 0 : i32
    return %c0_i32, %c0_i32_0 : i32, i32
  }
  func.func @transform_13(%arg0: i32, %arg1: i32) -> (i32, i32) {
    %c0_i32 = arith.constant 0 : i32
    %c0_i32_0 = arith.constant 0 : i32
    %c0_i32_1 = arith.constant 0 : i32
    return %c0_i32, %c0_i32_0 : i32, i32
  }
  func.func @transform_14(%arg0: i32, %arg1: i32) -> (i32, i32) {
    %c0_i32 = arith.constant 0 : i32
    %c0_i32_0 = arith.constant 0 : i32
    %c0_i32_1 = arith.constant 0 : i32
    return %c0_i32, %c0_i32_0 : i32, i32
  }
  func.func @transform_15(%arg0: i32, %arg1: i32) -> (i32, i32) {
    %c0_i32 = arith.constant 0 : i32
    %c0_i32_0 = arith.constant 0 : i32
    %c0_i32_1 = arith.constant 0 : i32
    return %c0_i32, %c0_i32_0 : i32, i32
  }
  func.func @transform_16(%arg0: i32, %arg1: i32) -> (i32, i32) {
    %c0_i32 = arith.constant 0 : i32
    %c0_i32_0 = arith.constant 0 : i32
    %c0_i32_1 = arith.constant 0 : i32
    return %c0_i32, %c0_i32_0 : i32, i32
  }
  func.func @transform_17(%arg0: i32, %arg1: i32) -> (i32, i32) {
    %c0_i32 = arith.constant 0 : i32
    %c0_i32_0 = arith.constant 0 : i32
    %c0_i32_1 = arith.constant 0 : i32
    return %c0_i32, %c0_i32_0 : i32, i32
  }
  func.func @transform_18(%arg0: i32, %arg1: i32) -> (i32, i32) {
    %c0_i32 = arith.constant 0 : i32
    %c0_i32_0 = arith.constant 0 : i32
    %c0_i32_1 = arith.constant 0 : i32
    return %c0_i32, %c0_i32_0 : i32, i32
  }
  func.func @transform_19(%arg0: i32, %arg1: i32) -> (i32, i32) {
    %c0_i32 = arith.constant 0 : i32
    %c0_i32_0 = arith.constant 0 : i32
    %c0_i32_1 = arith.constant 0 : i32
    return %c0_i32, %c0_i32_0 : i32, i32
  }
  func.func @transform_20(%arg0: i32, %arg1: i32) -> (i32, i32) {
    %c0_i32 = arith.constant 0 : i32
    %c0_i32_0 = arith.constant 0 : i32
    %c0_i32_1 = arith.constant 0 : i32
    return %c0_i32, %c0_i32_0 : i32, i32
  }
  func.func @transform_21(%arg0: i32, %arg1: i32) -> (i32, i32) {
    %c0_i32 = arith.constant 0 : i32
    %c0_i32_0 = arith.constant 0 : i32
    %c0_i32_1 = arith.constant 0 : i32
    return %c0_i32, %c0_i32_0 : i32, i32
  }
  func.func @transform_22(%arg0: i32, %arg1: i32) -> (i32, i32) {
    %c0_i32 = arith.constant 0 : i32
    %c0_i32_0 = arith.constant 0 : i32
    %c0_i32_1 = arith.constant 0 : i32
    return %c0_i32, %c0_i32_0 : i32, i32
  }
  func.func @transform_23(%arg0: i32, %arg1: i32) -> (i32, i32) {
    %c0_i32 = arith.constant 0 : i32
    %c0_i32_0 = arith.constant 0 : i32
    %c0_i32_1 = arith.constant 0 : i32
    return %c0_i32, %c0_i32_0 : i32, i32
  }
  func.func @transform_24(%arg0: i32, %arg1: i32) -> (i32, i32) {
    %c0_i32 = arith.constant 0 : i32
    %c0_i32_0 = arith.constant 0 : i32
    %c0_i32_1 = arith.constant 0 : i32
    return %c0_i32, %c0_i32_0 : i32, i32
  }
  func.func @transform_25(%arg0: i32, %arg1: i32) -> (i32, i32) {
    %c0_i32 = arith.constant 0 : i32
    %c0_i32_0 = arith.constant 0 : i32
    %c0_i32_1 = arith.constant 0 : i32
    return %c0_i32, %c0_i32_0 : i32, i32
  }
  func.func @transform_26(%arg0: i32, %arg1: i32) -> (i32, i32) {
    %c0_i32 = arith.constant 0 : i32
    %c0_i32_0 = arith.constant 0 : i32
    %c0_i32_1 = arith.constant 0 : i32
    return %c0_i32, %c0_i32_0 : i32, i32
  }
  func.func @transform_27(%arg0: i32, %arg1: i32) -> (i32, i32) {
    %c0_i32 = arith.constant 0 : i32
    %c0_i32_0 = arith.constant 0 : i32
    %c0_i32_1 = arith.constant 0 : i32
    return %c0_i32, %c0_i32_0 : i32, i32
  }
  func.func @transform_28(%arg0: i32, %arg1: i32) -> (i32, i32) {
    %c0_i32 = arith.constant 0 : i32
    %c0_i32_0 = arith.constant 0 : i32
    %c0_i32_1 = arith.constant 0 : i32
    return %c0_i32, %c0_i32_0 : i32, i32
  }
  func.func @transform_29(%arg0: i32, %arg1: i32) -> (i32, i32) {
    %c0_i32 = arith.constant 0 : i32
    %c0_i32_0 = arith.constant 0 : i32
    %c0_i32_1 = arith.constant 0 : i32
    return %c0_i32, %c0_i32_0 : i32, i32
  }
  func.func @transform_30(%arg0: i32, %arg1: i32) -> (i32, i32, i32) {
    %c0_i32 = arith.constant 0 : i32
    %c0_i32_0 = arith.constant 0 : i32
    return %arg0, %arg1, %c0_i32 : i32, i32, i32
  }
  func.func @transform_31(%arg0: i32, %arg1: i32) -> (i32, i32, i32, i32) {
    %c0_i32 = arith.constant 0 : i32
    %c0_i32_0 = arith.constant 0 : i32
    %c0_i32_1 = arith.constant 0 : i32
    return %arg0, %c0_i32, %arg1, %c0_i32_0 : i32, i32, i32, i32
  }
  func.func @transform_32(%arg0: i32, %arg1: i32) -> (i32, i32, i32, i32) {
    %c0_i32 = arith.constant 0 : i32
    %c0_i32_0 = arith.constant 0 : i32
    %c0_i32_1 = arith.constant 0 : i32
    return %arg0, %c0_i32, %arg1, %c0_i32_0 : i32, i32, i32, i32
  }
  func.func @transform_33(%arg0: i32, %arg1: i32) -> (i32, i32, i32, i32) {
    %c0_i32 = arith.constant 0 : i32
    %c0_i32_0 = arith.constant 0 : i32
    %c0_i32_1 = arith.constant 0 : i32
    return %arg0, %c0_i32, %arg1, %c0_i32_0 : i32, i32, i32, i32
  }
}

</mosaic_0001>

<bundles_post_ra>
// kernel: tpu_custom_call.1
= control target key start
LH: loop header
LB: loop body
LE: loop exit
PB: predicated region body
PF: predicated region fallthrough
CT: control target
= control target key end

     0   :  { %s9968_s6 = smov 1   ;;  %s9969_s10 = smov 2   ;;  %s11741_s0 = inlined_call_operand.smem [shape: u32[34], index: -1, kind: input, shape index: {}] }
   0x1   :  { %s10039_s5 = sld [smem:[%s11741_s0]]   ;;  %s9970_s14 = smov 3  }
   0x2   :  { %s10044_s9 = sld [smem:[%s11741_s0 + %s9968_s6]]   ;;  %s9971_s18 = smov 4  }
   0x3   :  { %s10049_s13 = sld [smem:[%s11741_s0 + %s9969_s10]]   ;;  %s9972_s22 = smov 5  }
   0x4   :  { %s10054_s17 = sld [smem:[%s11741_s0 + %s9970_s14]]   ;;  %s9973_s26 = smov 6  }
   0x5   :  { %s10059_s21 = sld [smem:[%s11741_s0 + %s9971_s18]]   ;;  %s9974_s30 = smov 7  }
   0x6   :  { %s10064_s25 = sld [smem:[%s11741_s0 + %s9972_s22]]   ;;  %s9975_s4 = smov 8  }
   0x7   :  { %11791 = sst [smem:[#allocation36_spill]] %s10039_s5  ;;  %s9976_s10 = smov 9  }
   0x8   :  { %11792 = sst [smem:[#allocation37_spill]] %s10044_s9  ;;  %s9977_s15 = smov 10  }
   0x9   :  { %s10069_s29 = sld [smem:[%s11741_s0 + %s9973_s26]]   ;;  %s9978_s20 = smov 11  }
   0xa   :  { %11793 = sst [smem:[#allocation38_spill]] %s10054_s17  ;;  %s9979_s26 = smov 12  }
   0xb   :  { %s10074_s3 = sld [smem:[%s11741_s0 + %s9974_s30]]   ;;  %s9980_s1 = smov 13  }
   0xc   :  { %s10079_s8 = sld [smem:[%s11741_s0 + %s9975_s4]]   ;;  %s9981_s7 = smov 14  }
   0xd   :  { %s10084_s14 = sld [smem:[%s11741_s0 + %s9976_s10]]   ;;  %s9983_s22 = smov 16  }
   0xe   :  { %s10089_s19 = sld [smem:[%s11741_s0 + %s9977_s15]]   ;;  %s9982_s15 = smov 15  }
   0xf   :  { %11794 = sst [smem:[#allocation39_spill]] %s10069_s29  ;;  %s9984_s28 = smov 17  }
  0x10   :  { %s10094_s24 = sld [smem:[%s11741_s0 + %s9978_s20]]  }
  0x11   :  { %11795 = sst [smem:[#allocation40_spill]] %s10074_s3 }
  0x12   :  { %11796 = sst [smem:[#allocation41_spill]] %s10079_s8 }
  0x13   :  { %11797 = sst [smem:[#allocation42_spill]] %s10084_s14 }
  0x14   :  { %11798 = sst [smem:[#allocation43_spill]] %s10089_s19 }
  0x15   :  { %s10099_s30 = sld [smem:[%s11741_s0 + %s9979_s26]]  }
  0x16   :  { %s10104_s6 = sld [smem:[%s11741_s0 + %s9980_s1]]  }
  0x17   :  { %s10109_s12 = sld [smem:[%s11741_s0 + %s9981_s7]]   ;;  %s9985_s7 = smov 18  }
  0x18   :  { %s10114_s20 = sld [smem:[%s11741_s0 + %s9982_s15]]   ;;  %s9986_s15 = smov 19  }
  0x19   :  { %s10119_s27 = sld [smem:[%s11741_s0 + %s9983_s22]]   ;;  %s9987_s22 = smov 20  }
  0x1a   :  { %s10124_s4 = sld [smem:[%s11741_s0 + %s9984_s28]]   ;;  %s9988_s28 = smov 21  }
  0x1b   :  { %11799 = sst [smem:[#allocation44_spill]] %s10099_s30 }
  0x1c   :  { %11800 = sst [smem:[#allocation45_spill]] %s10104_s6 }
  0x1d   :  { %11801 = sst [smem:[#allocation46_spill]] %s10109_s12 }
  0x1e   :  { %11802 = sst [smem:[#allocation47_spill]] %s10114_s20 }
  0x1f   :  { %11803 = sst [smem:[#allocation48_spill]] %s10119_s27 }
  0x20   :  { %11804 = sst [smem:[#allocation49_spill]] %s10124_s4 }
  0x21   :  { %s10129_s12 = sld [smem:[%s11741_s0 + %s9985_s7]]   ;;  %s9989_s7 = smov 22  }
  0x22   :  { %s10134_s9 = sld [smem:[%s11741_s0 + %s9986_s15]]   ;;  %s9990_s15 = smov 23  }
  0x23   :  { %s10139_s27 = sld [smem:[%s11741_s0 + %s9987_s22]]   ;;  %s9991_s22 = smov 24  }
  0x24   :  { %s10144_s19 = sld [smem:[%s11741_s0 + %s9988_s28]]   ;;  %s9992_s28 = smov 25  }
  0x27   :  { %11805 = sst [smem:[#allocation50_spill]] %s10129_s12 }
  0x28   :  { %11806 = sst [smem:[#allocation51_spill]] %s10134_s9 }
  0x29   :  { %11807 = sst [smem:[#allocation52_spill]] %s10139_s27 }
  0x2a   :  { %11808 = sst [smem:[#allocation53_spill]] %s10144_s19 }
  0x2b   :  { %s10149_s12 = sld [smem:[%s11741_s0 + %s9989_s7]]   ;;  %s9993_s7 = smov 26  }
  0x2c   :  { %s10154_s9 = sld [smem:[%s11741_s0 + %s9990_s15]]   ;;  %s9994_s15 = smov 27  }
  0x2d   :  { %s10159_s27 = sld [smem:[%s11741_s0 + %s9991_s22]]   ;;  %s9995_s22 = smov 28  }
  0x2e   :  { %s10164_s19 = sld [smem:[%s11741_s0 + %s9992_s28]]   ;;  %s9996_s28 = smov 29  }
  0x31   :  { %11809 = sst [smem:[#allocation54_spill]] %s10149_s12 }
  0x32   :  { %11810 = sst [smem:[#allocation55_spill]] %s10154_s9 }
  0x33   :  { %11811 = sst [smem:[#allocation56_spill]] %s10159_s27 }
  0x34   :  { %11812 = sst [smem:[#allocation57_spill]] %s10164_s19 }
  0x35   :  { %s10169_s12 = sld [smem:[%s11741_s0 + %s9993_s7]]   ;;  %s9997_s7 = smov 30  }
  0x36   :  { %s10174_s9 = sld [smem:[%s11741_s0 + %s9994_s15]]   ;;  %s9998_s15 = smov 31  }
  0x37   :  { %s10179_s27 = sld [smem:[%s11741_s0 + %s9995_s22]]   ;;  %s9999_s22 = smov 32  }
  0x38   :  { %s10184_s19 = sld [smem:[%s11741_s0 + %s9996_s28]]   ;;  %s10000_s28 = smov 33  }
  0x3b   :  { %11813 = sst [smem:[#allocation58_spill]] %s10169_s12 }
  0x3c   :  { %11814 = sst [smem:[#allocation59_spill]] %s10174_s9 }
  0x3d   :  { %11815 = sst [smem:[#allocation60_spill]] %s10179_s27 }
  0x3e   :  { %11816 = sst [smem:[#allocation61_spill]] %s10184_s19 }
  0x3f   :  { %s10189_s12 = sld [smem:[%s11741_s0 + %s9997_s7]]  }
  0x40   :  { %s10194_s9 = sld [smem:[%s11741_s0 + %s9998_s15]]  }
  0x41   :  { %s10199_s27 = sld [smem:[%s11741_s0 + %s9999_s22]]  }
  0x42   :  { %s10204_s19 = sld [smem:[%s11741_s0 + %s10000_s28]]  }
  0x45   :  { %11817 = sst [smem:[#allocation62_spill]] %s10189_s12 }
  0x46   :  { %11818 = sst [smem:[#allocation63_spill]] %s10194_s9 }
  0x47   :  { %11819 = sst [smem:[#allocation64_spill]] %s10199_s27 }
  0x48   :  { %11820 = sst [smem:[#allocation65_spill]] %s10204_s19 }
  0x49   :  { %73 = vsyncpa [#allocation3], 0 }
  0x4a   :  { %75 = vsyncpa [#allocation3 + $0x1], 0 }
  0x4b   :  { %76 = vsyncpa [#allocation6], 0 }
  0x4c   :  { %78 = vsyncpa [#allocation6 + $0x1], 0 }
  0x4d   :  { %79 = vsyncpa [#allocation9], 0 }
  0x4e   :  { %81 = vsyncpa [#allocation9 + $0x1], 0 }
  0x4f   :  { %82 = vsyncpa [#allocation12], 0 }
  0x50   :  { %83 = vsyncpa [#allocation15], 0 }
  0x51   :  { %84 = vsyncpa [#allocation18], 0 }
  0x52   :  { %85 = vsyncpa [#allocation4], 0 }
  0x53   :  { %87 = vsyncpa [#allocation4 + $0x1], 0 }
  0x54   :  { %88 = vsyncpa [#allocation22], 0 }
  0x55   :  { %90 = vsyncpa [#allocation22 + $0x1], 0 }
  0x56   :  { %91 = vsyncpa [#allocation25], 0 }
  0x57   :  { %93 = vsyncpa [#allocation25 + $0x1], 0  ;;  %s10206_s7 = smov 0   ;;  %s10208_s10 = smov 0  }
  0x58   :  { %s10210_s0 = smov 0   ;;  %s10212_s11 = smov 0  }
  0x59   :  { %s10214_s15 = smov 0   ;;  %s10216_s16 = smov 0  }
  0x5a LB: > { %s11821_s6 = sld [smem:[#allocation45_spill]]  ;;  %s11822_s4 = sld [smem:[#allocation49_spill]]  ;;  %s9946_s7 = sphi %s10206_s7, %s11907_s7   ;;  %s9966_s16 = sphi %s10216_s16, %s99_s16   ;;  %s9962_s15 = sphi %s10214_s15, %s11910_s15   ;;  %s9958_s11 = sphi %s10212_s11, %s11909_s11   ;;  %s9954_s0 = sphi %s10210_s0, %s11905_s0   ;;  %s9950_s10 = sphi %s10208_s10, %s11908_s10  }
  0x5b   : > { %s11823_s17 = sld [smem:[#allocation38_spill]]  ;;  %s11824_s30 = sld [smem:[#allocation44_spill]] }
  0x5c   : > { %s11825_s20 = sld [smem:[#allocation47_spill]]  ;;  %s11826_s14 = sld [smem:[#allocation42_spill]] }
  0x5d   : > { %s11827_s3 = sld [smem:[#allocation40_spill]]  ;;  %11828 = sst [smem:[#allocation66_spill]] %s9946_s7 }
  0x5e   : > { %11829 = sst [smem:[#allocation67_spill]] %s9954_s0  ;;  %s10237_s18 = sadd.s32 4294967295, %s9966_s16  }
  0x5f   : > { %p8716_p0 = scmp.ge.s32.totalorder %s9966_s16, 1  ;;  %p11752_p1 = scmp.eq.s32.totalorder %s10237_s18, 0 }
  0x60   : > { %p894_p2 = scmp.lt.s32.totalorder %s9966_s16, 3  ;;  %s10001_s23 = smov [#allocation10]  }
  0x61   : > { %s910_s26 = sshll.u32 %s10001_s23, 4  ;;  %s10002_s28 = smov [#allocation11]   ;;  %s911_s26 = int_to_ptr.vmem [resolvable:$true] %s910_s26 }
  0x62   : > { %p10242_p3 = pnand %p8716_p0, %p894_p2  ;;  %s924_s1 = sshll.u32 %s10002_s28, 4  ;;  %s10255_s1 = int_to_ptr.vmem [resolvable:$true] %s924_s1 }
  0x63   : > { %s10003_s12 = smov [#allocation14]   ;;  %s9452_s23 = scalar_lea.hbm %s11827_s3, 16 }
  0x64   : > { %s11830_s22 = scalar_select %p10242_p3, 1, 0 }
  0x65   : > { %p9205_p5 = pneg %p10242_p3  ;;  %s949_s19 = sshll.u32 %s10003_s12, 4  ;;  %s10257_s19 = int_to_ptr.vmem [resolvable:$true] %s949_s19 }
  0x66   : > { %p9453_p7 = scmp.ne.s32.totalorder %s11827_s3, %s9452_s23  ;;  %p9459_p11 = scmp.lt.u32.totalorder %s9452_s23, %s11827_s3 }
  0x67   : > { %p10251_p6 = pnand %p9205_p5, %p11752_p1 }
  0x69   : > { %s11831_s2 = scalar_select %p10251_p6, 1, 0 }
  0x6a   : > { %p10263_p8 = pneg %p10251_p6 }
  0x6c   : > { %s11832_s27 = scalar_select %p10263_p8, 1, 0 }
  0x6d   : > { %p9455_p9 = pnand %p10263_p8, %p9453_p7 }
  0x6f   : > { %p9456_p10 = pneg %p9455_p9 }
  0x71   : > { %p9461_p12 = pnand %p9459_p11, %p9456_p10 }
  0x73   : > { %9464 = shalt.err (!%p9461_p12)
}
  0x74   : > { %s9465_s28 = scalar_lea.vmem %s911_s26, 16  ;;  %s9472_s12 = scalar_lea.vmem %s911_s26, 32 }
  0x75   : > { %p9466_p13 = scmp.ne.s32.totalorder %s911_s26, %s9465_s28  ;;  %p9473_p5 = scmp.lt.s32.totalorder %s911_s26, %s911_s26 }
  0x76   : > { %p9474_p4 = scmp.lt.s32.totalorder %s9472_s12, %s9465_s28 }
  0x77   : > { %p9468_p0 = pnand %p9466_p13, %p10263_p8 }
  0x78   : > { %p9475_p1 = por %p9474_p4, %p9473_p5 }
  0x79   : > { %p9469_p2 = pneg %p9468_p0 }
  0x7b   : > { %p9476_p3 = pnand %p9475_p1, %p9469_p2 }
  0x7d   : > { %9479 = shalt.err (!%p9476_p3)
}
  0x7e   : > { %9208 = dma.hbm_to_vmem [thread:$0]  (!%p10251_p6), %s11827_s3, 16, %s911_s26, [#allocation9]  }
  0x7f   : > { %s9480_s23 = scalar_lea.hbm %s11826_s14, 16 }
  0x80   : > { %p9481_p7 = scmp.ne.s32.totalorder %s11826_s14, %s9480_s23  ;;  %p9487_p11 = scmp.lt.u32.totalorder %s9480_s23, %s11826_s14 }
  0x82   : > { %p9483_p9 = pnand %p9481_p7, %p10263_p8 }
  0x84   : > { %p9484_p10 = pneg %p9483_p9 }
  0x86   : > { %p9489_p12 = pnand %p9487_p11, %p9484_p10 }
  0x88   : > { %9492 = shalt.err (!%p9489_p12)
}
  0x89   : > { %s9493_s28 = scalar_lea.vmem %s10255_s1, 16  ;;  %s9500_s12 = scalar_lea.vmem %s10255_s1, 32 }
  0x8a   : > { %p9494_p1 = scmp.ne.s32.totalorder %s10255_s1, %s9493_s28  ;;  %p9501_p13 = scmp.lt.s32.totalorder %s10255_s1, %s10255_s1 }
  0x8b   : > { %p9502_p0 = scmp.lt.s32.totalorder %s9500_s12, %s9493_s28 }
  0x8c   : > { %p9496_p3 = pnand %p9494_p1, %p10263_p8 }
  0x8d   : > { %p9503_p2 = por %p9502_p0, %p9501_p13 }
  0x8e   : > { %p9497_p4 = pneg %p9496_p3 }
  0x90   : > { %p9504_p5 = pnand %p9503_p2, %p9497_p4 }
  0x92   : > { %9507 = shalt.err (!%p9504_p5)
}
  0x93   : > { %9211 = dma.hbm_to_vmem [thread:$0]  (!%p10251_p6), %s11826_s14, 16, %s10255_s1, [#allocation12]  }
  0x94   : > { %s9508_s26 = scalar_lea.hbm %s11824_s30, 16 }
  0x95   : > { %p9509_p7 = scmp.ne.s32.totalorder %s11824_s30, %s9508_s26  ;;  %p9515_p11 = scmp.lt.u32.totalorder %s9508_s26, %s11824_s30 }
  0x97   : > { %p9511_p9 = pnand %p9509_p7, %p10263_p8 }
  0x99   : > { %p9512_p10 = pneg %p9511_p9 }
  0x9b   : > { %p9517_p12 = pnand %p9515_p11, %p9512_p10 }
  0x9d   : > { %9520 = shalt.err (!%p9517_p12)
}
  0x9e   : > { %s9521_s23 = scalar_lea.vmem %s10257_s19, 16  ;;  %s9528_s28 = scalar_lea.vmem %s10257_s19, 32 }
  0x9f   : > { %p9522_p1 = scmp.ne.s32.totalorder %s10257_s19, %s9521_s23  ;;  %p9529_p13 = scmp.lt.s32.totalorder %s10257_s19, %s10257_s19 }
  0xa0   : > { %p9530_p0 = scmp.lt.s32.totalorder %s9528_s28, %s9521_s23 }
  0xa1   : > { %p9524_p3 = pnand %p9522_p1, %p10263_p8 }
  0xa2   : > { %p9531_p2 = por %p9530_p0, %p9529_p13 }
  0xa3   : > { %p9525_p4 = pneg %p9524_p3 }
  0xa5   : > { %p9532_p5 = pnand %p9531_p2, %p9525_p4 }
  0xa7   : > { %9535 = shalt.err (!%p9532_p5)
}
  0xa8   : > { %9217 = dma.hbm_to_vmem [thread:$0]  (!%p10251_p6), %s11824_s30, 16, %s10257_s19, [#allocation15]  }
  0xa9   : > { %s10004_s1 = smov [#allocation17]   ;;  %s9536_s26 = scalar_lea.hbm %s11825_s20, 16 }
  0xaa   : > { %s974_s12 = sshll.u32 %s10004_s1, 4  ;;  %p9537_p7 = scmp.ne.s32.totalorder %s11825_s20, %s9536_s26  ;;  %s975_s12 = int_to_ptr.vmem [resolvable:$true] %s974_s12 }
  0xab   : > { %p9543_p11 = scmp.lt.u32.totalorder %s9536_s26, %s11825_s20 }
  0xac   : > { %p9539_p9 = pnand %p9537_p7, %p10263_p8 }
  0xae   : > { %p9540_p10 = pneg %p9539_p9 }
  0xb0   : > { %p9545_p12 = pnand %p9543_p11, %p9540_p10 }
  0xb2   : > { %9548 = shalt.err (!%p9545_p12)
}
  0xb3   : > { %s9549_s23 = scalar_lea.vmem %s975_s12, 16  ;;  %s9556_s28 = scalar_lea.vmem %s975_s12, 32 }
  0xb4   : > { %p9550_p1 = scmp.ne.s32.totalorder %s975_s12, %s9549_s23  ;;  %p9557_p13 = scmp.lt.s32.totalorder %s975_s12, %s975_s12 }
  0xb5   : > { %p9558_p0 = scmp.lt.s32.totalorder %s9556_s28, %s9549_s23 }
  0xb6   : > { %p9552_p3 = pnand %p9550_p1, %p10263_p8 }
  0xb7   : > { %p9559_p2 = por %p9558_p0, %p9557_p13 }
  0xb8   : > { %p9553_p4 = pneg %p9552_p3 }
  0xba   : > { %p9560_p5 = pnand %p9559_p2, %p9553_p4 }
  0xbc   : > { %9563 = shalt.err (!%p9560_p5)
}
  0xbd   : > { %9223 = dma.hbm_to_vmem [thread:$0]  (!%p10251_p6), %s11825_s20, 16, %s975_s12, [#allocation18]  }
  0xbe   : > { %s111_s1 = sadd.s32 1, %s9962_s15  ;;  %s170_s26 = sadd.s32 1, %s9954_s0 }
  0xbf   : > { %p113_p7 = scmp.ge.s32.totalorder %s111_s1, 2  ;;  %p177_p9 = scmp.ne.s32.totalorder %s9954_s0, %s9950_s10 }
  0xc0   : > { %p178_p10 = scmp.eq.s32.totalorder %s9966_s16, 0  ;;  %p183_p12 = scmp.ne.s32.totalorder %s9950_s10, %s9946_s7 }
  0xc1   : > { %s11912_s1 = smov (%p113_p7, %s111_s1), 0  ;;  %p797_p1 = scmp.eq.s32.totalorder %s10237_s18, 1 }
  0xc2   : > { %11833 = sst [smem:[#allocation68_spill]] %s11912_s1  ;;  %p10325_p11 = por %p178_p10, %p177_p9 }
  0xc3   : > { %s167_s12 = ssub.s32 %s9962_s15, %s11912_s1  ;;  %p11835_p4 = scmp.eq.s32.totalorder %s10237_s18, 0 }
  0xc4   : > { %p168_p3 = scmp.eq.s32.totalorder %s167_s12, 0  ;;  %p10340_p0 = por %p797_p1, %p177_p9 }
  0xc5   : > { %p10336_p13 = por %p11835_p4, %p183_p12  ;;  %s11839_s3 = sadd.s32 4294967294, %s9966_s16  }
  0xc6   : > { %s11837_s19 = scalar_select %p10340_p0, 1, 0 }
  0xc7   : > { %s11836_s28 = scalar_select %p10336_p13, 1, 0 }
  0xc8   : > { %11838 = sst [smem:[#allocation69_spill]] %s11837_s19  ;;  %p803_p2 = scmp.eq.s32.totalorder %s11839_s3, 1 }
  0xc9   : > { %s10347_s14 = scalar_select %p168_p3, %s9954_s0, %s170_s26  }
  0xca   : > { %p10349_p5 = por %p803_p2, %p183_p12  ;;  %p9260_p7 = scmp.lt.s32.totalorder %s9966_s16, 2 }
  0xcb   : > { %11840 = sst [smem:[#allocation70_spill]] %s10347_s14  ;;  %s10355_s12 = sand.u32 1, %s9954_s0  }
  0xcc   : > { %s11841_s20 = scalar_select %p10349_p5, 1, 0 }
  0xcd   : > { %p10360_p9 = pnand %p9260_p7, %p10325_p11  ;;  %s10365_s3 = sshll.u32 %s10355_s12, 1 }
  0xce   : > { %11842 = sst [smem:[#allocation71_spill]] %s11841_s20  ;;  %s10368_s26 = sshll.u32 %s9962_s15, 5 }
  0xcf   : > { %s11843_s1 = scalar_select %p10360_p9, 1, 0 }
  0xd0   : > { %s10372_s14 = scalar_lea.hbm %s11823_s17, %s10368_s26  ;;  %s1072_s0 = scalar_lea.vmem [#allocation5], %s10365_s3 }
  0xd1   : > { %s1080_s30 = sshll.u32 %s1072_s0, 4  ;;  %s11844_s23 = sand.u32 1, %s9966_s16   ;;  %s10375_s30 = int_to_ptr.vmem [resolvable:$true] %s1080_s30 }
  0xd2   : > { %s10379_s20 = scalar_lea.sflag [#allocation6], %s11844_s23  ;;  %s9564_s7 = scalar_lea.hbm %s10372_s14, 32 }
  0xd3   : > { %p9565_p10 = scmp.ne.s32.totalorder %s10372_s14, %s9564_s7  ;;  %p10385_p11 = pneg %p10360_p9 }
  0xd4   : > { %s9569_s9 = scalar_lea.hbm %s11823_s17, 64  ;;  %p9570_p3 = scmp.lt.u32.totalorder %s10372_s14, %s11823_s17 }
  0xd5   : > { %s11845_s19 = scalar_select %p10385_p11, 1, 0 }
  0xd6   : > { %p9567_p12 = pnand %p10385_p11, %p9565_p10  ;;  %p9571_p4 = scmp.lt.u32.totalorder %s9569_s9, %s9564_s7 }
  0xd7   : > { %p9573_p7 = scmp.lt.u32.totalorder %s9564_s7, %s10372_s14 }
  0xd8   : > { %p9568_p1 = pneg %p9567_p12  ;;  %p9572_p2 = por %p9571_p4, %p9570_p3 }
  0xda   : > { %p9574_p5 = por %p9573_p7, %p9572_p2 }
  0xdc   : > { %p9575_p0 = pnand %p9574_p5, %p9568_p1 }
  0xde   : > { %9578 = shalt.err (!%p9575_p0)
}
  0xdf   : > { %s9579_s0 = scalar_lea.vmem %s10375_s30, 32  ;;  %s10005_s23 = smov [#allocation5]  }
  0xe0   : > { %p9580_p13 = scmp.ne.s32.totalorder %s10375_s30, %s9579_s0  ;;  %s9584_s29 = sshll.u32 %s10005_s23, 4  ;;  %s9585_s29 = int_to_ptr.vmem [resolvable:$false] %s9584_s29 }
  0xe1   : > { %s9586_s8 = scalar_lea.vmem %s9585_s29, 64  ;;  %p9587_p10 = scmp.lt.s32.totalorder %s10375_s30, %s9585_s29 }
  0xe2   : > { %p9582_p6 = pnand %p9580_p13, %p10385_p11  ;;  %p9588_p12 = scmp.lt.s32.totalorder %s9586_s8, %s9579_s0 }
  0xe4   : > { %p9583_p8 = pneg %p9582_p6  ;;  %p9589_p3 = por %p9588_p12, %p9587_p10 }
  0xe6   : > { %p9590_p4 = pnand %p9589_p3, %p9583_p8 }
  0xe8   : > { %9593 = shalt.err (!%p9590_p4)
}
  0xe9   : > { %9233 = dma.hbm_to_vmem [thread:$0]  (!%p10360_p9), %s10372_s14, 32, %s10375_s30, %s10379_s20  }
  0xea   : > { %s10006_s9 = smov [#allocation13]   ;;  %s10007_s23 = smov [#allocation16]  }
  0xeb   : > { %s938_s7 = sshll.u32 %s10006_s9, 4  ;;  %s960_s17 = sshll.u32 %s10007_s23, 4  ;;  %s939_s7 = int_to_ptr.vmem [resolvable:$true] %s938_s7  ;;  %s10405_s17 = int_to_ptr.vmem [resolvable:$true] %s960_s17 }
  0xec   : > { %s9594_s29 = scalar_lea.hbm %s10094_s24, 16  ;;  %p11846_p8 = scmp.ne.s32.totalorder %s11832_s27, 0 }
  0xed   : > { %p9595_p6 = scmp.ne.s32.totalorder %s10094_s24, %s9594_s29  ;;  %p9601_p5 = scmp.lt.u32.totalorder %s9594_s29, %s10094_s24 }
  0xef   : > { %p9597_p13 = pnand %p9595_p6, %p11846_p8 }
  0xf1   : > { %p9598_p0 = pneg %p9597_p13 }
  0xf3   : > { %p9603_p1 = pnand %p9601_p5, %p9598_p0 }
  0xf5   : > { %9606 = shalt.err (!%p9603_p1)
}
  0xf6   : > { %s9607_s8 = scalar_lea.vmem %s939_s7, 16  ;;  %s9614_s14 = scalar_lea.vmem %s939_s7, 32 }
  0xf7   : > { %p9608_p2 = scmp.ne.s32.totalorder %s939_s7, %s9607_s8  ;;  %p9615_p12 = scmp.lt.s32.totalorder %s939_s7, %s939_s7 }
  0xf8   : > { %p9616_p3 = scmp.lt.s32.totalorder %s9614_s14, %s9607_s8 }
  0xf9   : > { %p9610_p7 = pnand %p9608_p2, %p11846_p8 }
  0xfa   : > { %p9617_p4 = por %p9616_p3, %p9615_p12 }
  0xfb   : > { %p9611_p10 = pneg %p9610_p7 }
  0xfd   : > { %p9618_p9 = pnand %p9617_p4, %p9611_p10 }
  0xff   : > { %9621 = shalt.err (!%p9618_p9)
}
 0x100   : > { %p11847_p11 = scmp.ne.s32.totalorder %s11831_s2, 0  ;;  %s9622_s30 = scalar_lea.hbm %s11821_s6, 16 }
 0x101   : > { %p9623_p6 = scmp.ne.s32.totalorder %s11821_s6, %s9622_s30  ;;  %p9629_p5 = scmp.lt.u32.totalorder %s9622_s30, %s11821_s6 }
 0x102   : > { %9214 = dma.hbm_to_vmem [thread:$0]  (!%p11847_p11), %s10094_s24, 16, %s939_s7, [#allocation12]  }
 0x103   : > { %p9625_p13 = pnand %p9623_p6, %p11846_p8 }
 0x105   : > { %p9626_p0 = pneg %p9625_p13 }
 0x107   : > { %p9631_p1 = pnand %p9629_p5, %p9626_p0 }
 0x109   : > { %9634 = shalt.err (!%p9631_p1)
}
 0x10a   : > { %s9635_s0 = scalar_lea.vmem %s10405_s17, 16  ;;  %s9642_s9 = scalar_lea.vmem %s10405_s17, 32 }
 0x10b   : > { %p9636_p9 = scmp.ne.s32.totalorder %s10405_s17, %s9635_s0  ;;  %p9643_p10 = scmp.lt.s32.totalorder %s10405_s17, %s10405_s17 }
 0x10c   : > { %p9644_p12 = scmp.lt.s32.totalorder %s9642_s9, %s9635_s0 }
 0x10d   : > { %p9638_p2 = pnand %p9636_p9, %p11846_p8 }
 0x10e   : > { %p9645_p3 = por %p9644_p12, %p9643_p10 }
 0x10f   : > { %p9639_p7 = pneg %p9638_p2 }
 0x111   : > { %p9646_p4 = pnand %p9645_p3, %p9639_p7 }
 0x113   : > { %9649 = shalt.err (!%p9646_p4)
}
 0x114   : > { %9220 = dma.hbm_to_vmem [thread:$0]  (!%p11847_p11), %s11821_s6, 16, %s10405_s17, [#allocation15]  }
 0x115   : > { %s10008_s7 = smov [#allocation19]   ;;  %s8725_s29 = sshll.u32 %s10355_s12, 2 }
 0x116   : > { %s988_s23 = sshll.u32 %s10008_s7, 4  ;;  %s9650_s8 = scalar_lea.hbm %s11822_s4, 16  ;;  %s989_s23 = int_to_ptr.vmem [resolvable:$true] %s988_s23 }
 0x117   : > { %p9651_p6 = scmp.ne.s32.totalorder %s11822_s4, %s9650_s8  ;;  %p9657_p5 = scmp.lt.u32.totalorder %s9650_s8, %s11822_s4 }
 0x119   : > { %p9653_p13 = pnand %p9651_p6, %p11846_p8 }
 0x11b   : > { %p9654_p0 = pneg %p9653_p13 }
 0x11d   : > { %p9659_p1 = pnand %p9657_p5, %p9654_p0 }
 0x11f   : > { %9662 = shalt.err (!%p9659_p1)
}
 0x120   : > { %s9663_s14 = scalar_lea.vmem %s989_s23, 16  ;;  %s9670_s30 = scalar_lea.vmem %s989_s23, 32 }
 0x121   : > { %p9664_p9 = scmp.ne.s32.totalorder %s989_s23, %s9663_s14  ;;  %p9671_p10 = scmp.lt.s32.totalorder %s989_s23, %s989_s23 }
 0x122   : > { %p9672_p12 = scmp.lt.s32.totalorder %s9670_s30, %s9663_s14 }
 0x123   : > { %p9666_p2 = pnand %p9664_p9, %p11846_p8 }
 0x124   : > { %p9673_p3 = por %p9672_p12, %p9671_p10 }
 0x125   : > { %p9667_p7 = pneg %p9666_p2 }
 0x127   : > { %p9674_p4 = pnand %p9673_p3, %p9667_p7 }
 0x129   : > { %9677 = shalt.err (!%p9674_p4)
}
 0x12a   : > { %9226 = dma.hbm_to_vmem [thread:$0]  (!%p11847_p11), %s11822_s4, 16, %s989_s23, [#allocation18]  }
 0x12b   : > { %s8726_s17 = sshll.u32 %s9962_s15, 6  ;;  %s1054_s27 = scalar_lea.vmem [#allocation2], %s8725_s29 }
 0x12c   : > { %s1061_s0 = sshll.u32 %s1054_s27, 4  ;;  %s10446_s9 = scalar_lea.hbm %s10049_s13, %s8726_s17  ;;  %s1062_s0 = int_to_ptr.vmem [resolvable:$true] %s1061_s0 }
 0x12d   : > { %s1051_s7 = scalar_lea.sflag [#allocation3], %s10355_s12  ;;  %s9678_s2 = scalar_lea.hbm %s10446_s9, 64 }
 0x12e   : > { %p9679_p8 = scmp.ne.s32.totalorder %s10446_s9, %s9678_s2  ;;  %p11848_p6 = scmp.ne.s32.totalorder %s11845_s19, 0 }
 0x12f   : > { %s9683_s8 = scalar_lea.hbm %s10049_s13, 128  ;;  %p9684_p5 = scmp.lt.u32.totalorder %s10446_s9, %s10049_s13 }
 0x130   : > { %p9681_p13 = pnand %p9679_p8, %p11848_p6  ;;  %p9685_p1 = scmp.lt.u32.totalorder %s9683_s8, %s9678_s2 }
 0x131   : > { %p9687_p9 = scmp.lt.u32.totalorder %s9678_s2, %s10446_s9 }
 0x132   : > { %p9682_p0 = pneg %p9681_p13  ;;  %p9686_p11 = por %p9685_p1, %p9684_p5 }
 0x134   : > { %p9688_p2 = por %p9687_p9, %p9686_p11 }
 0x136   : > { %p9689_p7 = pnand %p9688_p2, %p9682_p0 }
 0x138   : > { %9692 = shalt.err (!%p9689_p7)
}
 0x139   : > { %s9693_s23 = scalar_lea.vmem %s1062_s0, 64  ;;  %s10009_s12 = smov [#allocation2]  }
 0x13a   : > { %p9694_p10 = scmp.ne.s32.totalorder %s1062_s0, %s9693_s23  ;;  %s9698_s29 = sshll.u32 %s10009_s12, 4  ;;  %s9699_s29 = int_to_ptr.vmem [resolvable:$false] %s9698_s29 }
 0x13b   : > { %s9700_s14 = scalar_lea.vmem %s9699_s29, 128  ;;  %p9701_p4 = scmp.lt.s32.totalorder %s1062_s0, %s9699_s29 }
 0x13c   : > { %p9696_p12 = pnand %p9694_p10, %p11848_p6  ;;  %p9702_p8 = scmp.lt.s32.totalorder %s9700_s14, %s9693_s23 }
 0x13e   : > { %p9697_p3 = pneg %p9696_p12  ;;  %p9703_p13 = por %p9702_p8, %p9701_p4 }
 0x140   : > { %p9704_p1 = pnand %p9703_p13, %p9697_p3 }
 0x142   : > { %9707 = shalt.err (!%p9704_p1)
}
 0x143   : > { %p11849_p5 = scmp.ne.s32.totalorder %s11843_s1, 0  ;;  %s10464_s30 = scalar_lea.hbm %s10059_s21, %s10368_s26 }
 0x144   : > { %s1091_s17 = scalar_lea.vmem [#allocation7], %s10365_s3  ;;  %s10469_s2 = scalar_lea.hbm %s10064_s25, %s10368_s26 }
 0x145   : > { %9230 = dma.hbm_to_vmem [thread:$0]  (!%p11849_p5), %s10446_s9, 64, %s1062_s0, %s1051_s7  }
 0x146   : > { %s1099_s27 = sshll.u32 %s1091_s17, 4  ;;  %s9708_s8 = scalar_lea.hbm %s10464_s30, 32  ;;  %s1100_s27 = int_to_ptr.vmem [resolvable:$true] %s1099_s27 }
 0x147   : > { %p9709_p0 = scmp.ne.s32.totalorder %s10464_s30, %s9708_s8  ;;  %s9713_s23 = scalar_lea.hbm %s10059_s21, 64 }
 0x148   : > { %p9714_p2 = scmp.lt.u32.totalorder %s10464_s30, %s10059_s21  ;;  %p9715_p7 = scmp.lt.u32.totalorder %s9713_s23, %s9708_s8 }
 0x149   : > { %p9711_p11 = pnand %p9709_p0, %p11848_p6  ;;  %p9717_p12 = scmp.lt.u32.totalorder %s9708_s8, %s10464_s30 }
 0x14a   : > { %p9716_p10 = por %p9715_p7, %p9714_p2 }
 0x14b   : > { %p9712_p9 = pneg %p9711_p11 }
 0x14c   : > { %p9718_p3 = por %p9717_p12, %p9716_p10 }
 0x14e   : > { %p9719_p4 = pnand %p9718_p3, %p9712_p9 }
 0x150   : > { %9722 = shalt.err (!%p9719_p4)
}
 0x151   : > { %s9723_s0 = scalar_lea.vmem %s1100_s27, 32  ;;  %s10010_s26 = smov [#allocation7]  }
 0x152   : > { %p9724_p8 = scmp.ne.s32.totalorder %s1100_s27, %s9723_s0  ;;  %s9728_s9 = sshll.u32 %s10010_s26, 4  ;;  %s9729_s9 = int_to_ptr.vmem [resolvable:$false] %s9728_s9 }
 0x153   : > { %s9730_s7 = scalar_lea.vmem %s9729_s9, 64  ;;  %p9731_p0 = scmp.lt.s32.totalorder %s1100_s27, %s9729_s9 }
 0x154   : > { %p9726_p13 = pnand %p9724_p8, %p11848_p6  ;;  %p9732_p11 = scmp.lt.s32.totalorder %s9730_s7, %s9723_s0 }
 0x156   : > { %p9727_p1 = pneg %p9726_p13  ;;  %p9733_p5 = por %p9732_p11, %p9731_p0 }
 0x158   : > { %p9734_p2 = pnand %p9733_p5, %p9727_p1 }
 0x15a   : > { %9737 = shalt.err (!%p9734_p2)
}
 0x15b   : > { %p11850_p7 = scmp.ne.s32.totalorder %s11843_s1, 0  ;;  %s1110_s12 = scalar_lea.vmem [#allocation8], %s10365_s3 }
 0x15c   : > { %s1118_s29 = sshll.u32 %s1110_s12, 4  ;;  %s11851_s14 = sand.u32 1, %s9966_s16   ;;  %s1119_s29 = int_to_ptr.vmem [resolvable:$true] %s1118_s29 }
 0x15d   : > { %9236 = dma.hbm_to_vmem [thread:$0]  (!%p11850_p7), %s10464_s30, 32, %s1100_s27, %s10379_s20  }
 0x15e   : > { %s1107_s17 = scalar_lea.sflag [#allocation9], %s11851_s14  ;;  %s9738_s8 = scalar_lea.hbm %s10469_s2, 32 }
 0x15f   : > { %p9739_p5 = scmp.ne.s32.totalorder %s10469_s2, %s9738_s8  ;;  %s9743_s23 = scalar_lea.hbm %s10064_s25, 64 }
 0x160   : > { %p9744_p12 = scmp.lt.u32.totalorder %s10469_s2, %s10064_s25  ;;  %p9745_p3 = scmp.lt.u32.totalorder %s9743_s23, %s9738_s8 }
 0x161   : > { %p9741_p9 = pnand %p9739_p5, %p11848_p6  ;;  %p9747_p8 = scmp.lt.u32.totalorder %s9738_s8, %s10469_s2 }
 0x162   : > { %p9746_p4 = por %p9745_p3, %p9744_p12 }
 0x163   : > { %p9742_p10 = pneg %p9741_p9 }
 0x164   : > { %p9748_p13 = por %p9747_p8, %p9746_p4 }
 0x166   : > { %p9749_p1 = pnand %p9748_p13, %p9742_p10 }
 0x168   : > { %9752 = shalt.err (!%p9749_p1)
}
 0x169   : > { %s9753_s0 = scalar_lea.vmem %s1119_s29, 32  ;;  %s10011_s20 = smov [#allocation8]  }
 0x16a   : > { %p9754_p0 = scmp.ne.s32.totalorder %s1119_s29, %s9753_s0  ;;  %s9758_s3 = sshll.u32 %s10011_s20, 4  ;;  %s9759_s3 = int_to_ptr.vmem [resolvable:$false] %s9758_s3 }
 0x16b   : > { %s9760_s30 = scalar_lea.vmem %s9759_s3, 64  ;;  %p9761_p5 = scmp.lt.s32.totalorder %s1119_s29, %s9759_s3 }
 0x16c   : > { %p9756_p11 = pnand %p9754_p0, %p11848_p6  ;;  %p9762_p9 = scmp.lt.s32.totalorder %s9760_s30, %s9753_s0 }
 0x16e   : > { %p9757_p2 = pneg %p9756_p11  ;;  %p9763_p7 = por %p9762_p9, %p9761_p5 }
 0x170   : > { %p9764_p3 = pnand %p9763_p7, %p9757_p2 }
 0x172   : > { %9767 = shalt.err (!%p9764_p3)
}
 0x173   : > { %p11852_p12 = scmp.ne.s32.totalorder %s11843_s1, 0  ;;  %p11853_p10 = scmp.ne.s32.totalorder %s11830_s22, 0 }
 0x174   : > { %s10504_s19 = sand.u32 (!%p11853_p10), 1, %s9950_s10   ;;  %p11854_p6 = scmp.ne.s32.totalorder (!%p11853_p10), %s11836_s28, 0 }
 0x175   : > { %9239 = dma.hbm_to_vmem [thread:$0]  (!%p11852_p12), %s10469_s2, 32, %s1119_s29, %s1107_s17  }
 0x176   : > { %1127 = sbr.rel (%p11853_p10) target bundleno = 6674 (0x1a12), region = 140  ;;  %s8734_s27 = sshll.u32 (!%p11853_p10), %s10504_s19, 2 }
 0x177   : > { %s1130_s26 = scalar_lea.sflag (!%p11853_p10), [#allocation3], %s10504_s19  ;;  %s10508_s9 = scalar_lea.vmem (!%p11853_p10), [#allocation2], %s8734_s27 }
 0x17d   : > { %9905 = dma.done.wait (%p11854_p6), %s1130_s26, 64  }
 0x17e   : > { %9907 = vsyncadd (%p11854_p6), %s1130_s26, 4294967232  ;;  %s10515_s22 = sand.u32 1, %s10237_s18   ;;  %s10518_s1 = sshll.u32 %s10504_s19, 1 }
 0x17f   : > { %s1139_s2 = scalar_lea.sflag [#allocation6], %s10515_s22  ;;  %s1142_s7 = scalar_lea.vmem [#allocation5], %s10518_s1 }
 0x180   : > { %9909 = dma.done.wait (%p11854_p6), %s1139_s2, 64  }
 0x181   : > { %9911 = vsyncadd (%p11854_p6), %s1139_s2, 4294967232  ;;  %s1157_s29 = scalar_lea.sflag [#allocation9], %s10515_s22 }
 0x182   : > { %9913 = dma.done.wait (%p11854_p6), %s1157_s29, 32  }
 0x183   : > { %9915 = vsyncadd (%p11854_p6), %s1157_s29, 4294967264  ;;  %p11855_p7 = scmp.eq.s32.totalorder %s10237_s18, 0 }
 0x185   : > { %9917 = dma.done.wait (%p11855_p7), [#allocation9], 16   ;;  %p11856_p4 = pmov %p11855_p7 }
 0x187   : > { %9919 = vsyncadd (%p11856_p4), [#allocation9], 4294967280  ;;  %p11857_p8 = pmov %p11856_p4 }
 0x188   : > { %p11858_p13 = pmov %p11856_p4 }
 0x189   : > { %9921 = dma.done.wait (%p11857_p8), [#allocation12], 32  }
 0x18a   : > { %9923 = vsyncadd (%p11858_p13), [#allocation12], 4294967264  ;;  %p11859_p1 = pmov %p11856_p4 }
 0x18c   : > { %9925 = dma.done.wait (%p11859_p1), [#allocation15], 32   ;;  %p11860_p0 = pmov %p11859_p1 }
 0x18e   : > { %9927 = vsyncadd (%p11860_p0), [#allocation15], 4294967264  ;;  %p11861_p11 = pmov %p11860_p0 }
 0x18f   : > { %p11862_p2 = pmov %p11860_p0 }
 0x190   : > { %9929 = dma.done.wait (%p11861_p11), [#allocation18], 32  }
 0x191   : > { %9931 = vsyncadd (%p11862_p2), [#allocation18], 4294967264  ;;  %s11863_s5 = sld [smem:[#allocation36_spill]]  ;;  %s11864_s28 = sld [smem:[#allocation41_spill]]  ;;  %v10012_v0 = vmov 0.0   ;;  %vm10013_vm0 = vmmov 0   ;;  %v1476_v19 = vlaneseq }
 0x192   : > { %s11865_s17 = sld [smem:[#allocation39_spill]]  ;;  %p1310_p5 = scmp.lt.s32.totalorder %s9958_s11, 1  ;;  %8937 = vmatprep.subr.bf16.mxu0 %v10012_v0  ;;  %8941 = vmatprep.mubr.msk.bf16.mxu0 %vm10013_vm0, %v10012_v0  ;;  %vm1354_vm1 = vcmask 261120   ;;  %v8752_v7 = vld [vmem:[#allocation11] ss:$0 sm:$0xff]  ;;  %vm2205_vm2 = vcmask 1043456  }
 0x193   : > { %8945 = vmatprep.subr.bf16.mxu1 %v10012_v0  ;;  %8949 = vmatprep.mubr.msk.bf16.mxu1 %vm10013_vm0, %v10012_v0  ;;  %s11780_s0 = smov 104   ;;  %s10015_s20 = smov 120   ;;  %v10017_v17 = vmov 1983009808   ;;  %v10018_v20 = vmov 1934713408  }
 0x194   : > { %s10554_s8 = scalar_select %p1310_p5, %s9958_s11, 1  ;;  %v1474_v18 = vunpack.c.l.s4 %v10017_v17  ;;  %v1506_v21 = vunpack.c.l.s4 %v10018_v20  ;;  %v1477_v23 = vshrl.u32 %v1476_v19, 7  ;;  %v8756_v56 = vld [vmem:[#allocation10] ss:$0 sm:$0xff]  ;;  %vm2201_vm3 = vcmask 64512  }
 0x195   : > { %s10016_s3 = smov 112   ;;  %s11778_s30 = smov 96   ;;  %vm2449_vm5 = vcmask 60416   ;;  %vm3333_vm6 = vcmask 130048   ;;  %vm3335_vm7 = vcmask 195584   ;;  %vm4999_vm9 = vcmask 125952  }
 0x196   : > { %s8749_s18 = sshll.u32 %s10554_s8, 3  ;;  %v1475_v22 = vunpack.c.0.s8 %v1474_v18  ;;  %v1507_v26 = vunpack.c.0.s8 %v1506_v21  ;;  %s10762_s27 = sshll.u32 %s10504_s19, 4  ;;  %vm7999_vm11 = vcmask 523264  }
 0x197   : > { %s10563_s23 = scalar_lea.vmem %s11863_s5, %s8749_s18  ;;  %v9372_v1 = vld [vmem:[%s11864_s28] sm:$0xff]   ;;  %v9373_v2 = vld [vmem:[%s11864_s28 + $0x8] sm:$0xff]   ;;  %s10769_s26 = scalar_lea.vmem [#allocation21], %s10762_s27 }
 0x198   : > { %8938 = vmatpush3.bf16.msra.mxu0 %v9372_v1  ;;  %v1320_v3 = vld [vmem:[%s10563_s23] sm:$0xff]  ;;  %v9375_v5 = vld [vmem:[%s11865_s17 + $0x8] sm:$0xff]   ;;  %v10596_v29 = vsub.s32 %v1475_v22, %v1477_v23  ;;  %v10604_v33 = vsub.s32 %v1507_v26, %v1477_v23  ;;  %s11868_s2 = sld [smem:[#allocation43_spill]]  ;;  %s11782_s14 = smov 16  }
 0x199   : > { %8939 = vmatprep.subr.bf16.mxu0 %v10012_v0  ;;  %v9374_v4 = vld [vmem:[%s11865_s17] sm:$0xff]   ;;  %v1321_v6 = vpack.c.bf16 %v1320_v3, %v1320_v3  ;;  %s11871_s12 = sld [smem:[#allocation37_spill]]  ;;  %s11874_s8 = sld [smem:[#allocation50_spill]] }
 0x19a   : > { %8946 = vmatpush3.bf16.msra.mxu1 %v9374_v4  ;;  %s10025_s4 = smov [#allocation21]  }
 0x19b   : > { %8947 = vmatprep.subr.bf16.mxu1 %v10012_v0  ;;  %s9772_s5 = sshll.u32 %s10025_s4, 4  ;;  %s9773_s5 = int_to_ptr.vmem [resolvable:$false] %s9772_s5 }
 0x19c   : > { %8940 = vmatpush3.bf16.msra.mxu0 %v9373_v2  ;;  %s9774_s6 = scalar_lea.vmem %s9773_s5, 512 }
 0x19d   : > { %8953 = vmatprep.subr.bf16.mxu0 %v10012_v0 }
 0x19e   : > { %8948 = vmatpush3.bf16.msra.mxu1 %v9375_v5 }
 0x19f   : > { %8942 = vmatmul.mubr.msk.bf16.vlgmr.msra.gmra.mrb[0].mxu0 %vm1354_vm1, %v1321_v6  ;;  %8959 = vmatprep.subr.bf16.mxu1 %v10012_v0 }
 0x1a0   : > { %8955 = vmatprep.mubr.msk.bf16.mxu0 %vm10013_vm0, %v10012_v0 }
 0x1a1   : > { %8950 = vmatmul.mubr.msk.bf16.vlgmr.msra.gmra.mrb[0].mxu1 %vm1354_vm1, %v1321_v6 }
 0x1a2   : > { %8961 = vmatprep.mubr.msk.bf16.mxu1 %vm10013_vm0, %v10012_v0 }
 0x272   : > { %v1392_v8 = vpop.f32.mrb[0].mxu0 }
 0x273   : > { %v10580_v9 = vadd.f32 %v8752_v7, %v1392_v8  ;;  %v8943_v10 = vpop.f32.mrb[1].mxu0 }
 0x274   : > { %v1395_v11 = vpop.f32.mrb[2].mxu0  ;;  %v1455_v13 = vpop.f32.mrb[0].mxu1 }
 0x275   : > { %1554 = vrot.lane.b32.xlu1 %v10580_v9, %s11780_s0  ;;  %1548 = vrot.lane.b32.xlu0 %v10580_v9, %s10015_s20  ;;  %v8944_v12 = vpop.f32.mrb[3].mxu0  ;;  %v8951_v14 = vpop.f32.mrb[1].mxu1  ;;  %v10618_v59 = vadd.f32 %v8756_v56, %v1455_v13 }
 0x276   : > { %v1458_v15 = vpop.f32.mrb[2].mxu1 }
 0x277   : > { %v8952_v16 = vpop.f32.mrb[3].mxu1 }
 0x279   : > { %1551 = vrot.lane.b32.xlu0 %v10580_v9, %s10016_s3 }
 0x2e7   : > { %v10588_v24 = vpop.permute.xlu1 %1554  ;;  %v10590_v25 = vpop.permute.xlu0 %1548 }
 0x2e8   : > { %v1573_v27 = vcombine.low %v10590_v25, %v10588_v24  ;;  %v1574_v28 = vcombine.high %v10590_v25, %v10588_v24 }
 0x2ea   : > { %v1581_v35 = vrot.slane %v1573_v27, %v10596_v29  ;;  %v1588_v37 = vrot.slane %v1574_v28, %v10596_v29  ;;  %v10019_v27 = vmov 0  }
 0x2eb   : > { %v10598_v30 = vpop.permute.xlu0 %1551 }
 0x2ec   : > { %v1557_v31 = vcombine.low %v10580_v9, %v10598_v30  ;;  %v1558_v32 = vcombine.high %v10580_v9, %v10598_v30 }
 0x2ee   : > { %v1565_v34 = vrot.slane %v1557_v31, %v10596_v29  ;;  %v1572_v36 = vrot.slane %v1558_v32, %v10596_v29 }
 0x2f0   : > { %v1590_v38 = vcombine.high %v1565_v34, %v1581_v35  ;;  %v1589_v39 = vcombine.low %v1565_v34, %v1581_v35  ;;  %v1605_v40 = vcombine.low %v1572_v36, %v1588_v37  ;;  %v1606_v43 = vcombine.high %v1572_v36, %v1588_v37 }
 0x2f2   : > { %v1604_v41 = vrot.slane %v1590_v38, %v10604_v33  ;;  %v1597_v42 = vrot.slane %v1589_v39, %v10604_v33  ;;  %v1613_v46 = vrot.slane %v1605_v40, %v10604_v33  ;;  %v1620_v50 = vrot.slane %v1606_v43, %v10604_v33 }
 0x2f4   : > { %v1627_v44 = vpack.c.bf16 %v1604_v41, %v1604_v41  ;;  %v1625_v45 = vpack.c.bf16 %v1597_v42, %v1597_v42  ;;  %v1622_v47 = vcombine.high %v1604_v41, %v10012_v0  ;;  %v1629_v48 = vpack.c.bf16 %v1613_v46, %v1613_v46 }
 0x2f5   : > { %v1623_v51 = vcombine.high %v1613_v46, %v10012_v0  ;;  %v1631_v52 = vpack.c.bf16 %v1620_v50, %v1620_v50  ;;  %v1624_v54 = vcombine.high %v1620_v50, %v10012_v0  ;;  %v1621_v55 = vcombine.high %v1597_v42, %v10012_v0 }
 0x2f6   : > { %1815 = vxpose.xlu0.c.b16.start.end [1/1] (short) (narrow) %v1627_v44, 16  ;;  %1783 = vxpose.xlu1.c.b16.start.end [1/1] (short) (narrow) %v1625_v45, 16  ;;  %v1628_v49 = vpack.c.bf16 %v1622_v47, %v1622_v47 }
 0x2f7   : > { %v1630_v53 = vpack.c.bf16 %v1623_v51, %v1623_v51  ;;  %v1632_v57 = vpack.c.bf16 %v1624_v54, %v1624_v54  ;;  %v1626_v58 = vpack.c.bf16 %v1621_v55, %v1621_v55 }
 0x2fa   : > { %1847 = vxpose.xlu0.c.b16.start.end [1/1] (short) (narrow) %v1629_v48, 16  ;;  %1831 = vxpose.xlu1.c.b16.start.end [1/1] (short) (narrow) %v1628_v49, 16 }
 0x2fe   : > { %1879 = vxpose.xlu0.c.b16.start.end [1/1] (short) (narrow) %v1631_v52, 16  ;;  %1863 = vxpose.xlu1.c.b16.start.end [1/1] (short) (narrow) %v1630_v53, 16 }
 0x302   : > { %1895 = vxpose.xlu1.c.b16.start.end [1/1] (short) (narrow) %v1632_v57, 16  ;;  %1799 = vxpose.xlu0.c.b16.start.end [1/1] (short) (narrow) %v1626_v58, 16 }
 0x306   : > { %1465 = vrot.lane.b32.xlu1 %v10618_v59, %s10016_s3 }
 0x30a   : > { %1468 = vrot.lane.b32.xlu1 %v10618_v59, %s11780_s0  ;;  %s10023_s0 = smov 24  }
 0x30b   : > { %1462 = vrot.lane.b32.xlu0 %v10618_v59, %s10015_s20 }
 0x35c   : > { %v1823_v60 = vpop.trf.xlu0  ;;  %v1791_v61 = vpop.trf.xlu1 }
 0x360   : > { %v1855_v62 = vpop.trf.xlu0  ;;  %v1839_v63 = vpop.trf.xlu1 }
 0x361   : > { %v1911_v3 = vcombine.low %v1791_v61, %v1855_v62 }
 0x363   : > { %v1918_v8 = vrot.slane %v1911_v3, %v10596_v29 }
 0x364   : > { %v1887_v1 = vpop.trf.xlu0  ;;  %v1871_v2 = vpop.trf.xlu1 }
 0x365   : > { %v1919_v4 = vcombine.low %v1823_v60, %v1887_v1 }
 0x367   : > { %v1926_v5 = vrot.slane %v1919_v4, %v10596_v29 }
 0x368   : > { %v1903_v6 = vpop.trf.xlu1  ;;  %v1807_v7 = vpop.trf.xlu0 }
 0x369   : > { %v1953_v10 = vcombine.low %v1839_v63, %v1903_v6  ;;  %v1945_v11 = vcombine.low %v1807_v7, %v1871_v2  ;;  %v1927_v12 = vcombine.low %v1918_v8, %v1926_v5  ;;  %v1928_v13 = vcombine.high %v1918_v8, %v1926_v5 }
 0x36b   : > { %v1960_v14 = vrot.slane %v1953_v10, %v10596_v29  ;;  %v1952_v15 = vrot.slane %v1945_v11, %v10596_v29  ;;  %v1935_v18 = vrot.slane %v1927_v12, %v10604_v33  ;;  %v1942_v19 = vrot.slane %v1928_v13, %v10604_v33 }
 0x36d   : > { %v1961_v16 = vcombine.low %v1952_v15, %v1960_v14  ;;  %v1962_v17 = vcombine.high %v1952_v15, %v1960_v14  ;;  %v1983_v31 = vshrl.u32 %v1935_v18, 16  ;;  %v1943_v32 = vcombine.high %v1935_v18, %v10019_v27 }
 0x36e   : > { %v1944_v38 = vcombine.high %v1942_v19, %v10019_v27  ;;  %v1999_v39 = vshrl.u32 %v1942_v19, 16 }
 0x36f   : > { %v1969_v20 = vrot.slane %v1961_v16, %v10604_v33  ;;  %v1976_v21 = vrot.slane %v1962_v17, %v10604_v33  ;;  %v1991_v43 = vshrl.u32 %v1943_v32, 16 }
 0x370   : > { %v2007_v46 = vshrl.u32 %v1944_v38, 16 }
 0x371   : > { %v1997_v22 = vpack.i.b16 %v1976_v21, %v1942_v19  ;;  %v1981_v23 = vpack.i.b16 %v1969_v20, %v1935_v18  ;;  %v1984_v26 = vshrl.u32 %v1969_v20, 16  ;;  %v1977_v28 = vcombine.high %v1969_v20, %v10019_v27 }
 0x372   : > { %v1978_v36 = vcombine.high %v1976_v21, %v10019_v27  ;;  %v2000_v37 = vshrl.u32 %v1976_v21, 16 }
 0x373   : > { %2075 = vxpose.xlu1.c.b16.start.end [1/1] (short) (narrow) %v1997_v22, 16  ;;  %2011 = vxpose.xlu0.c.b16.start.end [1/1] (short) (narrow) %v1981_v23, 16  ;;  %v1985_v34 = vpack.i.b16 %v1984_v26, %v1983_v31  ;;  %v1989_v35 = vpack.i.b16 %v1977_v28, %v1943_v32  ;;  %v1992_v42 = vshrl.u32 %v1977_v28, 16 }
 0x374   : > { %v2005_v40 = vpack.i.b16 %v1978_v36, %v1944_v38  ;;  %v2001_v41 = vpack.i.b16 %v2000_v37, %v1999_v39  ;;  %v2008_v45 = vshrl.u32 %v1978_v36, 16 }
 0x375   : > { %v1993_v44 = vpack.i.b16 %v1992_v42, %v1991_v43 }
 0x376   : > { %v2009_v47 = vpack.i.b16 %v2008_v45, %v2007_v46 }
 0x377   : > { %2027 = vxpose.xlu1.c.b16.start.end [1/1] (short) (narrow) %v1985_v34, 16  ;;  %2043 = vxpose.xlu0.c.b16.start.end [1/1] (short) (narrow) %v1989_v35, 16 }
 0x378   : > { %v1466_v48 = vpop.permute.xlu1 %1465 }
 0x379   : > { %v1471_v53 = vcombine.low %v10618_v59, %v1466_v48  ;;  %v1472_v54 = vcombine.high %v10618_v59, %v1466_v48 }
 0x37b   : > { %2107 = vxpose.xlu1.c.b16.start.end [1/1] (short) (narrow) %v2005_v40, 16  ;;  %2091 = vxpose.xlu0.c.b16.start.end [1/1] (short) (narrow) %v2001_v41, 16  ;;  %v1479_v56 = vrot.slane %v1471_v53, %v10596_v29 }
 0x37c   : > { %v1469_v49 = vpop.permute.xlu1 %1468 }
 0x37d   : > { %v1463_v50 = vpop.permute.xlu0 %1462 }
 0x37e   : > { %v1487_v51 = vcombine.low %v1463_v50, %v1469_v49  ;;  %v1488_v52 = vcombine.high %v1463_v50, %v1469_v49 }
 0x37f   : > { %1633 = vrot.lane.b32.xlu1 %v10580_v9, %s11778_s30  ;;  %2059 = vxpose.xlu0.c.b16.start.end [1/1] (short) (narrow) %v1993_v44, 16 }
 0x380   : > { %v1495_v9 = vrot.slane %v1487_v51, %v10596_v29  ;;  %v1502_v55 = vrot.slane %v1488_v52, %v10596_v29 }
 0x382   : > { %v1503_v57 = vcombine.low %v1479_v56, %v1495_v9  ;;  %v1504_v58 = vcombine.high %v1479_v56, %v1495_v9 }
 0x383   : > { %1637 = vrot.lane.b32.xlu1 %v10598_v30, %s11778_s30  ;;  %2123 = vxpose.xlu0.c.b16.start.end [1/1] (short) (narrow) %v2009_v47, 16  ;;  %v1486_v30 = vrot.slane %v1472_v54, %v10596_v29 }
 0x384   : > { %v1511_v63 = vrot.slane %v1503_v57, %v10604_v33  ;;  %v1518_v1 = vrot.slane %v1504_v58, %v10604_v33 }
 0x385   : > { %v1520_v60 = vcombine.high %v1486_v30, %v1502_v55 }
 0x386   : > { %v1535_v5 = vcombine.high %v1511_v63, %v10012_v0  ;;  %v1536_v6 = vcombine.high %v1518_v1, %v10012_v0 }
 0x387   : > { %v1534_v2 = vrot.slane %v1520_v60, %v10604_v33 }
 0x389   : > { %v1538_v8 = vcombine.high %v1534_v2, %v10012_v0  ;;  %v8761_v17 = vpack.c.bf16 %v1534_v2, %v1518_v1  ;;  %v1322_v2 = vld [vmem:[%s1142_s7] sm:$0x3]  ;;  %s11869_s7 = sld [smem:[#allocation48_spill]] }
 0x38b   : > { %v8763_v14 = vpack.c.bf16 %v1538_v8, %v1536_v6  ;;  %v1736_v28 = vrot.slane %v8761_v17, %v10596_v29 }
 0x38c   : > { %1635 = vrot.lane.b32.xlu0 %v10590_v25, %s11778_s30  ;;  %v1519_v25 = vcombine.low %v1486_v30, %v1502_v55 }
 0x38d   : > { %v1761_v21 = vrot.slane %v8763_v14, %v10596_v29 }
 0x38e   : > { %v1527_v59 = vrot.slane %v1519_v25, %v10604_v33 }
 0x38f   : > { %s11870_s29 = smov %s11869_s7 }
 0x390   : > { %v1537_v7 = vcombine.high %v1527_v59, %v10012_v0  ;;  %v8760_v16 = vpack.c.bf16 %v1527_v59, %v1511_v63 }
 0x392   : > { %v8762_v13 = vpack.c.bf16 %v1537_v7, %v1535_v5  ;;  %v1728_v26 = vrot.slane %v8760_v16, %v10596_v29 }
 0x394   : > { %v1753_v20 = vrot.slane %v8762_v13, %v10596_v29  ;;  %v1737_v38 = vcombine.low %v1728_v26, %v1736_v28 }
 0x396   : > { %v1762_v35 = vcombine.low %v1753_v20, %v1761_v21  ;;  %v1744_v43 = vrot.slane %v1737_v38, %v10604_v33 }
 0x398   : > { %v1769_v41 = vrot.slane %v1762_v35, %v10604_v33  ;;  %v1774_v56 = vshrl.u32 %v1744_v43, 16 }
 0x39a   : > { %v1775_v49 = vshrl.u32 %v1769_v41, 16  ;;  %v1773_v55 = vpack.i.b16 %v1769_v41, %v1744_v43  ;;  %v1770_v25 = vcombine.high %v1769_v41, %v10019_v27 }
 0x39c   : > { %v1776_v58 = vpack.i.b16 %v1775_v49, %v1774_v56 }
 0x3d9   : > { %v2083_v61 = vpop.trf.xlu1  ;;  %v2019_v62 = vpop.trf.xlu0 }
 0x3da   : > { %v2139_v15 = vcombine.low %v2019_v62, %v2083_v61  ;;  %v1745_v61 = vcombine.high %v1744_v43, %v10019_v27  ;;  %v1781_v62 = vshrl.u32 %v1770_v25, 16 }
 0x3dc   : > { %v2146_v22 = vrot.slane %v2139_v15, %v10596_v29  ;;  %v1779_v63 = vpack.i.b16 %v1770_v25, %v1745_v61  ;;  %v1780_v1 = vshrl.u32 %v1745_v61, 16 }
 0x3dd   : > { %v2035_v3 = vpop.trf.xlu1  ;;  %v2051_v4 = vpop.trf.xlu0 }
 0x3de   : > { %v1782_v59 = vpack.i.b16 %v1781_v62, %v1780_v1 }
 0x3e1   : > { %v2115_v10 = vpop.trf.xlu1  ;;  %v2099_v11 = vpop.trf.xlu0 }
 0x3e2   : > { %v2147_v12 = vcombine.low %v2051_v4, %v2115_v10  ;;  %v2164_v23 = vcombine.low %v2035_v3, %v2099_v11  ;;  %v1323_v3 = vunpack.c.0.s8 %v1322_v2 }
 0x3e4   : > { %v2154_v18 = vrot.slane %v2147_v12, %v10596_v29  ;;  %v2171_v36 = vrot.slane %v2164_v23, %v10596_v29  ;;  %vm10696_vm4 = vcmp.ne.s32.totalorder %v1323_v3, 0 }
 0x3e5   : > { %v2067_v19 = vpop.trf.xlu0 }
 0x3e6   : > { %v2155_v31 = vcombine.low %v2146_v22, %v2154_v18 }
 0x3e8   : > { %v2162_v39 = vrot.slane %v2155_v31, %v10604_v33 }
 0x3e9   : > { %v2131_v32 = vpop.trf.xlu0 }
 0x3ea   : > { %v2172_v34 = vcombine.low %v2067_v19, %v2131_v32  ;;  %v2163_v44 = vcombine.high %v2162_v39, %v10019_v27  ;;  %v2192_v46 = vshrl.u32 %v2162_v39, 16 }
 0x3ec   : > { %v2179_v37 = vrot.slane %v2172_v34, %v10596_v29  ;;  %v2198_v54 = vshrl.u32 %v2163_v44, 16 }
 0x3ee   : > { %v2180_v40 = vcombine.low %v2171_v36, %v2179_v37 }
 0x3f0   : > { %v2187_v42 = vrot.slane %v2180_v40, %v10604_v33 }
 0x3f1   : > { %v1634_v38 = vpop.permute.xlu1 %1633 }
 0x3f2   : > { %v2191_v45 = vpack.i.b16 %v2187_v42, %v2162_v39  ;;  %v2193_v47 = vshrl.u32 %v2187_v42, 16  ;;  %v2188_v48 = vcombine.high %v2187_v42, %v10019_v27 }
 0x3f4   : > { %v2207_v50 = vsel %vm2205_vm2, %v2191_v45, 0  ;;  %v2194_v51 = vpack.i.b16 %v2193_v47, %v2192_v46  ;;  %v2197_v52 = vpack.i.b16 %v2188_v48, %v2163_v44  ;;  %v2199_v53 = vshrl.u32 %v2188_v48, 16 }
 0x3f5   : > { %8954 = vmatpush3.bf16.msra.mxu0 %v2207_v50  ;;  %v1638_v39 = vpop.permute.xlu1 %1637 }
 0x3f6   : > { %v2253_v9 = vsel %vm2205_vm2, %v2194_v51, 0  ;;  %8965 = vmatprep.subr.bf16.mxu0 %v10012_v0  ;;  %v2200_v30 = vpack.i.b16 %v2199_v53, %v2198_v54  ;;  %v2299_v57 = vsel %vm2205_vm2, %v2197_v52, 0  ;;  %v1645_v41 = vcombine.low %v1634_v38, %v1638_v39 }
 0x3f7   : > { %8960 = vmatpush3.bf16.msra.mxu1 %v2253_v9  ;;  %v1646_v44 = vcombine.high %v1634_v38, %v1638_v39 }
 0x3f8   : > { %8956 = vmatmul.mubr.msk.bf16.vlgmr.msra.gmra.mrb[4].mxu0 %vm2201_vm3, %v1773_v55  ;;  %8971 = vmatprep.subr.bf16.mxu1 %v10012_v0  ;;  %v2345_v60 = vsel %vm2205_vm2, %v2200_v30, 0 }
 0x3f9   : > { %8966 = vmatpush3.bf16.msra.mxu0 %v2299_v57  ;;  %8967 = vmatprep.mubr.msk.bf16.mxu0 %vm10013_vm0, %v10012_v0  ;;  %v1660_v49 = vrot.slane %v1646_v44, %v10596_v29 }
 0x3fa   : > { %8962 = vmatmul.mubr.msk.bf16.vlgmr.msra.gmra.mrb[4].mxu1 %vm2201_vm3, %v1776_v58  ;;  %8977 = vmatprep.subr.bf16.mxu0 %v10012_v0 }
 0x3fb   : > { %8972 = vmatpush3.bf16.msra.mxu1 %v2345_v60  ;;  %8973 = vmatprep.mubr.msk.bf16.mxu1 %vm10013_vm0, %v10012_v0 }
 0x3fc   : > { %8983 = vmatprep.subr.bf16.mxu1 %v10012_v0 }
 0x3fe   : > { %v1636_v42 = vpop.permute.xlu0 %1635 }
 0x400   : > { %8968 = vmatmul.mubr.msk.bf16.vlgmr.msra.gmra.mrb[8].mxu0 %vm2201_vm3, %v1779_v63 }
 0x401   : > { %8979 = vmatprep.mubr.msk.bf16.mxu0 %vm10013_vm0, %v10012_v0 }
 0x402   : > { %8974 = vmatmul.mubr.msk.bf16.vlgmr.msra.gmra.mrb[8].mxu1 %vm2201_vm3, %v1782_v59 }
 0x403   : > { %8985 = vmatprep.mubr.msk.bf16.mxu1 %vm10013_vm0, %v10012_v0 }
 0x4cb   : > { %v2243_v4 = vpop.f32.mrb[4].mxu0 }
 0x4cc   : > { %v2387_v6 = vmul.f32 0.35355338, %v2243_v4  ;;  %v8957_v7 = vpop.f32.mrb[5].mxu0 }
 0x4cd   : > { %v2246_v8 = vpop.f32.mrb[6].mxu0  ;;  %v2289_v10 = vpop.f32.mrb[4].mxu1 }
 0x4ce   : > { %v2388_v11 = vmul.f32 0.35355338, %v2289_v10  ;;  %v8958_v12 = vpop.f32.mrb[7].mxu0  ;;  %v8963_v13 = vpop.f32.mrb[5].mxu1  ;;  %v10702_v14 = vsel %vm10696_vm4, -1e+09, %v2387_v6 }
 0x4cf   : > { %v2292_v15 = vpop.f32.mrb[6].mxu1  ;;  %v2397_v16 = vsel %vm2201_vm3, %v10702_v14, -inf }
 0x4d0   : > { %v8964_v17 = vpop.f32.mrb[7].mxu1  ;;  %2398 = vmax.xlane.f32.xlu1 %v2397_v16  ;;  %v10708_v18 = vsel %vm10696_vm4, -1e+09, %v2388_v11 }
 0x4d1   : > { %v2400_v25 = vsel %vm2201_vm3, %v10708_v18, -inf }
 0x4d3   : > { %v2335_v19 = vpop.f32.mrb[8].mxu0 }
 0x4d4   : > { %v8969_v20 = vpop.f32.mrb[9].mxu0  ;;  %v2389_v35 = vmul.f32 0.35355338, %v2335_v19 }
 0x4d5   : > { %v2338_v21 = vpop.f32.mrb[10].mxu0  ;;  %v2381_v22 = vpop.f32.mrb[8].mxu1 }
 0x4d6   : > { %v2390_v23 = vmul.f32 0.35355338, %v2381_v22  ;;  %v8970_v26 = vpop.f32.mrb[11].mxu0  ;;  %v8975_v28 = vpop.f32.mrb[9].mxu1  ;;  %v10718_v36 = vsel %vm10696_vm4, -1e+09, %v2389_v35 }
 0x4d7   : > { %v2384_v31 = vpop.f32.mrb[10].mxu1  ;;  %v2403_v37 = vsel %vm2201_vm3, %v10718_v36, -inf }
 0x4d8   : > { %v8976_v32 = vpop.f32.mrb[11].mxu1  ;;  %v10712_v34 = vsel %vm10696_vm4, -1e+09, %v2390_v23 }
 0x4d9   : > { %v2406_v63 = vsel %vm2201_vm3, %v10712_v34, -inf }
 0x4e1   : > { %1639 = vrot.lane.b32.xlu1 %v10588_v24, %s11778_s30  ;;  %v1653_v24 = vrot.slane %v1645_v41, %v10596_v29  ;;  %s10022_s30 = smov 8  }
 0x505   : > { %2404 = vmax.xlane.f32.xlu1 %v2403_v37 }
 0x55d   : > { %v10722_v40 = vpop.xlane.xlu1 %2398 }
 0x561   : > { %v1640_v43 = vpop.permute.xlu1 %1639 }
 0x562   : > { %v1661_v45 = vcombine.low %v1636_v42, %v1640_v43  ;;  %v1662_v46 = vcombine.high %v1636_v42, %v1640_v43 }
 0x564   : > { %v1669_v47 = vrot.slane %v1661_v45, %v10596_v29  ;;  %v1676_v48 = vrot.slane %v1662_v46, %v10596_v29 }
 0x566   : > { %v1677_v50 = vcombine.low %v1653_v24, %v1669_v47  ;;  %v1693_v52 = vcombine.low %v1660_v49, %v1676_v48  ;;  %v1694_v56 = vcombine.high %v1660_v49, %v1676_v48  ;;  %v1678_v60 = vcombine.high %v1653_v24, %v1669_v47 }
 0x567   : > { %v2409_v47 = vsub.f32 %v10702_v14, %v10722_v40 }
 0x568   : > { %v1685_v51 = vrot.slane %v1677_v50, %v10604_v33  ;;  %v1701_v55 = vrot.slane %v1693_v52, %v10604_v33  ;;  %v1708_v57 = vrot.slane %v1694_v56, %v10604_v33  ;;  %v1692_v61 = vrot.slane %v1678_v60, %v10604_v33 }
 0x56a   : > { %v1713_v53 = vpack.c.bf16 %v1685_v51, %v1685_v51  ;;  %v1709_v54 = vcombine.high %v1685_v51, %v10012_v0  ;;  %v1717_v30 = vpack.c.bf16 %v1701_v55, %v1701_v55  ;;  %v1719_v58 = vpack.c.bf16 %v1708_v57, %v1708_v57 }
 0x56b   : > { %v1715_v62 = vpack.c.bf16 %v1692_v61, %v1692_v61  ;;  %v1710_v1 = vcombine.high %v1692_v61, %v10012_v0  ;;  %v1711_v2 = vcombine.high %v1701_v55, %v10012_v0  ;;  %v1712_v4 = vcombine.high %v1708_v57, %v10012_v0 }
 0x56c   : > { %2454 = vxpose.xlu0.c.b16.start.end [1/1] (short) (narrow) %v1713_v53, 16  ;;  %v1714_v9 = vpack.c.bf16 %v1709_v54, %v1709_v54 }
 0x56d   : > { %v1716_v59 = vpack.c.bf16 %v1710_v1, %v1710_v1  ;;  %v1718_v3 = vpack.c.bf16 %v1711_v2, %v1711_v2  ;;  %v1720_v5 = vpack.c.bf16 %v1712_v4, %v1712_v4 }
 0x56e   : > { %2470 = vxpose.xlu1.c.b16.start.end [1/1] (short) (narrow) %v1714_v9, 16  ;;  %v2413_v9 = vmul.f32 1.442695, %v2409_v47 }
 0x570   : > { %9395 = vpow2.f32 %v2413_v9 }
 0x572   : > { %2518 = vxpose.xlu1.c.b16.start.end [1/1] (short) (narrow) %v1717_v30, 16 }
 0x576   : > { %2550 = vxpose.xlu1.c.b16.start.end [1/1] (short) (narrow) %v1719_v58, 16 }
 0x579   : > { %2401 = vmax.xlane.f32.xlu0 %v2400_v25 }
 0x57a   : > { %v9396_v61 = vpop.eup %9395 }
 0x592   : > { %v2405_v6 = vpop.xlane.xlu1 %2404 }
 0x593   : > { %v2411_v55 = vsub.f32 %v10718_v36, %v2405_v6 }
 0x595   : > { %v2417_v25 = vmul.f32 1.442695, %v2411_v55 }
 0x5a6   : > { %2486 = vxpose.xlu0.c.b16.start.end [1/1] (short) (narrow) %v1715_v62, 16  ;;  %v2421_v62 = vsel %vm2201_vm3, %v9396_v61, 0.0 }
 0x5b3   : > { %2407 = vmax.xlane.f32.xlu0 %v2406_v63 }
 0x5d2   : > { %v2462_v7 = vpop.trf.xlu0 }
 0x5d4   : > { %v2478_v8 = vpop.trf.xlu1 }
 0x5d8   : > { %v2526_v11 = vpop.trf.xlu1 }
 0x5d9   : > { %v2582_v16 = vcombine.low %v2462_v7, %v2526_v11 }
 0x5db   : > { %v2589_v20 = vrot.slane %v2582_v16, %v10596_v29 }
 0x5dc   : > { %v2558_v15 = vpop.trf.xlu1 }
 0x5e0   : > { %2502 = vxpose.xlu0.c.b16.start.end [1/1] (short) (narrow) %v1716_v59, 16 }
 0x5e4   : > { %2534 = vxpose.xlu0.c.b16.start.end [1/1] (short) (narrow) %v1718_v3, 16 }
 0x5e8   : > { %2566 = vxpose.xlu0.c.b16.start.end [1/1] (short) (narrow) %v1720_v5, 16 }
 0x606   : > { %v2402_v10 = vpop.xlane.xlu0 %2401 }
 0x607   : > { %v2410_v51 = vsub.f32 %v10708_v18, %v2402_v10 }
 0x609   : > { %v2415_v57 = vmul.f32 1.442695, %v2410_v51 }
 0x60b   : > { %9397 = vpow2.f32 %v2415_v57 }
 0x60c   : > { %v2494_v12 = vpop.trf.xlu0  ;;  %9399 = vpow2.f32 %v2417_v25 }
 0x60d   : > { %v2590_v17 = vcombine.low %v2494_v12, %v2558_v15 }
 0x60f   : > { %v2597_v21 = vrot.slane %v2590_v17, %v10596_v29 }
 0x611   : > { %v2598_v26 = vcombine.low %v2589_v20, %v2597_v21  ;;  %v2599_v42 = vcombine.high %v2589_v20, %v2597_v21 }
 0x613   : > { %v2606_v37 = vrot.slane %v2598_v26, %v10604_v33  ;;  %v2613_v54 = vrot.slane %v2599_v42, %v10604_v33 }
 0x615   : > { %v2654_v43 = vshrl.u32 %v2606_v37, 16  ;;  %v2614_v46 = vcombine.high %v2606_v37, %v10019_v27  ;;  %v2670_v58 = vshrl.u32 %v2613_v54, 16  ;;  %v9398_v36 = vpop.eup %9397  ;;  %v2615_v4 = vcombine.high %v2613_v54, %v10019_v27 }
 0x616   : > { %v9400_v63 = vpop.eup %9399 }
 0x617   : > { %v2662_v53 = vshrl.u32 %v2614_v46, 16  ;;  %v2427_v59 = vsel %vm2201_vm3, %v9400_v63, 0.0  ;;  %v2678_v7 = vshrl.u32 %v2615_v4, 16 }
 0x640   : > { %v2408_v13 = vpop.xlane.xlu0 %2407 }
 0x641   : > { %v2412_v14 = vsub.f32 %v10712_v34, %v2408_v13  ;;  %v2424_v34 = vsel %vm2201_vm3, %v9398_v36, 0.0 }
 0x643   : > { %v2419_v60 = vmul.f32 1.442695, %v2412_v14 }
 0x645   : > { %9401 = vpow2.f32 %v2419_v60 }
 0x646   : > { %v2510_v19 = vpop.trf.xlu0 }
 0x64a   : > { %v2542_v22 = vpop.trf.xlu0 }
 0x64b   : > { %v2616_v23 = vcombine.low %v2478_v8, %v2542_v22 }
 0x64d   : > { %v2623_v32 = vrot.slane %v2616_v23, %v10596_v29 }
 0x64e   : > { %v2574_v28 = vpop.trf.xlu0 }
 0x64f   : > { %v2624_v31 = vcombine.low %v2510_v19, %v2574_v28  ;;  %v9402_v1 = vpop.eup %9401 }
 0x650   : > { %v2430_v2 = vsel %vm2201_vm3, %v9402_v1, 0.0 }
 0x651   : > { %v2631_v35 = vrot.slane %v2624_v31, %v10596_v29 }
 0x653   : > { %v2632_v38 = vcombine.low %v2623_v32, %v2631_v35  ;;  %v2633_v39 = vcombine.high %v2623_v32, %v2631_v35 }
 0x655   : > { %v2640_v41 = vrot.slane %v2632_v38, %v10604_v33  ;;  %v2647_v50 = vrot.slane %v2633_v39, %v10604_v33 }
 0x657   : > { %v2652_v44 = vpack.i.b16 %v2640_v41, %v2606_v37  ;;  %v2655_v45 = vshrl.u32 %v2640_v41, 16  ;;  %v2648_v24 = vcombine.high %v2640_v41, %v10019_v27  ;;  %v2671_v30 = vshrl.u32 %v2647_v50, 16 }
 0x658   : > { %v2668_v40 = vpack.i.b16 %v2647_v50, %v2613_v54  ;;  %v2649_v3 = vcombine.high %v2647_v50, %v10019_v27 }
 0x659   : > { %2682 = vxpose.xlu1.c.b16.start.end [1/1] (short) (narrow) %v2652_v44, 16  ;;  %v2656_v48 = vpack.i.b16 %v2655_v45, %v2654_v43  ;;  %v2663_v49 = vshrl.u32 %v2648_v24, 16  ;;  %v2660_v52 = vpack.i.b16 %v2648_v24, %v2614_v46  ;;  %v2672_v18 = vpack.i.b16 %v2671_v30, %v2670_v58 }
 0x65a   : > { %v2679_v5 = vshrl.u32 %v2649_v3, 16  ;;  %v2676_v6 = vpack.i.b16 %v2649_v3, %v2615_v4 }
 0x65b   : > { %2698 = vxpose.xlu0.c.b16.start.end [1/1] (short) (narrow) %v2656_v48, 16  ;;  %v2664_v56 = vpack.i.b16 %v2663_v49, %v2662_v53 }
 0x65c   : > { %v2680_v8 = vpack.i.b16 %v2679_v5, %v2678_v7 }
 0x65d   : > { %2714 = vxpose.xlu1.c.b16.start.end [1/1] (short) (narrow) %v2660_v52, 16 }
 0x65f   : > { %2730 = vxpose.xlu0.c.b16.start.end [1/1] (short) (narrow) %v2664_v56, 16 }
 0x661   : > { %2746 = vxpose.xlu1.c.b16.start.end [1/1] (short) (narrow) %v2668_v40, 16 }
 0x663   : > { %2762 = vxpose.xlu0.c.b16.start.end [1/1] (short) (narrow) %v2672_v18, 16 }
 0x66e   : > { %2422 = vadd.xlane.f32.xlu1 %v2421_v62 }
 0x670   : > { %2425 = vadd.xlane.f32.xlu0 %v2424_v34 }
 0x672   : > { %2428 = vadd.xlane.f32.xlu1 %v2427_v59 }
 0x674   : > { %2431 = vadd.xlane.f32.xlu0 %v2430_v2 }
 0x69f   : > { %2778 = vxpose.xlu1.c.b16.start.end [1/1] (short) (narrow) %v2676_v6, 16 }
 0x6a1   : > { %2794 = vxpose.xlu0.c.b16.start.end [1/1] (short) (narrow) %v2680_v8, 16 }
 0x6bf   : > { %v2690_v10 = vpop.trf.xlu1 }
 0x6c1   : > { %v2706_v11 = vpop.trf.xlu0 }
 0x6c3   : > { %v2722_v12 = vpop.trf.xlu1 }
 0x6c5   : > { %v2738_v13 = vpop.trf.xlu0 }
 0x6c7   : > { %v2754_v15 = vpop.trf.xlu1 }
 0x6c8   : > { %v2810_v22 = vcombine.low %v2690_v10, %v2754_v15 }
 0x6c9   : > { %v2770_v16 = vpop.trf.xlu0 }
 0x6ca   : > { %v2835_v28 = vcombine.low %v2706_v11, %v2770_v16  ;;  %v2817_v38 = vrot.slane %v2810_v22, %v10596_v29 }
 0x6cc   : > { %v2842_v45 = vrot.slane %v2835_v28, %v10596_v29 }
 0x6fb   : > { %v2423_v17 = vpop.xlane.xlu1 %2422 }
 0x6fc   : > { %9403 = vrcp.f32 %v2423_v17 }
 0x6fd   : > { %v2426_v19 = vpop.xlane.xlu0 %2425 }
 0x6fe   : > { %9405 = vrcp.f32 %v2426_v19 }
 0x6ff   : > { %v2429_v20 = vpop.xlane.xlu1 %2428 }
 0x700   : > { %9407 = vrcp.f32 %v2429_v20 }
 0x701   : > { %v2432_v21 = vpop.xlane.xlu0 %2431 }
 0x702   : > { %9409 = vrcp.f32 %v2432_v21 }
 0x705   : > { %v2786_v23 = vpop.trf.xlu1 }
 0x706   : > { %v9404_v26 = vpop.eup %9403  ;;  %v2818_v31 = vcombine.low %v2722_v12, %v2786_v23 }
 0x707   : > { %v2802_v32 = vpop.trf.xlu0  ;;  %v2441_v35 = vmul.f32 %v9404_v26, %v9396_v61 }
 0x708   : > { %v9406_v37 = vpop.eup %9405  ;;  %v2825_v39 = vrot.slane %v2818_v31, %v10596_v29  ;;  %v2843_v41 = vcombine.low %v2738_v13, %v2802_v32 }
 0x709   : > { %v2445_v42 = vpack.c.bf16 %v2441_v35, %v2441_v35  ;;  %v2442_v43 = vmul.f32 %v9406_v37, %v9398_v36 }
 0x70a   : > { %v9408_v44 = vpop.eup %9407  ;;  %v2826_v46 = vcombine.low %v2817_v38, %v2825_v39  ;;  %v2850_v24 = vrot.slane %v2843_v41, %v10596_v29 }
 0x70b   : > { %2450 = vst.msk [vmem:[%s10769_s26] sm:$0xf] %vm2449_vm5, %v2445_v42  ;;  %v2876_v47 = vsel %vm2201_vm3, %v2445_v42, 0  ;;  %v2446_v48 = vpack.c.bf16 %v2442_v43, %v2442_v43  ;;  %v2443_v49 = vmul.f32 %v9408_v44, %v9400_v63  ;;  %v9376_v43 = vld [vmem:[%s11868_s2] sm:$0xff]  }
 0x70c   : > { %v9410_v50 = vpop.eup %9409  ;;  %v2833_v51 = vrot.slane %v2826_v46, %v10604_v33  ;;  %v2851_v52 = vcombine.low %v2842_v45, %v2850_v24  ;;  %8978 = vmatpush3.bf16.xpose.msra.mxu0 %v2876_v47 }
 0x70d   : > { %2451 = vst.msk [vmem:[%s10769_s26 + $0x4] sm:$0xf] %vm2449_vm5, %v2446_v48  ;;  %v2922_v53 = vsel %vm2201_vm3, %v2446_v48, 0  ;;  %8989 = vmatprep.subr.bf16.mxu0 %v10012_v0  ;;  %v2447_v54 = vpack.c.bf16 %v2443_v49, %v2443_v49  ;;  %v2444_v9 = vmul.f32 %v9410_v50, %v9402_v1 }
 0x70e   : > { %v2858_v55 = vrot.slane %v2851_v52, %v10604_v33  ;;  %8984 = vmatpush3.bf16.xpose.msra.mxu1 %v2922_v53  ;;  %v2863_v30 = vshrl.u32 %v2833_v51, 16  ;;  %v2834_v18 = vcombine.high %v2833_v51, %v10019_v27 }
 0x70f   : > { %2452 = vst.msk [vmem:[%s10769_s26 + $0x8] sm:$0xf] %vm2449_vm5, %v2447_v54  ;;  %8995 = vmatprep.subr.bf16.mxu1 %v10012_v0  ;;  %v2448_v56 = vpack.c.bf16 %v2444_v9, %v2444_v9  ;;  %v2968_v25 = vsel %vm2201_vm3, %v2447_v54, 0 }
 0x710   : > { %v2864_v57 = vshrl.u32 %v2858_v55, 16  ;;  %v2862_v14 = vpack.i.b16 %v2858_v55, %v2833_v51  ;;  %v2859_v58 = vcombine.high %v2858_v55, %v10019_v27  ;;  %v2869_v62 = vshrl.u32 %v2834_v18, 16  ;;  %v9377_v51 = vld [vmem:[%s11868_s2 + $0x8] sm:$0xff]   ;;  %s8269_s2 = scalar_lea.sflag [#allocation22], %s10515_s22 }
 0x711   : > { %2453 = vst.msk [vmem:[%s10769_s26 + $0xc] sm:$0xf] %vm2449_vm5, %v2448_v56  ;;  %v3014_v60 = vsel %vm2201_vm3, %v2448_v56, 0 }
 0x712   : > { %v2865_v40 = vpack.i.b16 %v2864_v57, %v2863_v30  ;;  %v2870_v61 = vshrl.u32 %v2859_v58, 16  ;;  %v2868_v36 = vpack.i.b16 %v2859_v58, %v2834_v18 }
 0x713   : > { %8980 = vmatmul.mubr.msk.bf16.vlgmr.msra.gmra.mrb[12].mxu0 %vm2201_vm3, %v2862_v14 }
 0x714   : > { %8990 = vmatpush3.bf16.xpose.msra.mxu0 %v2968_v25  ;;  %8991 = vmatprep.mubr.msk.bf16.mxu0 %vm10013_vm0, %v10012_v0  ;;  %v2871_v63 = vpack.i.b16 %v2870_v61, %v2869_v62 }
 0x715   : > { %8986 = vmatmul.mubr.msk.bf16.vlgmr.msra.gmra.mrb[12].mxu1 %vm2201_vm3, %v2865_v40  ;;  %9001 = vmatprep.subr.bf16.mxu0 %v10012_v0 }
 0x716   : > { %8996 = vmatpush3.bf16.xpose.msra.mxu1 %v3014_v60  ;;  %8997 = vmatprep.mubr.msk.bf16.mxu1 %vm10013_vm0, %v10012_v0 }
 0x717   : > { %9009 = vmatprep.subr.bf16.mxu1 %v10012_v0 }
 0x71b   : > { %8992 = vmatmul.mubr.msk.bf16.vlgmr.msra.gmra.mrb[16].mxu0 %vm2201_vm3, %v2868_v36 }
 0x71c   : > { %9005 = vmatprep.mubr.msk.bf16.mxu0 %vm10013_vm0, %v10012_v0  ;;  %9002 = vmatpush3.bf16.msra.mxu0 %v9376_v43 }
 0x71d   : > { %8998 = vmatmul.mubr.msk.bf16.vlgmr.msra.gmra.mrb[16].mxu1 %vm2201_vm3, %v2871_v63  ;;  %9003 = vmatprep.subr.bf16.mxu0 %v10012_v0 }
 0x71e   : > { %9013 = vmatprep.mubr.msk.bf16.mxu1 %vm10013_vm0, %v10012_v0 }
 0x720   : > { %9004 = vmatpush3.bf16.msra.mxu0 %v9377_v51 }
 0x721   : > { %9017 = vmatprep.subr.bf16.mxu0 %v10012_v0 }
 0x7e6   : > { %v2912_v34 = vpop.f32.mrb[12].mxu0 }
 0x7e7   : > { %3056 = vxpose.xlu1.b32.start.end [1/1] (short) (narrow) %v2912_v34, 8  ;;  %v8981_v1 = vpop.f32.mrb[13].mxu0 }
 0x7e8   : > { %v2915_v59 = vpop.f32.mrb[14].mxu0  ;;  %v2958_v2 = vpop.f32.mrb[12].mxu1 }
 0x7e9   : > { %3088 = vxpose.xlu0.b32.start.end [1/1] (short) (narrow) %v2958_v2, 8  ;;  %v8982_v3 = vpop.f32.mrb[15].mxu0  ;;  %v8987_v4 = vpop.f32.mrb[13].mxu1 }
 0x7ea   : > { %v2961_v5 = vpop.f32.mrb[14].mxu1  ;;  %v9378_v3 = vld [vmem:[%s11869_s7] sm:$0xff]   ;;  %s11882_s7 = smov 16  }
 0x7eb   : > { %v8988_v6 = vpop.f32.mrb[15].mxu1 }
 0x7ec   : > { %v9379_v6 = vld [vmem:[%s11870_s29 + $0x8] sm:$0xff]  }
 0x7ee   : > { %v3004_v7 = vpop.f32.mrb[16].mxu0 }
 0x7ef   : > { %3120 = vxpose.xlu0.b32.start.end [1/1] (short) (narrow) %v3004_v7, 8  ;;  %v8993_v8 = vpop.f32.mrb[17].mxu0  ;;  %v8774_v7 = vld [vmem:[#allocation13] ss:$0 sm:$0xff] }
 0x7f0   : > { %v3007_v10 = vpop.f32.mrb[18].mxu0  ;;  %v3050_v11 = vpop.f32.mrb[16].mxu1 }
 0x7f1   : > { %v8999_v12 = vpop.f32.mrb[17].mxu1  ;;  %3152 = vxpose.xlu1.b32.start.end [1/1] (short) (narrow) %v3050_v11, 8  ;;  %v8994_v13 = vpop.f32.mrb[19].mxu0 }
 0x7f2   : > { %v3053_v15 = vpop.f32.mrb[18].mxu1 }
 0x7f3   : > { %v9000_v16 = vpop.f32.mrb[19].mxu1  ;;  %v9451_v15 = vld [vmem:[%s10563_s23] sm:$0xff]  ;;  %s11877_s23 = scalar_lea.vmem [#allocation7], %s10518_s1 }
 0x867   : > { %v3072_v19 = vpop.trf.xlu1 }
 0x869   : > { %v3104_v17 = vpop.trf.xlu0 }
 0x86f   : > { %v3136_v20 = vpop.trf.xlu0 }
 0x870   : > { %v3184_v21 = vcombine.low %v3072_v19, %v3136_v20  ;;  %v3185_v22 = vcombine.high %v3072_v19, %v3136_v20 }
 0x871   : > { %v3168_v23 = vpop.trf.xlu1 }
 0x872   : > { %v3200_v26 = vcombine.low %v3104_v17, %v3168_v23  ;;  %v3201_v28 = vcombine.high %v3104_v17, %v3168_v23  ;;  %v3192_v35 = vrot.slane %v3184_v21, %v10596_v29  ;;  %v3199_v37 = vrot.slane %v3185_v22, %v10596_v29  ;;  %v8784_v23 = vld [vmem:[#allocation19] ss:$0 sm:$0xff] }
 0x874   : > { %v3208_v31 = vrot.slane %v3200_v26, %v10596_v29  ;;  %v3215_v32 = vrot.slane %v3201_v28, %v10596_v29 }
 0x876   : > { %v3216_v38 = vcombine.low %v3192_v35, %v3208_v31  ;;  %v3217_v39 = vcombine.high %v3192_v35, %v3208_v31  ;;  %v3232_v41 = vcombine.low %v3199_v37, %v3215_v32  ;;  %v3233_v42 = vcombine.high %v3199_v37, %v3215_v32 }
 0x878   : > { %v3224_v44 = vrot.slane %v3216_v38, %v10604_v33  ;;  %v3231_v45 = vrot.slane %v3217_v39, %v10604_v33  ;;  %v3240_v46 = vrot.slane %v3232_v41, %v10604_v33  ;;  %v3247_v24 = vrot.slane %v3233_v42, %v10604_v33 }
 0x87a   : > { %v3252_v47 = vcombine.low %v3224_v44, %v3231_v45  ;;  %v8772_v48 = vcombine.high %v3224_v44, %v3231_v45  ;;  %v3268_v49 = vcombine.low %v3240_v46, %v3247_v24  ;;  %v8773_v50 = vcombine.high %v3240_v46, %v3247_v24 }
 0x87c   : > { %v3259_v52 = vrot.slane %v3252_v47, %v10596_v29  ;;  %v3267_v53 = vrot.slane %v8772_v48, %v10596_v29  ;;  %v3275_v54 = vrot.slane %v3268_v49, %v10596_v29  ;;  %v3283_v9 = vrot.slane %v8773_v50, %v10596_v29 }
 0x87e   : > { %v3285_v55 = vcombine.high %v3259_v52, %v3267_v53  ;;  %v3301_v56 = vcombine.high %v3275_v54, %v3283_v9  ;;  %v3284_v30 = vcombine.low %v3259_v52, %v3267_v53  ;;  %v3300_v57 = vcombine.low %v3275_v54, %v3283_v9 }
 0x880   : > { %v3299_v14 = vrot.slane %v3285_v55, %v10604_v33  ;;  %v3315_v40 = vrot.slane %v3301_v56, %v10604_v33  ;;  %v3292_v58 = vrot.slane %v3284_v30, %v10604_v33  ;;  %v3308_v25 = vrot.slane %v3300_v57, %v10604_v33 }
 0x882   : > { %v3318_v18 = vcombine.low %v3299_v14, %v3315_v40  ;;  %v3317_v60 = vcombine.high %v3292_v58, %v3308_v25  ;;  %v3316_v61 = vcombine.low %v3292_v58, %v3308_v25  ;;  %v3319_v36 = vcombine.high %v3299_v14, %v3315_v40 }
 0x884   : > { %3325 = vrot.lane.b32.xlu1 %v3318_v18, %s11782_s14  ;;  %3321 = vrot.lane.b32.xlu0 %v3317_v60, %s10022_s30  ;;  %s1318_s14 = scalar_lea.vmem %s11871_s12, %s8749_s18  ;;  %s11872_s12 = sld [smem:[#allocation46_spill]] }
 0x885   : > { %v3502_v5 = vld [vmem:[%s1318_s14] sm:$0xff]   ;;  %s11873_s14 = smov 104   ;;  %s11876_s18 = sld [smem:[#allocation51_spill]] }
 0x888   : > { %3329 = vrot.lane.b32.xlu1 %v3319_v36, %s10023_s0 }
 0x88a   : > { %v9380_v39 = vld [vmem:[%s11872_s12] sm:$0xff]   ;;  %v9381_v41 = vld [vmem:[%s11872_s12 + $0x8] sm:$0xff]  }
 0x88b   : > { %9010 = vmatpush3.bf16.msra.mxu1 %v9380_v39 }
 0x88c   : > { %9011 = vmatprep.subr.bf16.mxu1 %v10012_v0 }
 0x88f   : > { %9012 = vmatpush3.bf16.msra.mxu1 %v9381_v41 }
 0x890   : > { %9025 = vmatprep.subr.bf16.mxu1 %v10012_v0 }
 0x8f6   : > { %v3326_v62 = vpop.permute.xlu1 %3325  ;;  %v3322_v63 = vpop.permute.xlu0 %3321 }
 0x8f7   : > { %v3332_v34 = vsel %vm2201_vm3, %v3316_v61, %v3322_v63 }
 0x8f8   : > { %v3334_v59 = vsel %vm3333_vm6, %v3332_v34, %v3326_v62 }
 0x8fa   : > { %v3330_v1 = vpop.permute.xlu1 %3329 }
 0x8fb   : > { %v3336_v2 = vsel %vm3335_vm7, %v3334_v59, %v3330_v1  ;;  %v8778_v1 = vld [vmem:[#allocation14] ss:$0 sm:$0xff] }
 0x8fc   : > { %v3337_v4 = vpack.c.bf16 %v3336_v2, %v3336_v2 }
 0x8fe   : > { %9006 = vmatmul.mubr.msk.bf16.vlgmr.msra.gmra.mrb[20].mxu0 %vm1354_vm1, %v3337_v4 }
 0x8ff   : > { %9018 = vmatpush3.bf16.msra.mxu0 %v9378_v3  ;;  %9021 = vmatprep.mubr.msk.bf16.mxu0 %vm10013_vm0, %v10012_v0 }
 0x900   : > { %9019 = vmatprep.subr.bf16.mxu0 %v10012_v0 }
 0x903   : > { %9020 = vmatpush3.bf16.msra.mxu0 %v9379_v6 }
 0x904   : > { %9033 = vmatprep.subr.bf16.mxu0 %v10012_v0 }
 0x906   : > { %9022 = vmatmul.mubr.msk.bf16.vlgmr.msra.gmra.mrb[24].mxu0 %vm1354_vm1, %v3502_v5 }
 0x907   : > { %9035 = vmatprep.mubr.msk.bf16.mxu0 %vm10013_vm0, %v10012_v0 }
 0x9d1   : > { %v3398_v8 = vpop.f32.mrb[20].mxu0 }
 0x9d2   : > { %v3399_v10 = vadd.f32 %v8774_v7, %v3398_v8  ;;  %v9007_v11 = vpop.f32.mrb[21].mxu0 }
 0x9d3   : > { %v3401_v12 = vpop.f32.mrb[22].mxu0 }
 0x9d4   : > { %v9008_v13 = vpop.f32.mrb[23].mxu0  ;;  %v3404_v16 = vadd.f32 %v9451_v15, %v3399_v10  ;;  %v8779_v10 = vld [vmem:[#allocation16] ss:$0 sm:$0xff] }
 0x9d6   : > { %v3407_v17 = vsel %vm1354_vm1, %v3404_v16, 0.0 }
 0x9d7   : > { %3408 = vadd.xlane.f32.xlu1 %v3407_v17 }
 0x9d9   : > { %v3569_v19 = vpop.f32.mrb[24].mxu0 }
 0x9da   : > { %v9023_v20 = vpop.f32.mrb[25].mxu0  ;;  %v10846_v28 = vadd.f32 %v8784_v23, %v3569_v19 }
 0x9db   : > { %v3572_v21 = vpop.f32.mrb[26].mxu0 }
 0x9dc   : > { %v9024_v22 = vpop.f32.mrb[27].mxu0  ;;  %v10844_v26 = vadd.f32 %v8784_v23, %v3572_v21 }
 0x9e8   : > { %3733 = vrot.lane.b32.xlu1 %v10844_v26, %s10015_s20 }
 0x9ec   : > { %3737 = vrot.lane.b32.xlu1 %v10846_v28, %s10016_s3 }
 0x9f0   : > { %3743 = vrot.lane.b32.xlu1 %v10846_v28, %s11873_s14 }
 0xa64   : > { %v3409_v31 = vpop.xlane.xlu1 %3408 }
 0xa65   : > { %v3411_v32 = vmul.f32 0.03125, %v3409_v31 }
 0xa67   : > { %v3412_v35 = vsub.f32 %v3404_v16, %v3411_v32 }
 0xa68   : > { %v10865_v42 = vpop.permute.xlu1 %3733 }
 0xa69   : > { %v3413_v37 = vmul.f32 %v3412_v35, %v3412_v35 }
 0xa6b   : > { %v3414_v38 = vsel %vm1354_vm1, %v3413_v37, 0.0 }
 0xa6c   : > { %3415 = vadd.xlane.f32.xlu0 %v3414_v38  ;;  %v10867_v43 = vpop.permute.xlu1 %3737 }
 0xa6d   : > { %v3749_v24 = vcombine.low %v10846_v28, %v10867_v43  ;;  %v3750_v48 = vcombine.high %v10846_v28, %v10867_v43 }
 0xa6f   : > { %v3757_v52 = vrot.slane %v3749_v24, %v10596_v29  ;;  %v3764_v9 = vrot.slane %v3750_v48, %v10596_v29 }
 0xa70   : > { %v10869_v46 = vpop.permute.xlu1 %3743 }
 0xa82   : > { %3731 = vrot.lane.b32.xlu0 %v10846_v28, %s10015_s20 }
 0xa86   : > { %3739 = vrot.lane.b32.xlu0 %v10844_v26, %s10016_s3 }
 0xa8a   : > { %3745 = vrot.lane.b32.xlu0 %v10844_v26, %s11873_s14 }
 0xaf9   : > { %v3416_v44 = vpop.xlane.xlu0 %3415 }
 0xafa   : > { %v3417_v45 = vmul.f32 0.03125, %v3416_v44 }
 0xafc   : > { %v3418_v47 = vadd.f32 1e-05, %v3417_v45 }
 0xafd   : > { %v10875_v49 = vpop.permute.xlu0 %3731 }
 0xafe   : > { %9411 = vrsqrt.f32 %v3418_v47  ;;  %v3765_v50 = vcombine.low %v10875_v49, %v10869_v46  ;;  %v3766_v51 = vcombine.high %v10875_v49, %v10869_v46 }
 0xb00   : > { %v3773_v53 = vrot.slane %v3765_v50, %v10596_v29  ;;  %v3780_v54 = vrot.slane %v3766_v51, %v10596_v29 }
 0xb01   : > { %v10885_v55 = vpop.permute.xlu0 %3739 }
 0xb02   : > { %v3781_v56 = vcombine.low %v3757_v52, %v3773_v53  ;;  %v3782_v30 = vcombine.high %v3757_v52, %v3773_v53  ;;  %v3797_v57 = vcombine.low %v3764_v9, %v3780_v54  ;;  %v3817_v14 = vcombine.low %v10844_v26, %v10885_v55 }
 0xb03   : > { %v3798_v18 = vcombine.high %v3764_v9, %v3780_v54  ;;  %v3818_v13 = vcombine.high %v10844_v26, %v10885_v55 }
 0xb04   : > { %v3789_v40 = vrot.slane %v3781_v56, %v10604_v33  ;;  %v3796_v58 = vrot.slane %v3782_v30, %v10604_v33  ;;  %v3805_v62 = vrot.slane %v3797_v57, %v10604_v33  ;;  %v3825_v59 = vrot.slane %v3817_v14, %v10596_v29 }
 0xb05   : > { %v10891_v25 = vpop.permute.xlu0 %3745  ;;  %v3812_v5 = vrot.slane %v3798_v18, %v10604_v33  ;;  %v3832_v31 = vrot.slane %v3818_v13, %v10596_v29 }
 0xb06   : > { %v3833_v60 = vcombine.low %v10865_v42, %v10891_v25  ;;  %v3885_v61 = vpack.c.bf16 %v3789_v40, %v3789_v40  ;;  %v3813_v36 = vcombine.high %v3789_v40, %v10012_v0  ;;  %v3814_v63 = vcombine.high %v3796_v58, %v10012_v0 }
 0xb07   : > { %v3834_v6 = vcombine.high %v10865_v42, %v10891_v25  ;;  %v3815_v8 = vcombine.high %v3805_v62, %v10012_v0  ;;  %v3887_v15 = vpack.c.bf16 %v3796_v58, %v3796_v58  ;;  %v3816_v17 = vcombine.high %v3812_v5, %v10012_v0 }
 0xb08   : > { %v9412_v34 = vpop.eup %9411  ;;  %v3841_v2 = vrot.slane %v3833_v60, %v10596_v29  ;;  %4139 = vxpose.xlu1.c.b16.start.end [1/1] (short) (narrow) %v3885_v61, 16  ;;  %v3886_v3 = vpack.c.bf16 %v3813_v36, %v3813_v36  ;;  %v3888_v7 = vpack.c.bf16 %v3814_v63, %v3814_v63  ;;  %v3889_v32 = vpack.c.bf16 %v3805_v62, %v3805_v62 }
 0xb09   : > { %v3420_v4 = vmul.f32 %v9412_v34, %v3412_v35  ;;  %v3848_v19 = vrot.slane %v3834_v6, %v10596_v29  ;;  %v3890_v20 = vpack.c.bf16 %v3815_v8, %v3815_v8  ;;  %v3892_v35 = vpack.c.bf16 %v3816_v17, %v3816_v17 }
 0xb0a   : > { %4155 = vxpose.xlu0.c.b16.start.end [1/1] (short) (narrow) %v3886_v3, 16  ;;  %v3849_v11 = vcombine.low %v3825_v59, %v3841_v2  ;;  %v3850_v22 = vcombine.high %v3825_v59, %v3841_v2  ;;  %v3891_v41 = vpack.c.bf16 %v3812_v5, %v3812_v5 }
 0xb0b   : > { %v3427_v12 = vmul.f32 %v8778_v1, %v3420_v4  ;;  %v3865_v39 = vcombine.low %v3832_v31, %v3848_v19  ;;  %v3866_v47 = vcombine.high %v3832_v31, %v3848_v19 }
 0xb0c   : > { %4187 = vxpose.xlu1.c.b16.start.end [1/1] (short) (narrow) %v3888_v7, 16  ;;  %v3857_v21 = vrot.slane %v3849_v11, %v10604_v33  ;;  %v3864_v38 = vrot.slane %v3850_v22, %v10604_v33 }
 0xb0d   : > { %v10906_v16 = vadd.f32 %v8779_v10, %v3427_v12  ;;  %v3873_v24 = vrot.slane %v3865_v39, %v10604_v33  ;;  %v3880_v52 = vrot.slane %v3866_v47, %v10604_v33 }
 0xb0e   : > { %4171 = vxpose.xlu0.c.b16.start.end [1/1] (short) (narrow) %v3887_v15, 16  ;;  %v3881_v37 = vcombine.high %v3857_v21, %v10012_v0  ;;  %v3882_v45 = vcombine.high %v3864_v38, %v10012_v0  ;;  %v3893_v48 = vpack.c.bf16 %v3857_v21, %v3857_v21  ;;  %v3895_v53 = vpack.c.bf16 %v3864_v38, %v3864_v38 }
 0xb0f   : > { %v3435_v23 = vpack.c.bf16 %v10906_v16, %v10906_v16  ;;  %v3883_v51 = vcombine.high %v3873_v24, %v10012_v0  ;;  %v3884_v9 = vcombine.high %v3880_v52, %v10012_v0  ;;  %v3897_v56 = vpack.c.bf16 %v3873_v24, %v3873_v24 }
 0xb10   : > { %4219 = vxpose.xlu1.c.b16.start.end [1/1] (short) (narrow) %v3890_v20, 16  ;;  %v3894_v44 = vpack.c.bf16 %v3881_v37, %v3881_v37  ;;  %v3896_v50 = vpack.c.bf16 %v3882_v45, %v3882_v45  ;;  %v3899_v57 = vpack.c.bf16 %v3880_v52, %v3880_v52 }
 0xb11   : > { %9014 = vmatmul.mubr.msk.bf16.vlgmr.msra.gmra.mrb[20].mxu1 %vm1354_vm1, %v3435_v23  ;;  %v3898_v54 = vpack.c.bf16 %v3883_v51, %v3883_v51  ;;  %v3900_v30 = vpack.c.bf16 %v3884_v9, %v3884_v9 }
 0xb12   : > { %4203 = vxpose.xlu0.c.b16.start.end [1/1] (short) (narrow) %v3889_v32, 16  ;;  %9029 = vmatprep.mubr.msk.bf16.mxu1 %vm10013_vm0, %v10012_v0 }
 0xb14   : > { %4251 = vxpose.xlu1.c.b16.start.end [1/1] (short) (narrow) %v3892_v35, 16 }
 0xb16   : > { %4235 = vxpose.xlu0.c.b16.start.end [1/1] (short) (narrow) %v3891_v41, 16 }
 0xb18   : > { %4283 = vxpose.xlu1.c.b16.start.end [1/1] (short) (narrow) %v3894_v44, 16 }
 0xb1a   : > { %4267 = vxpose.xlu0.c.b16.start.end [1/1] (short) (narrow) %v3893_v48, 16 }
 0xb1c   : > { %4315 = vxpose.xlu1.c.b16.start.end [1/1] (short) (narrow) %v3896_v50, 16 }
 0xb1e   : > { %4299 = vxpose.xlu0.c.b16.start.end [1/1] (short) (narrow) %v3895_v53, 16 }
 0xb20   : > { %4347 = vxpose.xlu1.c.b16.start.end [1/1] (short) (narrow) %v3898_v54, 16 }
 0xb22   : > { %4331 = vxpose.xlu0.c.b16.start.end [1/1] (short) (narrow) %v3897_v56, 16 }
 0xb24   : > { %4379 = vxpose.xlu1.c.b16.start.end [1/1] (short) (narrow) %v3900_v30, 16 }
 0xb26   : > { %4363 = vxpose.xlu0.c.b16.start.end [1/1] (short) (narrow) %v3899_v57, 16 }
 0xb6e   : > { %v4147_v14 = vpop.trf.xlu1 }
 0xb70   : > { %v4163_v40 = vpop.trf.xlu0 }
 0xb72   : > { %v4195_v58 = vpop.trf.xlu1 }
 0xb74   : > { %v4179_v18 = vpop.trf.xlu0 }
 0xb76   : > { %v4227_v60 = vpop.trf.xlu1 }
 0xb77   : > { %v4463_v59 = vcombine.low %v4163_v40, %v4227_v60 }
 0xb78   : > { %v4211_v61 = vpop.trf.xlu0 }
 0xb79   : > { %v4395_v3 = vcombine.low %v4147_v14, %v4211_v61  ;;  %v4470_v7 = vrot.slane %v4463_v59, %v10596_v29 }
 0xb7a   : > { %v4259_v36 = vpop.trf.xlu1 }
 0xb7b   : > { %v4471_v2 = vcombine.low %v4195_v58, %v4259_v36  ;;  %v4402_v11 = vrot.slane %v4395_v3, %v10596_v29 }
 0xb7c   : > { %v4243_v62 = vpop.trf.xlu0 }
 0xb7d   : > { %v4403_v4 = vcombine.low %v4179_v18, %v4243_v62  ;;  %v4478_v8 = vrot.slane %v4471_v2, %v10596_v29 }
 0xb7e   : > { %v4291_v63 = vpop.trf.xlu1 }
 0xb7f   : > { %v4410_v12 = vrot.slane %v4403_v4, %v10596_v29  ;;  %v4495_v19 = vcombine.low %v4470_v7, %v4478_v8  ;;  %v4496_v22 = vcombine.high %v4470_v7, %v4478_v8 }
 0xb80   : > { %v4275_v34 = vpop.trf.xlu0 }
 0xb81   : > { %v4427_v23 = vcombine.low %v4402_v11, %v4410_v12  ;;  %v4428_v31 = vcombine.high %v4402_v11, %v4410_v12  ;;  %v4503_v45 = vrot.slane %v4495_v19, %v10604_v33  ;;  %v4510_v48 = vrot.slane %v4496_v22, %v10604_v33  ;;  %v9382_v12 = vld [vmem:[%s11874_s8] sm:$0xff]  }
 0xb82   : > { %v4323_v1 = vpop.trf.xlu1  ;;  %9026 = vmatpush3.bf16.msra.mxu1 %v9382_v12 }
 0xb83   : > { %v4435_v24 = vrot.slane %v4427_v23, %v10604_v33  ;;  %v4442_v47 = vrot.slane %v4428_v31, %v10604_v33  ;;  %9027 = vmatprep.subr.bf16.mxu1 %v10012_v0 }
 0xb84   : > { %v4307_v5 = vpop.trf.xlu0 }
 0xb86   : > { %v4355_v6 = vpop.trf.xlu1 }
 0xb87   : > { %v4479_v10 = vcombine.low %v4291_v63, %v4355_v6 }
 0xb88   : > { %v4339_v13 = vpop.trf.xlu0 }
 0xb89   : > { %v4411_v15 = vcombine.low %v4275_v34, %v4339_v13  ;;  %v4486_v20 = vrot.slane %v4479_v10, %v10596_v29  ;;  %v9383_v13 = vld [vmem:[%s11874_s8 + $0x8] sm:$0xff]  }
 0xb8a   : > { %v4387_v17 = vpop.trf.xlu1  ;;  %9028 = vmatpush3.bf16.msra.mxu1 %v9383_v13 }
 0xb8b   : > { %v4487_v21 = vcombine.low %v4323_v1, %v4387_v17  ;;  %v4418_v35 = vrot.slane %v4411_v15, %v10596_v29  ;;  %9039 = vmatprep.subr.bf16.mxu1 %v10012_v0  ;;  %v3576_v15 = vld [vmem:[%s10508_s9] sm:$0xf]  ;;  %v8780_v17 = vld [vmem:[#allocation17] ss:$0 sm:$0xff]  ;;  %s11875_s9 = smov 96  }
 0xb8c   : > { %v4371_v32 = vpop.trf.xlu0 }
 0xb8d   : > { %v4494_v37 = vrot.slane %v4487_v21, %v10596_v29  ;;  %v4419_v38 = vcombine.low %v4307_v5, %v4371_v32  ;;  %9030 = vmatmul.mubr.msk.bf16.vlgmr.msra.gmra.mrb[24].mxu1 %vm1354_vm1, %v3576_v15 }
 0xb8e   : > { %9041 = vmatprep.mubr.msk.bf16.mxu1 %vm10013_vm0, %v10012_v0 }
 0xb8f   : > { %v4511_v39 = vcombine.low %v4486_v20, %v4494_v37  ;;  %v4512_v41 = vcombine.high %v4486_v20, %v4494_v37  ;;  %v4426_v44 = vrot.slane %v4419_v38, %v10596_v29 }
 0xb91   : > { %v4443_v50 = vcombine.low %v4418_v35, %v4426_v44  ;;  %v4444_v51 = vcombine.high %v4418_v35, %v4426_v44  ;;  %v4519_v52 = vrot.slane %v4511_v39, %v10604_v33  ;;  %v4526_v53 = vrot.slane %v4512_v41, %v10604_v33 }
 0xb93   : > { %v4451_v54 = vrot.slane %v4443_v50, %v10604_v33  ;;  %v4527_v9 = vcombine.low %v4503_v45, %v4519_v52  ;;  %v4458_v56 = vrot.slane %v4444_v51, %v10604_v33  ;;  %v4528_v30 = vcombine.high %v4503_v45, %v4519_v52 }
 0xb94   : > { %v4529_v57 = vcombine.low %v4510_v48, %v4526_v53  ;;  %v4530_v14 = vcombine.high %v4510_v48, %v4526_v53 }
 0xb95   : > { %v4459_v40 = vcombine.low %v4435_v24, %v4451_v54  ;;  %v4460_v58 = vcombine.high %v4435_v24, %v4451_v54  ;;  %v4461_v18 = vcombine.low %v4442_v47, %v4458_v56  ;;  %v4462_v60 = vcombine.high %v4442_v47, %v4458_v56 }
 0xb96   : > { %v4536_v61 = vshrl.u32 %v4527_v9, 16  ;;  %v4560_v36 = vshrl.u32 %v4530_v14, 16  ;;  %v4544_v4 = vshrl.u32 %v4528_v30, 16  ;;  %v4552_v10 = vshrl.u32 %v4529_v57, 16 }
 0xb97   : > { %v4533_v62 = vpack.i.b16 %v4527_v9, %v4459_v40  ;;  %v4549_v63 = vpack.i.b16 %v4529_v57, %v4461_v18  ;;  %v4535_v34 = vshrl.u32 %v4459_v40, 16  ;;  %v4559_v1 = vshrl.u32 %v4462_v60, 16 }
 0xb98   : > { %v4557_v59 = vpack.i.b16 %v4530_v14, %v4462_v60  ;;  %v4541_v2 = vpack.i.b16 %v4528_v30, %v4460_v58  ;;  %v4543_v3 = vshrl.u32 %v4460_v58, 16  ;;  %v4551_v8 = vshrl.u32 %v4461_v18, 16 }
 0xb99   : > { %4563 = vxpose.xlu0.c.b16.start.end [1/1] (short) (narrow) %v4533_v62, 16  ;;  %4627 = vxpose.xlu1.c.b16.start.end [1/1] (short) (narrow) %v4549_v63, 16  ;;  %v4537_v5 = vpack.i.b16 %v4536_v61, %v4535_v34  ;;  %v4561_v6 = vpack.i.b16 %v4560_v36, %v4559_v1 }
 0xb9a   : > { %v4545_v7 = vpack.i.b16 %v4544_v4, %v4543_v3  ;;  %v4553_v11 = vpack.i.b16 %v4552_v10, %v4551_v8 }
 0xb9d   : > { %4595 = vxpose.xlu0.c.b16.start.end [1/1] (short) (narrow) %v4541_v2, 16  ;;  %4579 = vxpose.xlu1.c.b16.start.end [1/1] (short) (narrow) %v4537_v5, 16 }
 0xba1   : > { %4611 = vxpose.xlu0.c.b16.start.end [1/1] (short) (narrow) %v4545_v7, 16 }
 0xba5   : > { %4643 = vxpose.xlu0.c.b16.start.end [1/1] (short) (narrow) %v4553_v11, 16 }
 0xbe4   : > { %v3496_v19 = vpop.f32.mrb[20].mxu1 }
 0xbe5   : > { %v10948_v20 = vadd.f32 %v8780_v17, %v3496_v19  ;;  %v9015_v21 = vpop.f32.mrb[21].mxu1 }
 0xbe6   : > { %v3499_v22 = vpop.f32.mrb[22].mxu1 }
 0xbe7   : > { %v9016_v23 = vpop.f32.mrb[23].mxu1  ;;  %3647 = vrot.lane.b32.xlu1 %v10948_v20, %s10016_s3  ;;  %3644 = vrot.lane.b32.xlu0 %v10948_v20, %s10015_s20 }
 0xbeb   : > { %3650 = vrot.lane.b32.xlu1 %v10948_v20, %s11873_s14 }
 0xbff   : > { %v4635_v31 = vpop.trf.xlu1 }
 0xc05   : > { %4675 = vxpose.xlu0.c.b16.start.end [1/1] (short) (narrow) %v4561_v6, 16 }
 0xc0e   : > { %4659 = vxpose.xlu1.c.b16.start.end [1/1] (short) (narrow) %v4557_v59, 16  ;;  %3903 = vrot.lane.b32.xlu0 %v10844_v26, %s11875_s9  ;;  %v4571_v26 = vpop.trf.xlu0 }
 0xc0f   : > { %v4691_v2 = vcombine.low %v4571_v26, %v4635_v31 }
 0xc11   : > { %v4698_v10 = vrot.slane %v4691_v2, %v10596_v29 }
 0xc12   : > { %3901 = vrot.lane.b32.xlu1 %v10846_v28, %s11875_s9  ;;  %3909 = vrot.lane.b32.xlu0 %v10867_v43, %s11875_s9  ;;  %v4603_v28 = vpop.trf.xlu0  ;;  %v4587_v43 = vpop.trf.xlu1 }
 0xc16   : > { %3905 = vrot.lane.b32.xlu1 %v10875_v49, %s11875_s9  ;;  %3913 = vrot.lane.b32.xlu0 %v10869_v46, %s11875_s9  ;;  %v4619_v32 = vpop.trf.xlu0 }
 0xc1a   : > { %3907 = vrot.lane.b32.xlu1 %v10865_v42, %s11875_s9  ;;  %v4651_v35 = vpop.trf.xlu0 }
 0xc1b   : > { %v4716_v9 = vcombine.low %v4587_v43, %v4651_v35 }
 0xc1d   : > { %v4723_v18 = vrot.slane %v4716_v9, %v10596_v29 }
 0xc1e   : > { %3911 = vrot.lane.b32.xlu1 %v10885_v55, %s11875_s9 }
 0xc22   : > { %3915 = vrot.lane.b32.xlu1 %v10891_v25, %s11875_s9 }
 0xc59   : > { %v10972_v37 = vpop.permute.xlu1 %3647  ;;  %v10978_v49 = vpop.permute.xlu0 %3644 }
 0xc5a   : > { %v3653_v46 = vcombine.low %v10948_v20, %v10972_v37  ;;  %v3654_v42 = vcombine.high %v10948_v20, %v10972_v37 }
 0xc5c   : > { %v3661_v39 = vrot.slane %v3653_v46, %v10596_v29  ;;  %v3668_v41 = vrot.slane %v3654_v42, %v10596_v29 }
 0xc5d   : > { %v10980_v55 = vpop.permute.xlu1 %3650 }
 0xc5e   : > { %v3669_v25 = vcombine.low %v10978_v49, %v10980_v55  ;;  %v3670_v38 = vcombine.high %v10978_v49, %v10980_v55 }
 0xc60   : > { %v3677_v44 = vrot.slane %v3669_v25, %v10596_v29  ;;  %v3684_v45 = vrot.slane %v3670_v38, %v10596_v29 }
 0xc62   : > { %v3685_v24 = vcombine.low %v3661_v39, %v3677_v44  ;;  %v3686_v47 = vcombine.high %v3661_v39, %v3677_v44  ;;  %v3701_v48 = vcombine.low %v3668_v41, %v3684_v45  ;;  %v3702_v50 = vcombine.high %v3668_v41, %v3684_v45 }
 0xc64   : > { %v3693_v51 = vrot.slane %v3685_v24, %v10604_v33  ;;  %v3700_v52 = vrot.slane %v3686_v47, %v10604_v33  ;;  %v3709_v53 = vrot.slane %v3701_v48, %v10604_v33  ;;  %v3716_v54 = vrot.slane %v3702_v50, %v10604_v33 }
 0xc66   : > { %v3717_v56 = vcombine.high %v3693_v51, %v10012_v0  ;;  %v3718_v30 = vcombine.high %v3700_v52, %v10012_v0  ;;  %v3719_v57 = vcombine.high %v3709_v53, %v10012_v0  ;;  %v3720_v14 = vcombine.high %v3716_v54, %v10012_v0 }
 0xc67   : > { %v8793_v62 = vpack.c.bf16 %v3709_v53, %v3693_v51  ;;  %v8794_v63 = vpack.c.bf16 %v3716_v54, %v3700_v52 }
 0xc68   : > { %v8795_v60 = vpack.c.bf16 %v3719_v57, %v3717_v56  ;;  %v8796_v61 = vpack.c.bf16 %v3720_v14, %v3718_v30 }
 0xc69   : > { %v4084_v3 = vrot.slane %v8793_v62, %v10596_v29  ;;  %v4092_v4 = vrot.slane %v8794_v63, %v10596_v29 }
 0xc6a   : > { %v4109_v34 = vrot.slane %v8795_v60, %v10596_v29  ;;  %v4117_v1 = vrot.slane %v8796_v61, %v10596_v29 }
 0xc6b   : > { %v4683_v40 = vpop.trf.xlu0  ;;  %v4093_v12 = vcombine.low %v4084_v3, %v4092_v4 }
 0xc6c   : > { %v4724_v58 = vcombine.low %v4619_v32, %v4683_v40  ;;  %v4118_v8 = vcombine.low %v4109_v34, %v4117_v1 }
 0xc6d   : > { %v4100_v21 = vrot.slane %v4093_v12, %v10604_v33 }
 0xc6e   : > { %v4731_v36 = vrot.slane %v4724_v58, %v10596_v29  ;;  %v4125_v15 = vrot.slane %v4118_v8, %v10604_v33 }
 0xc6f   : > { %v4130_v41 = vshrl.u32 %v4100_v21, 16  ;;  %v4101_v51 = vcombine.high %v4100_v21, %v10019_v27 }
 0xc70   : > { %v4732_v59 = vcombine.low %v4723_v18, %v4731_v36  ;;  %v4131_v31 = vshrl.u32 %v4125_v15, 16  ;;  %v4129_v39 = vpack.i.b16 %v4125_v15, %v4100_v21  ;;  %v4126_v45 = vcombine.high %v4125_v15, %v10019_v27 }
 0xc71   : > { %v4136_v57 = vshrl.u32 %v4101_v51, 16 }
 0xc72   : > { %v4739_v7 = vrot.slane %v4732_v59, %v10604_v33  ;;  %v4132_v47 = vpack.i.b16 %v4131_v31, %v4130_v41  ;;  %v4137_v53 = vshrl.u32 %v4126_v45, 16  ;;  %v4135_v58 = vpack.i.b16 %v4126_v45, %v4101_v51 }
 0xc74   : > { %v4667_v5 = vpop.trf.xlu1  ;;  %v4740_v17 = vcombine.high %v4739_v7, %v10019_v27  ;;  %v4745_v26 = vshrl.u32 %v4739_v7, 16  ;;  %v4138_v18 = vpack.i.b16 %v4137_v53, %v4136_v57 }
 0xc75   : > { %v4699_v6 = vcombine.low %v4603_v28, %v4667_v5 }
 0xc76   : > { %v4751_v32 = vshrl.u32 %v4740_v17, 16 }
 0xc77   : > { %v4706_v11 = vrot.slane %v4699_v6, %v10596_v29 }
 0xc79   : > { %v4707_v13 = vcombine.low %v4698_v10, %v4706_v11 }
 0xc7b   : > { %v4714_v19 = vrot.slane %v4707_v13, %v10604_v33 }
 0xc7d   : > { %v4743_v22 = vpack.i.b16 %v4739_v7, %v4714_v19  ;;  %v4744_v23 = vshrl.u32 %v4714_v19, 16  ;;  %v4715_v28 = vcombine.high %v4714_v19, %v10019_v27 }
 0xc7f   : > { %v4757_v43 = vsel %vm2205_vm2, %v4743_v22, 0  ;;  %v4746_v35 = vpack.i.b16 %v4745_v26, %v4744_v23  ;;  %v4749_v46 = vpack.i.b16 %v4740_v17, %v4715_v28  ;;  %v4750_v42 = vshrl.u32 %v4715_v28, 16 }
 0xc80   : > { %9034 = vmatpush3.bf16.msra.mxu0 %v4757_v43  ;;  %v11013_v25 = vpop.permute.xlu0 %3903 }
 0xc81   : > { %v4803_v38 = vsel %vm2205_vm2, %v4746_v35, 0  ;;  %9045 = vmatprep.subr.bf16.mxu0 %v10012_v0  ;;  %v4752_v44 = vpack.i.b16 %v4751_v32, %v4750_v42  ;;  %v4849_v24 = vsel %vm2205_vm2, %v4749_v46, 0 }
 0xc82   : > { %9040 = vmatpush3.bf16.msra.mxu1 %v4803_v38 }
 0xc83   : > { %9036 = vmatmul.mubr.msk.bf16.vlgmr.msra.gmra.mrb[28].mxu0 %vm2201_vm3, %v4129_v39  ;;  %9051 = vmatprep.subr.bf16.mxu1 %v10012_v0  ;;  %v4895_v52 = vsel %vm2205_vm2, %v4752_v44, 0 }
 0xc84   : > { %v3902_v48 = vpop.permute.xlu1 %3901  ;;  %9046 = vmatpush3.bf16.msra.mxu0 %v4849_v24  ;;  %v3910_v50 = vpop.permute.xlu0 %3909  ;;  %9047 = vmatprep.mubr.msk.bf16.mxu0 %vm10013_vm0, %v10012_v0 }
 0xc85   : > { %9042 = vmatmul.mubr.msk.bf16.vlgmr.msra.gmra.mrb[28].mxu1 %vm2201_vm3, %v4132_v47  ;;  %9057 = vmatprep.subr.bf16.mxu0 %v10012_v0  ;;  %v3925_v54 = vcombine.low %v3902_v48, %v3910_v50  ;;  %v3926_v9 = vcombine.high %v3902_v48, %v3910_v50 }
 0xc86   : > { %9052 = vmatpush3.bf16.msra.mxu1 %v4895_v52  ;;  %9053 = vmatprep.mubr.msk.bf16.mxu1 %vm10013_vm0, %v10012_v0 }
 0xc87   : > { %9063 = vmatprep.subr.bf16.mxu1 %v10012_v0  ;;  %v3933_v60 = vrot.slane %v3925_v54, %v10596_v29  ;;  %v3940_v61 = vrot.slane %v3926_v9, %v10596_v29 }
 0xc88   : > { %v3906_v56 = vpop.permute.xlu1 %3905  ;;  %v3914_v30 = vpop.permute.xlu0 %3913 }
 0xc89   : > { %v3941_v14 = vcombine.low %v3906_v56, %v3914_v30  ;;  %v3942_v40 = vcombine.high %v3906_v56, %v3914_v30 }
 0xc8b   : > { %v3949_v36 = vrot.slane %v3941_v14, %v10596_v29  ;;  %v3956_v62 = vrot.slane %v3942_v40, %v10596_v29  ;;  %9048 = vmatmul.mubr.msk.bf16.vlgmr.msra.gmra.mrb[32].mxu0 %vm2201_vm3, %v4135_v58 }
 0xc8c   : > { %v3908_v63 = vpop.permute.xlu1 %3907  ;;  %9059 = vmatprep.mubr.msk.bf16.mxu0 %vm10013_vm0, %v10012_v0 }
 0xc8d   : > { %v3957_v34 = vcombine.low %v3933_v60, %v3949_v36  ;;  %v3958_v1 = vcombine.high %v3933_v60, %v3949_v36  ;;  %v3973_v59 = vcombine.low %v3940_v61, %v3956_v62  ;;  %9054 = vmatmul.mubr.msk.bf16.vlgmr.msra.gmra.mrb[32].mxu1 %vm2201_vm3, %v4138_v18  ;;  %v3974_v4 = vcombine.high %v3940_v61, %v3956_v62  ;;  %v11062_v60 = vpop.f32.mrb[24].mxu1 }
 0xc8e   : > { %9065 = vmatprep.mubr.msk.bf16.mxu1 %vm10013_vm0, %v10012_v0  ;;  %v9031_v61 = vpop.f32.mrb[25].mxu1 }
 0xc8f   : > { %v3965_v2 = vrot.slane %v3957_v34, %v10604_v33  ;;  %v3972_v3 = vrot.slane %v3958_v1, %v10604_v33  ;;  %v3981_v8 = vrot.slane %v3973_v59, %v10604_v33  ;;  %v3988_v15 = vrot.slane %v3974_v4, %v10604_v33  ;;  %v3640_v36 = vpop.f32.mrb[26].mxu1 }
 0xc90   : > { %v3912_v5 = vpop.permute.xlu1 %3911  ;;  %v9032_v62 = vpop.f32.mrb[27].mxu1 }
 0xc91   : > { %v4061_v6 = vpack.c.bf16 %v3965_v2, %v3965_v2  ;;  %v3989_v7 = vcombine.high %v3965_v2, %v10012_v0  ;;  %v3990_v10 = vcombine.high %v3972_v3, %v10012_v0  ;;  %v3993_v11 = vcombine.low %v11013_v25, %v3912_v5 }
 0xc92   : > { %v3991_v22 = vcombine.high %v3981_v8, %v10012_v0  ;;  %v3994_v23 = vcombine.high %v11013_v25, %v3912_v5  ;;  %v4063_v31 = vpack.c.bf16 %v3972_v3, %v3972_v3  ;;  %v3992_v32 = vcombine.high %v3988_v15, %v10012_v0 }
 0xc93   : > { %5004 = vxpose.xlu1.c.b16.start.end [1/1] (short) (narrow) %v4061_v6, 16  ;;  %v4062_v12 = vpack.c.bf16 %v3989_v7, %v3989_v7  ;;  %v4064_v21 = vpack.c.bf16 %v3990_v10, %v3990_v10  ;;  %v4001_v26 = vrot.slane %v3993_v11, %v10596_v29  ;;  %v4065_v39 = vpack.c.bf16 %v3981_v8, %v3981_v8 }
 0xc94   : > { %v3916_v13 = vpop.permute.xlu1 %3915  ;;  %v4066_v42 = vpack.c.bf16 %v3991_v22, %v3991_v22  ;;  %v4008_v38 = vrot.slane %v3994_v23, %v10596_v29  ;;  %v4068_v44 = vpack.c.bf16 %v3992_v32, %v3992_v32  ;;  %v4067_v47 = vpack.c.bf16 %v3988_v15, %v3988_v15 }
 0xc95   : > { %v4009_v17 = vcombine.low %v3908_v63, %v3916_v13  ;;  %v4010_v19 = vcombine.high %v3908_v63, %v3916_v13  ;;  %5020 = vxpose.xlu0.c.b16.start.end [1/1] (short) (narrow) %v4062_v12, 16 }
 0xc97   : > { %v4017_v28 = vrot.slane %v4009_v17, %v10596_v29  ;;  %5052 = vxpose.xlu1.c.b16.start.end [1/1] (short) (narrow) %v4064_v21, 16  ;;  %v4024_v43 = vrot.slane %v4010_v19, %v10596_v29 }
 0xc99   : > { %v4025_v35 = vcombine.low %v4001_v26, %v4017_v28  ;;  %v4026_v46 = vcombine.high %v4001_v26, %v4017_v28  ;;  %5036 = vxpose.xlu0.c.b16.start.end [1/1] (short) (narrow) %v4063_v31, 16  ;;  %v4041_v41 = vcombine.low %v4008_v38, %v4024_v43  ;;  %v4042_v48 = vcombine.high %v4008_v38, %v4024_v43 }
 0xc9b   : > { %5084 = vxpose.xlu1.c.b16.start.end [1/1] (short) (narrow) %v4066_v42, 16  ;;  %v4033_v25 = vrot.slane %v4025_v35, %v10604_v33  ;;  %v4040_v24 = vrot.slane %v4026_v46, %v10604_v33  ;;  %v4049_v52 = vrot.slane %v4041_v41, %v10604_v33  ;;  %v4056_v56 = vrot.slane %v4042_v48, %v10604_v33 }
 0xc9d   : > { %5068 = vxpose.xlu0.c.b16.start.end [1/1] (short) (narrow) %v4065_v39, 16  ;;  %v4057_v45 = vcombine.high %v4033_v25, %v10012_v0  ;;  %v4058_v51 = vcombine.high %v4040_v24, %v10012_v0  ;;  %v4069_v53 = vpack.c.bf16 %v4033_v25, %v4033_v25  ;;  %v4059_v9 = vcombine.high %v4049_v52, %v10012_v0 }
 0xc9e   : > { %v4071_v30 = vpack.c.bf16 %v4040_v24, %v4040_v24  ;;  %v4060_v14 = vcombine.high %v4056_v56, %v10012_v0  ;;  %v4073_v40 = vpack.c.bf16 %v4049_v52, %v4049_v52  ;;  %v4075_v18 = vpack.c.bf16 %v4056_v56, %v4056_v56 }
 0xc9f   : > { %5116 = vxpose.xlu1.c.b16.start.end [1/1] (short) (narrow) %v4068_v44, 16  ;;  %v4070_v50 = vpack.c.bf16 %v4057_v45, %v4057_v45  ;;  %v4072_v54 = vpack.c.bf16 %v4058_v51, %v4058_v51  ;;  %v4074_v57 = vpack.c.bf16 %v4059_v9, %v4059_v9 }
 0xca0   : > { %v4076_v58 = vpack.c.bf16 %v4060_v14, %v4060_v14 }
 0xca1   : > { %5100 = vxpose.xlu0.c.b16.start.end [1/1] (short) (narrow) %v4067_v47, 16 }
 0xca3   : > { %5148 = vxpose.xlu1.c.b16.start.end [1/1] (short) (narrow) %v4070_v50, 16 }
 0xca5   : > { %5132 = vxpose.xlu0.c.b16.start.end [1/1] (short) (narrow) %v4069_v53, 16 }
 0xca7   : > { %5180 = vxpose.xlu1.c.b16.start.end [1/1] (short) (narrow) %v4072_v54, 16 }
 0xca9   : > { %5164 = vxpose.xlu0.c.b16.start.end [1/1] (short) (narrow) %v4071_v30, 16 }
 0xcab   : > { %5212 = vxpose.xlu1.c.b16.start.end [1/1] (short) (narrow) %v4074_v57, 16 }
 0xcad   : > { %5196 = vxpose.xlu0.c.b16.start.end [1/1] (short) (narrow) %v4073_v40, 16 }
 0xcaf   : > { %5244 = vxpose.xlu1.c.b16.start.end [1/1] (short) (narrow) %v4076_v58, 16 }
 0xcb1   : > { %5228 = vxpose.xlu0.c.b16.start.end [1/1] (short) (narrow) %v4075_v18, 16 }
 0xcf9   : > { %v5012_v63 = vpop.trf.xlu1 }
 0xcfb   : > { %v5028_v34 = vpop.trf.xlu0 }
 0xcfd   : > { %v5060_v1 = vpop.trf.xlu1 }
 0xcff   : > { %v5044_v59 = vpop.trf.xlu0 }
 0xd01   : > { %v5092_v2 = vpop.trf.xlu1 }
 0xd02   : > { %v5328_v12 = vcombine.low %v5028_v34, %v5092_v2 }
 0xd03   : > { %v5076_v3 = vpop.trf.xlu0 }
 0xd04   : > { %v5260_v21 = vcombine.low %v5012_v63, %v5076_v3  ;;  %v5335_v23 = vrot.slane %v5328_v12, %v10596_v29 }
 0xd05   : > { %v5124_v4 = vpop.trf.xlu1 }
 0xd06   : > { %v5336_v10 = vcombine.low %v5060_v1, %v5124_v4  ;;  %v5267_v46 = vrot.slane %v5260_v21, %v10596_v29 }
 0xd07   : > { %v5108_v5 = vpop.trf.xlu0 }
 0xd08   : > { %v5268_v15 = vcombine.low %v5044_v59, %v5108_v5  ;;  %v5343_v17 = vrot.slane %v5336_v10, %v10596_v29 }
 0xd09   : > { %v5156_v6 = vpop.trf.xlu1 }
 0xd0a   : > { %v5275_v28 = vrot.slane %v5268_v15, %v10596_v29  ;;  %v5360_v43 = vcombine.low %v5335_v23, %v5343_v17  ;;  %v5361_v53 = vcombine.high %v5335_v23, %v5343_v17  ;;  %v8789_v17 = vld [vmem:[%s11876_s18] ss:$0 sm:$0xff]  ;;  %s11886_s18 = sld [smem:[#allocation54_spill]] }
 0xd0b   : > { %v5140_v7 = vpop.trf.xlu0  ;;  %v11082_v21 = vadd.f32 %v8789_v17, %v11062_v60 }
 0xd0c   : > { %v5292_v25 = vcombine.low %v5267_v46, %v5275_v28  ;;  %v5368_v24 = vrot.slane %v5360_v43, %v10604_v33  ;;  %v5293_v47 = vcombine.high %v5267_v46, %v5275_v28  ;;  %v5375_v61 = vrot.slane %v5361_v53, %v10604_v33 }
 0xd0d   : > { %v5188_v8 = vpop.trf.xlu1 }
 0xd0e   : > { %v5300_v54 = vrot.slane %v5292_v25, %v10604_v33  ;;  %v5307_v57 = vrot.slane %v5293_v47, %v10604_v33 }
 0xd0f   : > { %v5172_v11 = vpop.trf.xlu0 }
 0xd11   : > { %v5220_v13 = vpop.trf.xlu1 }
 0xd12   : > { %v5344_v22 = vcombine.low %v5156_v6, %v5220_v13 }
 0xd13   : > { %v5204_v19 = vpop.trf.xlu0 }
 0xd14   : > { %v5276_v31 = vcombine.low %v5140_v7, %v5204_v19  ;;  %v5351_v42 = vrot.slane %v5344_v22, %v10596_v29 }
 0xd15   : > { %v5252_v26 = vpop.trf.xlu1 }
 0xd16   : > { %v5352_v32 = vcombine.low %v5188_v8, %v5252_v26  ;;  %v5283_v41 = vrot.slane %v5276_v31, %v10596_v29 }
 0xd17   : > { %v5236_v35 = vpop.trf.xlu0 }
 0xd18   : > { %v5359_v38 = vrot.slane %v5352_v32, %v10596_v29  ;;  %v5284_v39 = vcombine.low %v5172_v11, %v5236_v35 }
 0xd1a   : > { %v5376_v44 = vcombine.low %v5351_v42, %v5359_v38  ;;  %v5291_v45 = vrot.slane %v5284_v39, %v10596_v29  ;;  %v5377_v48 = vcombine.high %v5351_v42, %v5359_v38 }
 0xd1c   : > { %v5384_v50 = vrot.slane %v5376_v44, %v10604_v33  ;;  %v5308_v51 = vcombine.low %v5283_v41, %v5291_v45  ;;  %v5309_v52 = vcombine.high %v5283_v41, %v5291_v45  ;;  %v5391_v14 = vrot.slane %v5377_v48, %v10604_v33 }
 0xd1e   : > { %v5316_v9 = vrot.slane %v5308_v51, %v10604_v33  ;;  %v5323_v56 = vrot.slane %v5309_v52, %v10604_v33  ;;  %v5392_v30 = vcombine.low %v5368_v24, %v5384_v50  ;;  %v5393_v18 = vcombine.high %v5368_v24, %v5384_v50 }
 0xd1f   : > { %v5394_v3 = vcombine.low %v5375_v61, %v5391_v14  ;;  %v5395_v10 = vcombine.high %v5375_v61, %v5391_v14 }
 0xd20   : > { %v5324_v40 = vcombine.low %v5300_v54, %v5316_v9  ;;  %v5325_v58 = vcombine.high %v5300_v54, %v5316_v9  ;;  %v5401_v36 = vshrl.u32 %v5392_v30, 16  ;;  %v5326_v1 = vcombine.low %v5307_v57, %v5323_v56 }
 0xd21   : > { %v5409_v2 = vshrl.u32 %v5393_v18, 16  ;;  %v5327_v6 = vcombine.high %v5307_v57, %v5323_v56  ;;  %v5417_v8 = vshrl.u32 %v5394_v3, 16  ;;  %v5425_v15 = vshrl.u32 %v5395_v10, 16 }
 0xd22   : > { %v5398_v62 = vpack.i.b16 %v5392_v30, %v5324_v40  ;;  %v5400_v63 = vshrl.u32 %v5324_v40, 16  ;;  %v5408_v34 = vshrl.u32 %v5325_v58, 16  ;;  %v5416_v5 = vshrl.u32 %v5326_v1, 16 }
 0xd23   : > { %v5406_v7 = vpack.i.b16 %v5393_v18, %v5325_v58  ;;  %v5424_v12 = vshrl.u32 %v5327_v6, 16  ;;  %v5414_v13 = vpack.i.b16 %v5394_v3, %v5326_v1  ;;  %v5422_v22 = vpack.i.b16 %v5395_v10, %v5327_v6 }
 0xd24   : > { %5428 = vxpose.xlu1.c.b16.start.end [1/1] (short) (narrow) %v5398_v62, 16  ;;  %v5402_v59 = vpack.i.b16 %v5401_v36, %v5400_v63  ;;  %v5410_v4 = vpack.i.b16 %v5409_v2, %v5408_v34  ;;  %v5418_v11 = vpack.i.b16 %v5417_v8, %v5416_v5 }
 0xd25   : > { %v5426_v19 = vpack.i.b16 %v5425_v15, %v5424_v12 }
 0xd26   : > { %5444 = vxpose.xlu0.c.b16.start.end [1/1] (short) (narrow) %v5402_v59, 16 }
 0xd28   : > { %5476 = vxpose.xlu1.c.b16.start.end [1/1] (short) (narrow) %v5410_v4, 16 }
 0xd2a   : > { %5460 = vxpose.xlu0.c.b16.start.end [1/1] (short) (narrow) %v5406_v7, 16 }
 0xd2c   : > { %5508 = vxpose.xlu1.c.b16.start.end [1/1] (short) (narrow) %v5418_v11, 16 }
 0xd2e   : > { %5492 = vxpose.xlu0.c.b16.start.end [1/1] (short) (narrow) %v5414_v13, 16 }
 0xd30   : > { %5540 = vxpose.xlu1.c.b16.start.end [1/1] (short) (narrow) %v5426_v19, 16 }
 0xd32   : > { %5524 = vxpose.xlu0.c.b16.start.end [1/1] (short) (narrow) %v5422_v22, 16 }
 0xd34   : > { %6173 = vrot.lane.b32.xlu1 %v11082_v21, %s10016_s3  ;;  %s11878_s3 = scalar_lea.vmem [#allocation8], %s10518_s1  ;;  %s11463_s1 = scalar_lea.vmem [#allocation24], %s10762_s27 }
 0xd3b   : > { %6170 = vrot.lane.b32.xlu0 %v11082_v21, %s10015_s20  ;;  %s11250_s20 = scalar_lea.vmem [#allocation23], %s10762_s27  ;;  %s11881_s27 = sld [smem:[#allocation52_spill]] }
 0xd3f   : > { %6176 = vrot.lane.b32.xlu0 %v11082_v21, %s11873_s14  ;;  %s11883_s14 = sld [smem:[#allocation53_spill]] }
 0xd56   : > { %v11090_v23 = vpop.f32.mrb[28].mxu0 }
 0xd57   : > { %v9037_v26 = vpop.f32.mrb[29].mxu0 }
 0xd58   : > { %v4796_v28 = vpop.f32.mrb[30].mxu0  ;;  %v11092_v31 = vpop.f32.mrb[28].mxu1 }
 0xd59   : > { %v9038_v32 = vpop.f32.mrb[31].mxu0  ;;  %v9043_v60 = vpop.f32.mrb[29].mxu1 }
 0xd5a   : > { %v4842_v43 = vpop.f32.mrb[30].mxu1 }
 0xd5b   : > { %v9044_v35 = vpop.f32.mrb[31].mxu1 }
 0xd5e   : > { %v11094_v46 = vpop.f32.mrb[32].mxu0 }
 0xd5f   : > { %v9049_v42 = vpop.f32.mrb[33].mxu0 }
 0xd60   : > { %v4888_v38 = vpop.f32.mrb[34].mxu0  ;;  %v11096_v39 = vpop.f32.mrb[32].mxu1 }
 0xd61   : > { %v9050_v25 = vpop.f32.mrb[35].mxu0  ;;  %v9055_v41 = vpop.f32.mrb[33].mxu1 }
 0xd62   : > { %v4934_v44 = vpop.f32.mrb[34].mxu1 }
 0xd63   : > { %v9056_v45 = vpop.f32.mrb[35].mxu1 }
 0xd8a   : > { %v5436_v24 = vpop.trf.xlu1 }
 0xd8c   : > { %v5452_v47 = vpop.trf.xlu0 }
 0xd8e   : > { %v5484_v48 = vpop.trf.xlu1 }
 0xd90   : > { %v5468_v50 = vpop.trf.xlu0 }
 0xd92   : > { %v5516_v51 = vpop.trf.xlu1 }
 0xd93   : > { %v5581_v52 = vcombine.low %v5452_v47, %v5516_v51 }
 0xd94   : > { %v5500_v53 = vpop.trf.xlu0 }
 0xd95   : > { %v5556_v54 = vcombine.low %v5436_v24, %v5500_v53  ;;  %v5588_v56 = vrot.slane %v5581_v52, %v10596_v29 }
 0xd96   : > { %v5548_v9 = vpop.trf.xlu1 }
 0xd97   : > { %v5589_v30 = vcombine.low %v5484_v48, %v5548_v9  ;;  %v5563_v14 = vrot.slane %v5556_v54, %v10596_v29 }
 0xd98   : > { %v5532_v57 = vpop.trf.xlu0 }
 0xd99   : > { %v5564_v40 = vcombine.low %v5468_v50, %v5532_v57  ;;  %v5596_v58 = vrot.slane %v5589_v30, %v10596_v29 }
 0xd9b   : > { %v5571_v18 = vrot.slane %v5564_v40, %v10596_v29  ;;  %v5597_v61 = vcombine.low %v5588_v56, %v5596_v58 }
 0xd9d   : > { %v5572_v36 = vcombine.low %v5563_v14, %v5571_v18  ;;  %v11103_v62 = vrot.slane %v5597_v61, %v10604_v33 }
 0xd9f   : > { %v11106_v63 = vrot.slane %v5572_v36, %v10604_v33  ;;  %v11110_v34 = vcombine.high %v11103_v62, %v10019_v27  ;;  %v5610_v1 = vshrl.u32 %v11103_v62, 16 }
 0xda1   : > { %v11115_v59 = vcombine.high %v11106_v63, %v10019_v27  ;;  %v5609_v2 = vshrl.u32 %v11106_v63, 16  ;;  %v5608_v3 = vpack.i.b16 %v11103_v62, %v11106_v63  ;;  %v5616_v4 = vshrl.u32 %v11110_v34, 16 }
 0xda3   : > { %v5615_v5 = vshrl.u32 %v11115_v59, 16  ;;  %v11122_v6 = vpack.i.b16 %v5610_v1, %v5609_v2  ;;  %v5614_v7 = vpack.i.b16 %v11110_v34, %v11115_v59 }
 0xda5   : > { %v11126_v8 = vpack.i.b16 %v5616_v4, %v5615_v5 }
 0xda6   : > { %v11128_v10 = vpop.permute.xlu1 %6173 }
 0xda7   : > { %v6179_v12 = vcombine.low %v11082_v21, %v11128_v10  ;;  %v6180_v15 = vcombine.high %v11082_v21, %v11128_v10 }
 0xda9   : > { %v6187_v22 = vrot.slane %v6179_v12, %v10596_v29  ;;  %v6194_v32 = vrot.slane %v6180_v15, %v10596_v29 }
 0xdad   : > { %v11130_v11 = vpop.permute.xlu0 %6170 }
 0xdb1   : > { %v11134_v13 = vpop.permute.xlu0 %6176 }
 0xdb2   : > { %v6195_v17 = vcombine.low %v11130_v11, %v11134_v13  ;;  %v6196_v19 = vcombine.high %v11130_v11, %v11134_v13 }
 0xdb4   : > { %v6203_v26 = vrot.slane %v6195_v17, %v10596_v29  ;;  %v6210_v28 = vrot.slane %v6196_v19, %v10596_v29 }
 0xdb6   : > { %v6211_v60 = vcombine.low %v6187_v22, %v6203_v26  ;;  %v6212_v43 = vcombine.high %v6187_v22, %v6203_v26  ;;  %v6227_v35 = vcombine.low %v6194_v32, %v6210_v28  ;;  %v6228_v44 = vcombine.high %v6194_v32, %v6210_v28 }
 0xdb8   : > { %v6219_v42 = vrot.slane %v6211_v60, %v10604_v33  ;;  %v6226_v38 = vrot.slane %v6212_v43, %v10604_v33  ;;  %v6235_v47 = vrot.slane %v6227_v35, %v10604_v33  ;;  %v6242_v52 = vrot.slane %v6228_v44, %v10604_v33 }
 0xdba   : > { %v6247_v25 = vpack.c.bf16 %v6219_v42, %v6219_v42  ;;  %v6243_v41 = vcombine.high %v6219_v42, %v10012_v0  ;;  %v6244_v24 = vcombine.high %v6226_v38, %v10012_v0  ;;  %v6249_v48 = vpack.c.bf16 %v6226_v38, %v6226_v38 }
 0xdbb   : > { %v6245_v51 = vcombine.high %v6235_v47, %v10012_v0  ;;  %v6251_v53 = vpack.c.bf16 %v6235_v47, %v6235_v47  ;;  %v6246_v9 = vcombine.high %v6242_v52, %v10012_v0  ;;  %v6253_v56 = vpack.c.bf16 %v6242_v52, %v6242_v52 }
 0xdbc   : > { %6405 = vxpose.xlu0.c.b16.start.end [1/1] (short) (narrow) %v6247_v25, 16  ;;  %v6248_v45 = vpack.c.bf16 %v6243_v41, %v6243_v41  ;;  %v6250_v50 = vpack.c.bf16 %v6244_v24, %v6244_v24 }
 0xdbd   : > { %v6252_v54 = vpack.c.bf16 %v6245_v51, %v6245_v51  ;;  %v6254_v30 = vpack.c.bf16 %v6246_v9, %v6246_v9 }
 0xdbe   : > { %6421 = vxpose.xlu1.c.b16.start.end [1/1] (short) (narrow) %v6248_v45, 16 }
 0xdc0   : > { %6437 = vxpose.xlu0.c.b16.start.end [1/1] (short) (narrow) %v6249_v48, 16 }
 0xdc2   : > { %6453 = vxpose.xlu1.c.b16.start.end [1/1] (short) (narrow) %v6250_v50, 16 }
 0xdc4   : > { %6469 = vxpose.xlu0.c.b16.start.end [1/1] (short) (narrow) %v6251_v53, 16 }
 0xdc6   : > { %6485 = vxpose.xlu1.c.b16.start.end [1/1] (short) (narrow) %v6252_v54, 16  ;;  %v1325_v54 = vld [vmem:[%s11877_s23] sm:$0x3]  ;;  %s11887_s23 = sld [smem:[#allocation55_spill]] }
 0xdc8   : > { %6501 = vxpose.xlu0.c.b16.start.end [1/1] (short) (narrow) %v6253_v56, 16 }
 0xdca   : > { %6517 = vxpose.xlu1.c.b16.start.end [1/1] (short) (narrow) %v6254_v30, 16 }
 0xe22   : > { %v6413_v57 = vpop.trf.xlu0 }
 0xe24   : > { %v6429_v14 = vpop.trf.xlu1 }
 0xe26   : > { %v6445_v40 = vpop.trf.xlu0 }
 0xe28   : > { %v6461_v58 = vpop.trf.xlu1 }
 0xe2a   : > { %v6477_v18 = vpop.trf.xlu0 }
 0xe2b   : > { %v6533_v36 = vcombine.low %v6413_v57, %v6477_v18  ;;  %v4937_v18 = vmul.f32 0.35355338, %v11090_v23 }
 0xe2c   : > { %v6493_v61 = vpop.trf.xlu1 }
 0xe2d   : > { %v6567_v2 = vcombine.low %v6429_v14, %v6493_v61  ;;  %v6540_v12 = vrot.slane %v6533_v36, %v10596_v29  ;;  %v4938_v61 = vmul.f32 0.35355338, %v11092_v31 }
 0xe2e   : > { %v6509_v1 = vpop.trf.xlu0 }
 0xe2f   : > { %v6541_v4 = vcombine.low %v6445_v40, %v6509_v1  ;;  %v6574_v19 = vrot.slane %v6567_v2, %v10596_v29  ;;  %v4939_v1 = vmul.f32 0.35355338, %v11094_v46 }
 0xe30   : > { %v6525_v5 = vpop.trf.xlu1 }
 0xe31   : > { %v6548_v15 = vrot.slane %v6541_v4, %v10596_v29  ;;  %v6575_v17 = vcombine.low %v6461_v58, %v6525_v5  ;;  %v1326_v58 = vunpack.c.0.s8 %v1325_v54  ;;  %v4940_v4 = vmul.f32 0.35355338, %v11096_v39 }
 0xe33   : > { %v6549_v22 = vcombine.low %v6540_v12, %v6548_v15  ;;  %v6550_v26 = vcombine.high %v6540_v12, %v6548_v15  ;;  %v6582_v28 = vrot.slane %v6575_v17, %v10596_v29  ;;  %vm1327_vm8 = vcmp.ne.s32.totalorder %v1326_v58, 0 }
 0xe34   : > { %v4943_v36 = vsel %vm1327_vm8, -1e+09, %v4937_v18  ;;  %v4944_v2 = vsel %vm1327_vm8, -1e+09, %v4938_v61  ;;  %v4945_v12 = vsel %vm1327_vm8, -1e+09, %v4939_v1 }
 0xe35   : > { %v6557_v32 = vrot.slane %v6549_v22, %v10604_v33  ;;  %v11160_v60 = vrot.slane %v6550_v26, %v10604_v33  ;;  %v6583_v43 = vcombine.low %v6574_v19, %v6582_v28  ;;  %v6584_v35 = vcombine.high %v6574_v19, %v6582_v28 }
 0xe36   : > { %v4947_v5 = vsel %vm3333_vm6, %v4943_v36, -inf  ;;  %v4950_v15 = vsel %vm3333_vm6, %v4944_v2, -inf  ;;  %v4946_v17 = vsel %vm1327_vm8, -1e+09, %v4940_v4  ;;  %v4953_v19 = vsel %vm3333_vm6, %v4945_v12, -inf }
 0xe37   : > { %v6591_v42 = vrot.slane %v6583_v43, %v10604_v33  ;;  %v11164_v38 = vrot.slane %v6584_v35, %v10604_v33  ;;  %v11168_v25 = vcombine.high %v11160_v60, %v10019_v27  ;;  %v6605_v44 = vshrl.u32 %v6557_v32, 16 }
 0xe38   : > { %v6621_v48 = vshrl.u32 %v11160_v60, 16  ;;  %v6565_v53 = vcombine.high %v6557_v32, %v10019_v27  ;;  %v4956_v23 = vsel %vm3333_vm6, %v4946_v17, -inf }
 0xe39   : > { %v6603_v41 = vpack.i.b16 %v6591_v42, %v6557_v32  ;;  %v6606_v45 = vshrl.u32 %v6591_v42, 16  ;;  %v6599_v24 = vcombine.high %v6591_v42, %v10019_v27  ;;  %v6619_v47 = vpack.i.b16 %v11164_v38, %v11160_v60 }
 0xe3a   : > { %v6622_v50 = vshrl.u32 %v11164_v38, 16  ;;  %v11177_v51 = vcombine.high %v11164_v38, %v10019_v27  ;;  %v6629_v30 = vshrl.u32 %v11168_v25, 16  ;;  %v6613_v46 = vshrl.u32 %v6565_v53, 16 }
 0xe3b   : > { %6633 = vxpose.xlu0.c.b16.start.end [1/1] (short) (narrow) %v6603_v41, 16  ;;  %v6607_v52 = vpack.i.b16 %v6606_v45, %v6605_v44  ;;  %v6611_v14 = vpack.i.b16 %v6599_v24, %v6565_v53  ;;  %v6614_v31 = vshrl.u32 %v6599_v24, 16 }
 0xe3c   : > { %v11182_v9 = vpack.i.b16 %v6622_v50, %v6621_v48  ;;  %v6627_v56 = vpack.i.b16 %v11177_v51, %v11168_v25  ;;  %v6630_v57 = vshrl.u32 %v11177_v51, 16 }
 0xe3d   : > { %6649 = vxpose.xlu1.c.b16.start.end [1/1] (short) (narrow) %v6607_v52, 16  ;;  %v6615_v39 = vpack.i.b16 %v6614_v31, %v6613_v46 }
 0xe3e   : > { %v6631_v40 = vpack.i.b16 %v6630_v57, %v6629_v30 }
 0xe3f   : > { %6665 = vxpose.xlu0.c.b16.start.end [1/1] (short) (narrow) %v6611_v14, 16 }
 0xe4a   : > { %4948 = vmax.xlane.f32.xlu1 %v4947_v5 }
 0xe4c   : > { %4951 = vmax.xlane.f32.xlu0 %v4950_v15 }
 0xe4e   : > { %4954 = vmax.xlane.f32.xlu1 %v4953_v19 }
 0xe50   : > { %4957 = vmax.xlane.f32.xlu0 %v4956_v23 }
 0xe66   : > { %6081 = vrot.lane.b32.xlu0 %v10948_v20, %s11875_s9 }
 0xe7b   : > { %6681 = vxpose.xlu1.c.b16.start.end [1/1] (short) (narrow) %v6615_v39, 16 }
 0xe7f   : > { %6083 = vrot.lane.b32.xlu1 %v10978_v49, %s11875_s9 }
 0xea1   : > { %v11200_v22 = vpop.trf.xlu0 }
 0xea3   : > { %v11202_v26 = vpop.trf.xlu1 }
 0xea5   : > { %v11204_v28 = vpop.trf.xlu0 }
 0xed7   : > { %v4949_v32 = vpop.xlane.xlu1 %4948 }
 0xed8   : > { %v4959_v43 = vsub.f32 %v4943_v36, %v4949_v32 }
 0xed9   : > { %v4952_v35 = vpop.xlane.xlu0 %4951 }
 0xeda   : > { %v4963_v42 = vmul.f32 1.442695, %v4959_v43  ;;  %v4960_v41 = vsub.f32 %v4944_v2, %v4952_v35 }
 0xedb   : > { %v4955_v48 = vpop.xlane.xlu1 %4954 }
 0xedc   : > { %9413 = vpow2.f32 %v4963_v42  ;;  %v4965_v20 = vmul.f32 1.442695, %v4960_v41  ;;  %v4961_v52 = vsub.f32 %v4945_v12, %v4955_v48 }
 0xedd   : > { %v4958_v50 = vpop.xlane.xlu0 %4957 }
 0xede   : > { %9415 = vpow2.f32 %v4965_v20  ;;  %v4962_v53 = vsub.f32 %v4946_v17, %v4958_v50  ;;  %v4967_v54 = vmul.f32 1.442695, %v4961_v52 }
 0xee0   : > { %v4969_v30 = vmul.f32 1.442695, %v4962_v53  ;;  %9417 = vpow2.f32 %v4967_v54 }
 0xee1   : > { %v6082_v60 = vpop.permute.xlu0 %6081 }
 0xee2   : > { %9419 = vpow2.f32 %v4969_v30 }
 0xee6   : > { %v9414_v44 = vpop.eup %9413 }
 0xee7   : > { %v4971_v45 = vsel %vm3333_vm6, %v9414_v44, 0.0 }
 0xee8   : > { %v9416_v24 = vpop.eup %9415  ;;  %4972 = vadd.xlane.f32.xlu0 %v4971_v45 }
 0xee9   : > { %v4974_v49 = vsel %vm3333_vm6, %v9416_v24, 0.0 }
 0xeea   : > { %4975 = vadd.xlane.f32.xlu1 %v4974_v49  ;;  %v11212_v57 = vpop.eup %9417 }
 0xeeb   : > { %v4977_v58 = vsel %vm3333_vm6, %v11212_v57, 0.0 }
 0xeec   : > { %v11214_v14 = vpop.eup %9419 }
 0xefb   : > { %6085 = vrot.lane.b32.xlu1 %v10972_v37, %s11875_s9  ;;  %v4980_v37 = vsel %vm3333_vm6, %v11214_v14, 0.0 }
 0xefe   : > { %6087 = vrot.lane.b32.xlu0 %v10980_v55, %s11875_s9  ;;  %v11235_v55 = vpop.trf.xlu1 }
 0xf02   : > { %v6084_v38 = vpop.permute.xlu1 %6083 }
 0xf1d   : > { %4978 = vadd.xlane.f32.xlu0 %v4977_v58 }
 0xf1f   : > { %4981 = vadd.xlane.f32.xlu1 %v4980_v37 }
 0xf4a   : > { %6697 = vxpose.xlu0.c.b16.start.end [1/1] (short) (narrow) %v6619_v47, 16 }
 0xf4c   : > { %6713 = vxpose.xlu1.c.b16.start.end [1/1] (short) (narrow) %v11182_v9, 16 }
 0xf4e   : > { %6729 = vxpose.xlu0.c.b16.start.end [1/1] (short) (narrow) %v6627_v56, 16 }
 0xf50   : > { %6745 = vxpose.xlu1.c.b16.start.end [1/1] (short) (narrow) %v6631_v40, 16 }
 0xf54   : > { %6257 = vrot.lane.b32.xlu1 %v11130_v11, %s11875_s9 }
 0xf57   : > { %6255 = vrot.lane.b32.xlu0 %v11082_v21, %s11875_s9 }
 0xf58   : > { %6259 = vrot.lane.b32.xlu1 %v11128_v10, %s11875_s9 }
 0xf5b   : > { %6261 = vrot.lane.b32.xlu0 %v11134_v13, %s11875_s9  ;;  %s10024_s9 = smov 32  }
 0xf75   : > { %v4973_v47 = vpop.xlane.xlu0 %4972 }
 0xf76   : > { %9421 = vrcp.f32 %v4973_v47 }
 0xf77   : > { %v4976_v25 = vpop.xlane.xlu1 %4975 }
 0xf78   : > { %9423 = vrcp.f32 %v4976_v25 }
 0xf79   : > { %v6088_v51 = vpop.permute.xlu0 %6087 }
 0xf7a   : > { %v6109_v9 = vcombine.low %v6084_v38, %v6088_v51  ;;  %v6110_v11 = vcombine.high %v6084_v38, %v6088_v51 }
 0xf7b   : > { %v6086_v56 = vpop.permute.xlu1 %6085 }
 0xf7c   : > { %v6093_v40 = vcombine.low %v6082_v60, %v6086_v56  ;;  %v6094_v21 = vcombine.high %v6082_v60, %v6086_v56  ;;  %v6117_v18 = vrot.slane %v6109_v9, %v10596_v29  ;;  %v6124_v10 = vrot.slane %v6110_v11, %v10596_v29 }
 0xf7e   : > { %v6101_v13 = vrot.slane %v6093_v40, %v10596_v29  ;;  %v6108_v61 = vrot.slane %v6094_v21, %v10596_v29 }
 0xf80   : > { %v9422_v36 = vpop.eup %9421  ;;  %v6125_v1 = vcombine.low %v6101_v13, %v6117_v18  ;;  %v6126_v2 = vcombine.high %v6101_v13, %v6117_v18  ;;  %v6141_v4 = vcombine.low %v6108_v61, %v6124_v10  ;;  %v6142_v5 = vcombine.high %v6108_v61, %v6124_v10 }
 0xf81   : > { %v4991_v12 = vmul.f32 %v9422_v36, %v9414_v44 }
 0xf82   : > { %v9424_v15 = vpop.eup %9423  ;;  %v6133_v17 = vrot.slane %v6125_v1, %v10604_v33  ;;  %v6140_v19 = vrot.slane %v6126_v2, %v10604_v33  ;;  %v6149_v23 = vrot.slane %v6141_v4, %v10604_v33  ;;  %v6156_v31 = vrot.slane %v6142_v5, %v10604_v33 }
 0xf83   : > { %v4995_v46 = vpack.c.bf16 %v4991_v12, %v4991_v12  ;;  %v4992_v39 = vmul.f32 %v9424_v15, %v9416_v24 }
 0xf84   : > { %v6157_v32 = vcombine.high %v6133_v17, %v10012_v0  ;;  %v6158_v43 = vcombine.high %v6140_v19, %v10012_v0  ;;  %v6159_v35 = vcombine.high %v6149_v23, %v10012_v0  ;;  %v6160_v42 = vcombine.high %v6156_v31, %v10012_v0 }
 0xf85   : > { %v8807_v41 = vpack.c.bf16 %v6149_v23, %v6133_v17  ;;  %v8808_v20 = vpack.c.bf16 %v6156_v31, %v6140_v19  ;;  %5000 = vst.msk [vmem:[%s11250_s20] sm:$0xf] %vm4999_vm9, %v4995_v46  ;;  %v5622_v44 = vsel %vm3333_vm6, %v4995_v46, 0  ;;  %v4996_v45 = vpack.c.bf16 %v4992_v39, %v4992_v39 }
 0xf86   : > { %v8809_v24 = vpack.c.bf16 %v6159_v35, %v6157_v32  ;;  %v8810_v49 = vpack.c.bf16 %v6160_v42, %v6158_v43  ;;  %9058 = vmatpush3.bf16.xpose.msra.mxu0 %v5622_v44 }
 0xf87   : > { %v6350_v48 = vrot.slane %v8807_v41, %v10596_v29  ;;  %v6358_v50 = vrot.slane %v8808_v20, %v10596_v29  ;;  %5001 = vst.msk [vmem:[%s11250_s20 + $0x4] sm:$0xf] %vm4999_vm9, %v4996_v45  ;;  %v5668_v52 = vsel %vm3333_vm6, %v4996_v45, 0  ;;  %9069 = vmatprep.subr.bf16.mxu0 %v10012_v0 }
 0xf88   : > { %v6375_v53 = vrot.slane %v8809_v24, %v10596_v29  ;;  %v6383_v54 = vrot.slane %v8810_v49, %v10596_v29  ;;  %9064 = vmatpush3.bf16.xpose.msra.mxu1 %v5668_v52 }
 0xf89   : > { %v6359_v30 = vcombine.low %v6350_v48, %v6358_v50  ;;  %9075 = vmatprep.subr.bf16.mxu1 %v10012_v0 }
 0xf8a   : > { %v6384_v58 = vcombine.low %v6375_v53, %v6383_v54 }
 0xf8b   : > { %v11265_v37 = vrot.slane %v6359_v30, %v10604_v33 }
 0xf8c   : > { %v11268_v60 = vrot.slane %v6384_v58, %v10604_v33 }
 0xf8d   : > { %9060 = vmatmul.mubr.msk.bf16.vlgmr.msra.gmra.mrb[36].mxu0 %vm3333_vm6, %v5608_v3  ;;  %v11276_v38 = vcombine.high %v11265_v37, %v10019_v27  ;;  %v6396_v25 = vshrl.u32 %v11265_v37, 16 }
 0xf8e   : > { %9071 = vmatprep.mubr.msk.bf16.mxu0 %vm10013_vm0, %v10012_v0  ;;  %v6395_v47 = vpack.i.b16 %v11268_v60, %v11265_v37  ;;  %v6397_v51 = vshrl.u32 %v11268_v60, 16  ;;  %v11286_v9 = vcombine.high %v11268_v60, %v10019_v27 }
 0xf8f   : > { %9066 = vmatmul.mubr.msk.bf16.vlgmr.msra.gmra.mrb[36].mxu1 %vm3333_vm6, %v11122_v6  ;;  %v6402_v3 = vshrl.u32 %v11276_v38, 16 }
 0xf90   : > { %9077 = vmatprep.mubr.msk.bf16.mxu1 %vm10013_vm0, %v10012_v0  ;;  %v11292_v62 = vpack.i.b16 %v6397_v51, %v6396_v25  ;;  %v6401_v63 = vpack.i.b16 %v11286_v9, %v11276_v38  ;;  %v6403_v11 = vshrl.u32 %v11286_v9, 16 }
 0xf92   : > { %v11298_v56 = vpack.i.b16 %v6403_v11, %v6402_v3 }
 0xfaa   : > { %v4979_v40 = vpop.xlane.xlu0 %4978 }
 0xfab   : > { %9425 = vrcp.f32 %v4979_v40 }
 0xfac   : > { %v4982_v21 = vpop.xlane.xlu1 %4981 }
 0xfad   : > { %9427 = vrcp.f32 %v4982_v21 }
 0xfb0   : > { %v6705_v18 = vpop.trf.xlu0 }
 0xfb1   : > { %v6761_v10 = vcombine.low %v11200_v22, %v6705_v18  ;;  %v1328_v18 = vld [vmem:[%s11878_s3] sm:$0x3]  ;;  %s11888_s3 = sld [smem:[#allocation58_spill]] }
 0xfb2   : > { %v6721_v6 = vpop.trf.xlu1 }
 0xfb3   : > { %v6786_v36 = vcombine.low %v11202_v26, %v6721_v6  ;;  %v6768_v12 = vrot.slane %v6761_v10, %v10596_v29 }
 0xfb4   : > { %v6737_v13 = vpop.trf.xlu0 }
 0xfb5   : > { %v9426_v61 = vpop.eup %9425  ;;  %v6769_v1 = vcombine.low %v11204_v28, %v6737_v13  ;;  %v6793_v23 = vrot.slane %v6786_v36, %v10596_v29  ;;  %v1329_v36 = vunpack.c.0.s8 %v1328_v18 }
 0xfb6   : > { %v6753_v2 = vpop.trf.xlu1  ;;  %v4993_v4 = vmul.f32 %v9426_v61, %v11212_v57 }
 0xfb7   : > { %v9428_v5 = vpop.eup %9427  ;;  %v6776_v15 = vrot.slane %v6769_v1, %v10596_v29  ;;  %v6794_v17 = vcombine.low %v11235_v55, %v6753_v2  ;;  %vm11389_vm10 = vcmp.ne.s32.totalorder %v1329_v36, 0 }
 0xfb8   : > { %v4997_v19 = vpack.c.bf16 %v4993_v4, %v4993_v4  ;;  %v4994_v22 = vmul.f32 %v9428_v5, %v11214_v14 }
 0xfb9   : > { %v6777_v31 = vcombine.low %v6768_v12, %v6776_v15  ;;  %v6801_v26 = vrot.slane %v6794_v17, %v10596_v29 }
 0xfba   : > { %5002 = vst.msk [vmem:[%s11250_s20 + $0x8] sm:$0xf] %vm4999_vm9, %v4997_v19  ;;  %v5714_v28 = vsel %vm3333_vm6, %v4997_v19, 0  ;;  %v4998_v57 = vpack.c.bf16 %v4994_v22, %v4994_v22 }
 0xfbb   : > { %v6784_v46 = vrot.slane %v6777_v31, %v10604_v33  ;;  %v6802_v39 = vcombine.low %v6793_v23, %v6801_v26  ;;  %9070 = vmatpush3.bf16.xpose.msra.mxu0 %v5714_v28 }
 0xfbc   : > { %5003 = vst.msk [vmem:[%s11250_s20 + $0xc] sm:$0xf] %vm4999_vm9, %v4998_v57  ;;  %v5760_v55 = vsel %vm3333_vm6, %v4998_v57, 0  ;;  %9081 = vmatprep.subr.bf16.mxu0 %v10012_v0 }
 0xfbd   : > { %v6809_v14 = vrot.slane %v6802_v39, %v10604_v33  ;;  %9076 = vmatpush3.bf16.xpose.msra.mxu1 %v5760_v55  ;;  %v6814_v43 = vshrl.u32 %v6784_v46, 16  ;;  %v6785_v44 = vcombine.high %v6784_v46, %v10019_v27 }
 0xfbe   : > { %9087 = vmatprep.subr.bf16.mxu1 %v10012_v0 }
 0xfbf   : > { %v6813_v32 = vpack.i.b16 %v6809_v14, %v6784_v46  ;;  %v6815_v35 = vshrl.u32 %v6809_v14, 16  ;;  %v6810_v42 = vcombine.high %v6809_v14, %v10019_v27 }
 0xfc1   : > { %v6827_v41 = vsel %vm2205_vm2, %v6813_v32, 0  ;;  %v6816_v20 = vpack.i.b16 %v6815_v35, %v6814_v43  ;;  %v6821_v24 = vshrl.u32 %v6810_v42, 16  ;;  %v6819_v59 = vpack.i.b16 %v6810_v42, %v6785_v44 }
 0xfc2   : > { %9072 = vmatmul.mubr.msk.bf16.vlgmr.msra.gmra.mrb[40].mxu0 %vm3333_vm6, %v5614_v7  ;;  %v6820_v7 = vshrl.u32 %v6785_v44, 16 }
 0xfc3   : > { %9082 = vmatpush3.bf16.msra.mxu0 %v6827_v41  ;;  %v6873_v45 = vsel %vm2205_vm2, %v6816_v20, 0  ;;  %9083 = vmatprep.mubr.msk.bf16.mxu0 %vm10013_vm0, %v10012_v0 }
 0xfc4   : > { %9078 = vmatmul.mubr.msk.bf16.vlgmr.msra.gmra.mrb[40].mxu1 %vm3333_vm6, %v11126_v8  ;;  %9093 = vmatprep.subr.bf16.mxu0 %v10012_v0  ;;  %v6822_v49 = vpack.i.b16 %v6821_v24, %v6820_v7  ;;  %v6919_v8 = vsel %vm2205_vm2, %v6819_v59, 0 }
 0xfc5   : > { %9088 = vmatpush3.bf16.msra.mxu1 %v6873_v45  ;;  %9089 = vmatprep.mubr.msk.bf16.mxu1 %vm10013_vm0, %v10012_v0 }
 0xfc6   : > { %v11335_v34 = vpop.permute.xlu1 %6257  ;;  %9099 = vmatprep.subr.bf16.mxu1 %v10012_v0  ;;  %v6965_v53 = vsel %vm2205_vm2, %v6822_v49, 0 }
 0xfc9   : > { %v11338_v48 = vpop.permute.xlu0 %6255 }
 0xfca   : > { %9084 = vmatmul.mubr.msk.bf16.vlgmr.msra.gmra.mrb[44].mxu0 %vm2201_vm3, %v6395_v47  ;;  %v11345_v50 = vpop.permute.xlu1 %6259 }
 0xfcb   : > { %9094 = vmatpush3.bf16.msra.mxu0 %v6919_v8  ;;  %9095 = vmatprep.mubr.msk.bf16.mxu0 %vm10013_vm0, %v10012_v0  ;;  %v6268_v52 = vcombine.high %v11338_v48, %v11345_v50  ;;  %v6267_v45 = vcombine.low %v11338_v48, %v11345_v50 }
 0xfcc   : > { %9090 = vmatmul.mubr.msk.bf16.vlgmr.msra.gmra.mrb[44].mxu1 %vm2201_vm3, %v11292_v62  ;;  %9105 = vmatprep.subr.bf16.mxu0 %v10012_v0 }
 0xfcd   : > { %9100 = vmatpush3.bf16.msra.mxu1 %v6965_v53  ;;  %v6262_v54 = vpop.permute.xlu0 %6261  ;;  %9101 = vmatprep.mubr.msk.bf16.mxu1 %vm10013_vm0, %v10012_v0  ;;  %v11360_v58 = vrot.slane %v6268_v52, %v10596_v29  ;;  %v6275_v59 = vrot.slane %v6267_v45, %v10596_v29 }
 0xfce   : > { %v6284_v30 = vcombine.high %v11335_v34, %v6262_v54  ;;  %9111 = vmatprep.subr.bf16.mxu1 %v10012_v0  ;;  %v6283_v44 = vcombine.low %v11335_v34, %v6262_v54 }
 0xfd0   : > { %v11363_v37 = vrot.slane %v6284_v30, %v10596_v29  ;;  %v6291_v24 = vrot.slane %v6283_v44, %v10596_v29 }
 0xfd2   : > { %v6315_v60 = vcombine.low %v11360_v58, %v11363_v37  ;;  %v6316_v47 = vcombine.high %v11360_v58, %v11363_v37  ;;  %9096 = vmatmul.mubr.msk.bf16.vlgmr.msra.gmra.mrb[48].mxu0 %vm2201_vm3, %v6401_v63  ;;  %v6299_v7 = vcombine.low %v6275_v59, %v6291_v24 }
 0xfd3   : > { %9107 = vmatprep.mubr.msk.bf16.mxu0 %vm10013_vm0, %v10012_v0 }
 0xfd4   : > { %9102 = vmatmul.mubr.msk.bf16.vlgmr.msra.gmra.mrb[48].mxu1 %vm2201_vm3, %v11298_v56  ;;  %v6307_v49 = vrot.slane %v6299_v7, %v10604_v33 }
 0xfd5   : > { %9113 = vmatprep.mubr.msk.bf16.mxu1 %vm10013_vm0, %v10012_v0 }
 0xfd6   : > { %v6331_v8 = vcombine.high %v6307_v49, %v10012_v0  ;;  %v6335_v53 = vpack.c.bf16 %v6307_v49, %v6307_v49 }
 0xfd8   : > { %v6336_v52 = vpack.c.bf16 %v6331_v8, %v6331_v8 }
0x1060   : > { %v11379_v25 = vpop.f32.mrb[36].mxu0 }
0x1061   : > { %v9061_v51 = vpop.f32.mrb[37].mxu0 }
0x1062   : > { %v5661_v62 = vpop.f32.mrb[38].mxu0  ;;  %v11381_v3 = vpop.f32.mrb[36].mxu1 }
0x1063   : > { %v9062_v11 = vpop.f32.mrb[39].mxu0  ;;  %v9067_v40 = vpop.f32.mrb[37].mxu1  ;;  %v6300_v62 = vcombine.high %v6275_v59, %v6291_v24 }
0x1064   : > { %v5707_v38 = vpop.f32.mrb[38].mxu1 }
0x1065   : > { %v9068_v9 = vpop.f32.mrb[39].mxu1  ;;  %v6314_v11 = vrot.slane %v6300_v62, %v10604_v33  ;;  %v6323_v38 = vrot.slane %v6315_v60, %v10604_v33 }
0x1067   : > { %v6332_v40 = vcombine.high %v6314_v11, %v10012_v0  ;;  %v6337_v9 = vpack.c.bf16 %v6314_v11, %v6314_v11  ;;  %v6333_v18 = vcombine.high %v6323_v38, %v10012_v0 }
0x1095   : > { %v11383_v63 = vpop.f32.mrb[40].mxu0 }
0x1096   : > { %v9073_v21 = vpop.f32.mrb[41].mxu0 }
0x1097   : > { %v5753_v6 = vpop.f32.mrb[42].mxu0  ;;  %v11387_v56 = vpop.f32.mrb[40].mxu1  ;;  %v6338_v21 = vpack.c.bf16 %v6332_v40, %v6332_v40 }
0x1098   : > { %v9074_v10 = vpop.f32.mrb[43].mxu0  ;;  %v9079_v13 = vpop.f32.mrb[41].mxu1  ;;  %v6330_v6 = vrot.slane %v6316_v47, %v10604_v33 }
0x1099   : > { %v5799_v61 = vpop.f32.mrb[42].mxu1  ;;  %v6339_v10 = vpack.c.bf16 %v6323_v38, %v6323_v38  ;;  %v6340_v13 = vpack.c.bf16 %v6333_v18, %v6333_v18 }
0x109a   : > { %v9080_v1 = vpop.f32.mrb[43].mxu1  ;;  %v6334_v61 = vcombine.high %v6330_v6, %v10012_v0  ;;  %v6341_v36 = vpack.c.bf16 %v6330_v6, %v6330_v6 }
0x109c   : > { %v6342_v60 = vpack.c.bf16 %v6334_v61, %v6334_v61 }
0x109d   : > { %v6863_v4 = vpop.f32.mrb[44].mxu0 }
0x109e   : > { %v7007_v5 = vmul.f32 0.35355338, %v6863_v4  ;;  %v9085_v12 = vpop.f32.mrb[45].mxu0 }
0x109f   : > { %v6866_v15 = vpop.f32.mrb[46].mxu0  ;;  %v6909_v17 = vpop.f32.mrb[44].mxu1 }
0x10a0   : > { %v11395_v19 = vsel %vm11389_vm10, -1e+09, %v7007_v5  ;;  %v7008_v22 = vmul.f32 0.35355338, %v6909_v17  ;;  %v9086_v23 = vpop.f32.mrb[47].mxu0  ;;  %v9091_v31 = vpop.f32.mrb[45].mxu1 }
0x10a1   : > { %v6912_v26 = vpop.f32.mrb[46].mxu1  ;;  %v7017_v28 = vsel %vm2201_vm3, %v11395_v19, -inf }
0x10a2   : > { %v11401_v57 = vsel %vm11389_vm10, -1e+09, %v7008_v22  ;;  %v9092_v46 = vpop.f32.mrb[47].mxu1  ;;  %7018 = vmax.xlane.f32.xlu0 %v7017_v28 }
0x10a3   : > { %v7020_v39 = vsel %vm2201_vm3, %v11401_v57, -inf }
0x10a4   : > { %7021 = vmax.xlane.f32.xlu1 %v7020_v39 }
0x10a5   : > { %v6955_v55 = vpop.f32.mrb[48].mxu0 }
0x10a6   : > { %v9097_v14 = vpop.f32.mrb[49].mxu0  ;;  %v7009_v30 = vmul.f32 0.35355338, %v6955_v55 }
0x10a7   : > { %v6958_v32 = vpop.f32.mrb[50].mxu0  ;;  %v7001_v43 = vpop.f32.mrb[48].mxu1 }
0x10a8   : > { %v9098_v35 = vpop.f32.mrb[51].mxu0  ;;  %v9103_v42 = vpop.f32.mrb[49].mxu1  ;;  %v7010_v51 = vmul.f32 0.35355338, %v7001_v43  ;;  %v11414_v34 = vsel %vm11389_vm10, -1e+09, %v7009_v30 }
0x10a9   : > { %v7004_v41 = vpop.f32.mrb[50].mxu1  ;;  %v7023_v50 = vsel %vm2201_vm3, %v11414_v34, -inf }
0x10aa   : > { %v9104_v20 = vpop.f32.mrb[51].mxu1  ;;  %v11418_v48 = vsel %vm11389_vm10, -1e+09, %v7010_v51 }
0x10ab   : > { %v7026_v54 = vsel %vm2201_vm3, %v11418_v48, -inf }
0x10cf   : > { %7089 = vxpose.xlu0.c.b16.start.end [1/1] (short) (narrow) %v6336_v52, 16 }
0x10d1   : > { %7073 = vxpose.xlu1.c.b16.start.end [1/1] (short) (narrow) %v6335_v53, 16 }
0x10dc   : > { %7024 = vmax.xlane.f32.xlu0 %v7023_v50 }
0x10de   : > { %7027 = vmax.xlane.f32.xlu1 %v7026_v54 }
0x1109   : > { %7105 = vxpose.xlu0.c.b16.start.end [1/1] (short) (narrow) %v6337_v9, 16 }
0x110b   : > { %7121 = vxpose.xlu1.c.b16.start.end [1/1] (short) (narrow) %v6338_v21, 16 }
0x110d   : > { %7137 = vxpose.xlu0.c.b16.start.end [1/1] (short) (narrow) %v6339_v10, 16 }
0x110f   : > { %7153 = vxpose.xlu1.c.b16.start.end [1/1] (short) (narrow) %v6340_v13, 16 }
0x1111   : > { %7169 = vxpose.xlu0.c.b16.start.end [1/1] (short) (narrow) %v6341_v36, 16 }
0x1113   : > { %7185 = vxpose.xlu1.c.b16.start.end [1/1] (short) (narrow) %v6342_v60, 16 }
0x112f   : > { %v7019_v1 = vpop.xlane.xlu0 %7018 }
0x1130   : > { %v7029_v8 = vsub.f32 %v11395_v19, %v7019_v1 }
0x1131   : > { %v7022_v2 = vpop.xlane.xlu1 %7021 }
0x1132   : > { %v7030_v51 = vsub.f32 %v11401_v57, %v7022_v2  ;;  %v7033_v11 = vmul.f32 1.442695, %v7029_v8 }
0x1134   : > { %v7035_v21 = vmul.f32 1.442695, %v7030_v51  ;;  %9429 = vpow2.f32 %v7033_v11 }
0x1135   : > { %v7097_v4 = vpop.trf.xlu0 }
0x1136   : > { %9431 = vpow2.f32 %v7035_v21 }
0x1137   : > { %v7081_v5 = vpop.trf.xlu1 }
0x113e   : > { %v9430_v61 = vpop.eup %9429 }
0x113f   : > { %v7041_v36 = vsel %vm2201_vm3, %v9430_v61, 0.0 }
0x1169   : > { %v7025_v12 = vpop.xlane.xlu0 %7024 }
0x116a   : > { %v7031_v40 = vsub.f32 %v11414_v34, %v7025_v12  ;;  %v9432_v34 = vpop.eup %9431 }
0x116b   : > { %v7028_v15 = vpop.xlane.xlu1 %7027 }
0x116c   : > { %v7032_v19 = vsub.f32 %v11418_v48, %v7028_v15  ;;  %v7037_v10 = vmul.f32 1.442695, %v7031_v40  ;;  %v7044_v48 = vsel %vm2201_vm3, %v9432_v34, 0.0 }
0x116e   : > { %v7039_v13 = vmul.f32 1.442695, %v7032_v19  ;;  %9433 = vpow2.f32 %v7037_v10 }
0x116f   : > { %v7113_v17 = vpop.trf.xlu0 }
0x1170   : > { %9435 = vpow2.f32 %v7039_v13 }
0x1171   : > { %v7129_v58 = vpop.trf.xlu1 }
0x1173   : > { %v7145_v37 = vpop.trf.xlu0 }
0x1174   : > { %v7201_v22 = vcombine.low %v7081_v5, %v7145_v37 }
0x1175   : > { %v7161_v47 = vpop.trf.xlu1 }
0x1176   : > { %v7235_v31 = vcombine.low %v7097_v4, %v7161_v47  ;;  %v7208_v46 = vrot.slane %v7201_v22, %v10596_v29 }
0x1177   : > { %v7177_v23 = vpop.trf.xlu0 }
0x1178   : > { %v7209_v26 = vcombine.low %v7113_v17, %v7177_v23  ;;  %v7242_v14 = vrot.slane %v7235_v31, %v10596_v29  ;;  %v9434_v60 = vpop.eup %9433 }
0x1179   : > { %v7193_v28 = vpop.trf.xlu1  ;;  %v7047_v2 = vsel %vm2201_vm3, %v9434_v60, 0.0 }
0x117a   : > { %v7216_v39 = vrot.slane %v7209_v26, %v10596_v29  ;;  %v7243_v55 = vcombine.low %v7129_v58, %v7193_v28  ;;  %v9436_v1 = vpop.eup %9435 }
0x117b   : > { %v7050_v4 = vsel %vm2201_vm3, %v9436_v1, 0.0 }
0x117c   : > { %v7217_v32 = vcombine.low %v7208_v46, %v7216_v39  ;;  %v7250_v43 = vrot.slane %v7243_v55, %v10596_v29  ;;  %v7218_v44 = vcombine.high %v7208_v46, %v7216_v39 }
0x117e   : > { %v7225_v35 = vrot.slane %v7217_v32, %v10604_v33  ;;  %v7251_v42 = vcombine.low %v7242_v14, %v7250_v43  ;;  %v7252_v41 = vcombine.high %v7242_v14, %v7250_v43  ;;  %v7232_v50 = vrot.slane %v7218_v44, %v10604_v33 }
0x1180   : > { %v7259_v20 = vrot.slane %v7251_v42, %v10604_v33  ;;  %v7273_v45 = vshrl.u32 %v7225_v35, 16  ;;  %v7233_v7 = vcombine.high %v7225_v35, %v10019_v27  ;;  %v7266_v52 = vrot.slane %v7252_v41, %v10604_v33 }
0x1181   : > { %v7289_v6 = vshrl.u32 %v7232_v50, 16  ;;  %v7234_v12 = vcombine.high %v7232_v50, %v10019_v27 }
0x1182   : > { %v7271_v24 = vpack.i.b16 %v7259_v20, %v7225_v35  ;;  %v7274_v59 = vshrl.u32 %v7259_v20, 16  ;;  %v7267_v49 = vcombine.high %v7259_v20, %v10019_v27  ;;  %v7281_v62 = vshrl.u32 %v7233_v7, 16 }
0x1183   : > { %v7290_v9 = vshrl.u32 %v7266_v52, 16  ;;  %v7287_v18 = vpack.i.b16 %v7266_v52, %v7232_v50  ;;  %v7268_v5 = vcombine.high %v7266_v52, %v10019_v27  ;;  %v7297_v58 = vshrl.u32 %v7234_v12, 16 }
0x1184   : > { %7301 = vxpose.xlu0.c.b16.start.end [1/1] (short) (narrow) %v7271_v24, 16  ;;  %v7275_v53 = vpack.i.b16 %v7274_v59, %v7273_v45  ;;  %v7282_v30 = vshrl.u32 %v7267_v49, 16  ;;  %v7279_v54 = vpack.i.b16 %v7267_v49, %v7233_v7 }
0x1185   : > { %v7291_v57 = vpack.i.b16 %v7290_v9, %v7289_v6  ;;  %v7298_v15 = vshrl.u32 %v7268_v5, 16  ;;  %v7295_v17 = vpack.i.b16 %v7268_v5, %v7234_v12 }
0x1186   : > { %7317 = vxpose.xlu1.c.b16.start.end [1/1] (short) (narrow) %v7275_v53, 16  ;;  %v7283_v38 = vpack.i.b16 %v7282_v30, %v7281_v62 }
0x1187   : > { %v7299_v37 = vpack.i.b16 %v7298_v15, %v7297_v58 }
0x1188   : > { %7333 = vxpose.xlu0.c.b16.start.end [1/1] (short) (narrow) %v7279_v54, 16 }
0x118a   : > { %7349 = vxpose.xlu1.c.b16.start.end [1/1] (short) (narrow) %v7283_v38, 16 }
0x118c   : > { %7365 = vxpose.xlu0.c.b16.start.end [1/1] (short) (narrow) %v7287_v18, 16 }
0x118e   : > { %7381 = vxpose.xlu1.c.b16.start.end [1/1] (short) (narrow) %v7291_v57, 16 }
0x1199   : > { %7042 = vadd.xlane.f32.xlu0 %v7041_v36 }
0x119b   : > { %7045 = vadd.xlane.f32.xlu1 %v7044_v48 }
0x119d   : > { %7048 = vadd.xlane.f32.xlu0 %v7047_v2 }
0x119f   : > { %7051 = vadd.xlane.f32.xlu1 %v7050_v4 }
0x11ca   : > { %7397 = vxpose.xlu0.c.b16.start.end [1/1] (short) (narrow) %v7295_v17, 16 }
0x11cc   : > { %7413 = vxpose.xlu1.c.b16.start.end [1/1] (short) (narrow) %v7299_v37, 16 }
0x11ce   : > { %5834 = vxpose.xlu0.b32.start.end [1/1] (short) (narrow) %v11381_v3, 8 }
0x11d6   : > { %5802 = vxpose.xlu1.b32.start.end [1/1] (short) (narrow) %v11379_v25, 8 }
0x11ea   : > { %v7309_v47 = vpop.trf.xlu0 }
0x11ec   : > { %v7325_v22 = vpop.trf.xlu1 }
0x11ee   : > { %v7341_v23 = vpop.trf.xlu0 }
0x11f0   : > { %v7357_v31 = vpop.trf.xlu1 }
0x11f2   : > { %v7373_v26 = vpop.trf.xlu0 }
0x11f3   : > { %v7429_v32 = vcombine.low %v7309_v47, %v7373_v26 }
0x11f4   : > { %v7389_v28 = vpop.trf.xlu1 }
0x11f5   : > { %v7454_v35 = vcombine.low %v7325_v22, %v7389_v28  ;;  %v7436_v44 = vrot.slane %v7429_v32, %v10596_v29 }
0x11f7   : > { %v7461_v8 = vrot.slane %v7454_v35, %v10596_v29 }
0x1226   : > { %v7043_v46 = vpop.xlane.xlu0 %7042 }
0x1227   : > { %9437 = vrcp.f32 %v7043_v46 }
0x1228   : > { %v7046_v39 = vpop.xlane.xlu1 %7045 }
0x1229   : > { %9439 = vrcp.f32 %v7046_v39 }
0x122a   : > { %v7049_v55 = vpop.xlane.xlu0 %7048 }
0x122b   : > { %9441 = vrcp.f32 %v7049_v55 }
0x122c   : > { %v7052_v14 = vpop.xlane.xlu1 %7051 }
0x122d   : > { %9443 = vrcp.f32 %v7052_v14 }
0x1230   : > { %v7405_v43 = vpop.trf.xlu0 }
0x1231   : > { %v9438_v3 = vpop.eup %9437  ;;  %v7437_v25 = vcombine.low %v7341_v23, %v7405_v43 }
0x1232   : > { %v7421_v42 = vpop.trf.xlu1  ;;  %v7061_v41 = vmul.f32 %v9438_v3, %v9430_v61 }
0x1233   : > { %v9440_v20 = vpop.eup %9439  ;;  %v7444_v45 = vrot.slane %v7437_v25, %v10596_v29  ;;  %v7462_v24 = vcombine.low %v7357_v31, %v7421_v42 }
0x1234   : > { %v7065_v59 = vpack.c.bf16 %v7061_v41, %v7061_v41  ;;  %v7062_v7 = vmul.f32 %v9440_v20, %v9432_v34 }
0x1235   : > { %v9442_v49 = vpop.eup %9441  ;;  %v7445_v52 = vcombine.low %v7436_v44, %v7444_v45  ;;  %v7469_v53 = vrot.slane %v7462_v24, %v10596_v29 }
0x1236   : > { %7069 = vst.msk [vmem:[%s11463_s1] sm:$0xf] %vm2449_vm5, %v7065_v59  ;;  %v7495_v30 = vsel %vm2201_vm3, %v7065_v59, 0  ;;  %v7066_v51 = vpack.c.bf16 %v7062_v7, %v7062_v7  ;;  %v7063_v50 = vmul.f32 %v9442_v49, %v9434_v60 }
0x1237   : > { %v9444_v54 = vpop.eup %9443  ;;  %v7452_v62 = vrot.slane %v7445_v52, %v10604_v33  ;;  %v7470_v11 = vcombine.low %v7461_v8, %v7469_v53  ;;  %9106 = vmatpush3.bf16.xpose.msra.mxu0 %v7495_v30 }
0x1238   : > { %7070 = vst.msk [vmem:[%s11463_s1 + $0x4] sm:$0xf] %vm2449_vm5, %v7066_v51  ;;  %v7541_v40 = vsel %vm2201_vm3, %v7066_v51, 0  ;;  %9117 = vmatprep.subr.bf16.mxu0 %v10012_v0  ;;  %v7067_v38 = vpack.c.bf16 %v7063_v50, %v7063_v50  ;;  %v7064_v9 = vmul.f32 %v9444_v54, %v9436_v1 }
0x1239   : > { %v7477_v21 = vrot.slane %v7470_v11, %v10604_v33  ;;  %9112 = vmatpush3.bf16.xpose.msra.mxu1 %v7541_v40  ;;  %v7482_v18 = vshrl.u32 %v7452_v62, 16  ;;  %v7453_v34 = vcombine.high %v7452_v62, %v10019_v27 }
0x123a   : > { %7071 = vst.msk [vmem:[%s11463_s1 + $0x8] sm:$0xf] %vm2449_vm5, %v7067_v38  ;;  %9123 = vmatprep.subr.bf16.mxu1 %v10012_v0  ;;  %v7068_v19 = vpack.c.bf16 %v7064_v9, %v7064_v9  ;;  %v7587_v61 = vsel %vm2201_vm3, %v7067_v38, 0 }
0x123b   : > { %v7481_v6 = vpack.i.b16 %v7477_v21, %v7452_v62  ;;  %v7483_v10 = vshrl.u32 %v7477_v21, 16  ;;  %v7478_v13 = vcombine.high %v7477_v21, %v10019_v27  ;;  %v7488_v48 = vshrl.u32 %v7453_v34, 16 }
0x123c   : > { %7072 = vst.msk [vmem:[%s11463_s1 + $0xc] sm:$0xf] %vm2449_vm5, %v7068_v19  ;;  %v7633_v36 = vsel %vm2201_vm3, %v7068_v19, 0 }
0x123d   : > { %v7484_v57 = vpack.i.b16 %v7483_v10, %v7482_v18  ;;  %v7489_v60 = vshrl.u32 %v7478_v13, 16  ;;  %v7487_v1 = vpack.i.b16 %v7478_v13, %v7453_v34 }
0x123e   : > { %9108 = vmatmul.mubr.msk.bf16.vlgmr.msra.gmra.mrb[52].mxu0 %vm2201_vm3, %v7481_v6 }
0x123f   : > { %9118 = vmatpush3.bf16.xpose.msra.mxu0 %v7587_v61  ;;  %9119 = vmatprep.mubr.msk.bf16.mxu0 %vm10013_vm0, %v10012_v0  ;;  %v7490_v2 = vpack.i.b16 %v7489_v60, %v7488_v48 }
0x1240   : > { %9114 = vmatmul.mubr.msk.bf16.vlgmr.msra.gmra.mrb[52].mxu1 %vm2201_vm3, %v7484_v57  ;;  %9129 = vmatprep.subr.bf16.mxu0 %v10012_v0 }
0x1241   : > { %9124 = vmatpush3.bf16.xpose.msra.mxu1 %v7633_v36  ;;  %9125 = vmatprep.mubr.msk.bf16.mxu1 %vm10013_vm0, %v10012_v0 }
0x1242   : > { %9141 = vmatprep.subr.bf16.mxu1 %v10012_v0 }
0x1246   : > { %9120 = vmatmul.mubr.msk.bf16.vlgmr.msra.gmra.mrb[56].mxu0 %vm2201_vm3, %v7487_v1 }
0x1247   : > { %9137 = vmatprep.mubr.msk.bf16.mxu0 %vm10013_vm0, %v10012_v0 }
0x1248   : > { %9126 = vmatmul.mubr.msk.bf16.vlgmr.msra.gmra.mrb[56].mxu1 %vm2201_vm3, %v7490_v2 }
0x1249   : > { %9145 = vmatprep.mubr.msk.bf16.mxu1 %vm10013_vm0, %v10012_v0 }
0x124e   : > { %v11497_v55 = vpop.trf.xlu0 }
0x1256   : > { %v5818_v32 = vpop.trf.xlu1 }
0x1311   : > { %v7531_v27 = vpop.f32.mrb[52].mxu0 }
0x1312   : > { %7675 = vxpose.xlu0.b32.start.end [1/1] (short) (narrow) %v7531_v27, 8  ;;  %v9109_v4 = vpop.f32.mrb[53].mxu0  ;;  %v9384_v27 = vld [vmem:[%s11881_s27] sm:$0xff]  }
0x1313   : > { %v7534_v5 = vpop.f32.mrb[54].mxu0  ;;  %v7577_v12 = vpop.f32.mrb[52].mxu1  ;;  %9130 = vmatpush3.bf16.msra.mxu0 %v9384_v27 }
0x1314   : > { %7707 = vxpose.xlu1.b32.start.end [1/1] (short) (narrow) %v7577_v12, 8  ;;  %v9110_v15 = vpop.f32.mrb[55].mxu0  ;;  %v9115_v17 = vpop.f32.mrb[53].mxu1  ;;  %9131 = vmatprep.subr.bf16.mxu0 %v10012_v0 }
0x1315   : > { %v7580_v58 = vpop.f32.mrb[54].mxu1 }
0x1316   : > { %v9116_v37 = vpop.f32.mrb[55].mxu1 }
0x1319   : > { %v7623_v47 = vpop.f32.mrb[56].mxu0 }
0x131a   : > { %7739 = vxpose.xlu0.b32.start.end [1/1] (short) (narrow) %v7623_v47, 8  ;;  %v9121_v22 = vpop.f32.mrb[57].mxu0 }
0x131b   : > { %v7626_v23 = vpop.f32.mrb[58].mxu0  ;;  %v7669_v31 = vpop.f32.mrb[56].mxu1 }
0x131c   : > { %v9122_v26 = vpop.f32.mrb[59].mxu0  ;;  %v9127_v28 = vpop.f32.mrb[57].mxu1 }
0x131d   : > { %v7672_v46 = vpop.f32.mrb[58].mxu1 }
0x131e   : > { %v9128_v39 = vpop.f32.mrb[59].mxu1  ;;  %7771 = vxpose.xlu0.b32.start.end [1/1] (short) (narrow) %v7669_v31, 8 }
0x1392   : > { %v7691_v14 = vpop.trf.xlu0 }
0x1394   : > { %v7723_v3 = vpop.trf.xlu1 }
0x139a   : > { %v7755_v43 = vpop.trf.xlu0 }
0x139b   : > { %v7803_v35 = vcombine.low %v7691_v14, %v7755_v43  ;;  %v7804_v25 = vcombine.high %v7691_v14, %v7755_v43  ;;  %v9385_v14 = vld [vmem:[%s11881_s27 + $0x8] sm:$0xff]  }
0x139c   : > { %9132 = vmatpush3.bf16.msra.mxu0 %v9385_v14 }
0x139d   : > { %v7811_v44 = vrot.slane %v7803_v35, %v10596_v29  ;;  %v7818_v45 = vrot.slane %v7804_v25, %v10596_v29  ;;  %9133 = vmatprep.subr.bf16.mxu0 %v10012_v0 }
0x139e   : > { %v7787_v42 = vpop.trf.xlu0 }
0x139f   : > { %v7819_v41 = vcombine.low %v7723_v3, %v7787_v42  ;;  %v7820_v20 = vcombine.high %v7723_v3, %v7787_v42 }
0x13a1   : > { %v7827_v24 = vrot.slane %v7819_v41, %v10596_v29  ;;  %v7834_v59 = vrot.slane %v7820_v20, %v10596_v29  ;;  %v9386_v20 = vld [vmem:[%s11881_s27 + $0x10] sm:$0xff]  }
0x13a2   : > { %9134 = vmatpush3.bf16.msra.mxu0 %v9386_v20 }
0x13a3   : > { %v7835_v7 = vcombine.low %v7811_v44, %v7827_v24  ;;  %v7836_v49 = vcombine.high %v7811_v44, %v7827_v24  ;;  %v7851_v8 = vcombine.low %v7818_v45, %v7834_v59  ;;  %v7852_v52 = vcombine.high %v7818_v45, %v7834_v59  ;;  %9135 = vmatprep.subr.bf16.mxu0 %v10012_v0 }
0x13a5   : > { %v7843_v53 = vrot.slane %v7835_v7, %v10604_v33  ;;  %v7850_v30 = vrot.slane %v7836_v49, %v10604_v33  ;;  %v7859_v51 = vrot.slane %v7851_v8, %v10604_v33  ;;  %v7866_v50 = vrot.slane %v7852_v52, %v10604_v33 }
0x13a7   : > { %v7871_v54 = vcombine.low %v7843_v53, %v7850_v30  ;;  %v8819_v62 = vcombine.high %v7843_v53, %v7850_v30  ;;  %v7887_v11 = vcombine.low %v7859_v51, %v7866_v50  ;;  %v8820_v40 = vcombine.high %v7859_v51, %v7866_v50 }
0x13a9   : > { %v7878_v38 = vrot.slane %v7871_v54, %v10596_v29  ;;  %v7886_v9 = vrot.slane %v8819_v62, %v10596_v29  ;;  %v7894_v21 = vrot.slane %v7887_v11, %v10596_v29  ;;  %v7902_v19 = vrot.slane %v8820_v40, %v10596_v29  ;;  %v9387_v54 = vld [vmem:[%s11881_s27 + $0x18] sm:$0xff]  }
0x13aa   : > { %9136 = vmatpush3.bf16.msra.mxu0 %v9387_v54 }
0x13ab   : > { %v7904_v18 = vcombine.high %v7878_v38, %v7886_v9  ;;  %v7920_v6 = vcombine.high %v7894_v21, %v7902_v19  ;;  %v7903_v10 = vcombine.low %v7878_v38, %v7886_v9  ;;  %v7919_v57 = vcombine.low %v7894_v21, %v7902_v19 }
0x13ad   : > { %v7918_v13 = vrot.slane %v7904_v18, %v10604_v33  ;;  %v7934_v61 = vrot.slane %v7920_v6, %v10604_v33  ;;  %v11514_v34 = vrot.slane %v7903_v10, %v10604_v33  ;;  %v11517_v36 = vrot.slane %v7919_v57, %v10604_v33 }
0x13af   : > { %v7937_v60 = vcombine.low %v7918_v13, %v7934_v61  ;;  %v7936_v48 = vcombine.high %v11514_v34, %v11517_v36  ;;  %v7935_v1 = vcombine.low %v11514_v34, %v11517_v36  ;;  %v7938_v2 = vcombine.high %v7918_v13, %v7934_v61  ;;  %v8821_v36 = vld [vmem:[%s11883_s14] ss:$0 sm:$0xff]  ;;  %s11890_s14 = sld [smem:[#allocation59_spill]] }
0x13b1   : > { %7944 = vrot.lane.b32.xlu0 %v7937_v60, %s11882_s7  ;;  %7940 = vrot.lane.b32.xlu1 %v7936_v48, %s10022_s30 }
0x13b5   : > { %7948 = vrot.lane.b32.xlu1 %v7938_v2, %s10023_s0 }
0x13cf   : > { %5866 = vxpose.xlu0.b32.start.end [1/1] (short) (narrow) %v11383_v63, 8 }
0x13de   : > { %5898 = vxpose.xlu1.b32.start.end [1/1] (short) (narrow) %v11387_v56, 8 }
0x1423   : > { %v7941_v4 = vpop.permute.xlu1 %7940  ;;  %v7945_v5 = vpop.permute.xlu0 %7944 }
0x1424   : > { %v7951_v38 = vsel %vm2201_vm3, %v7935_v1, %v7941_v4 }
0x1425   : > { %v7952_v9 = vsel %vm3333_vm6, %v7951_v38, %v7945_v5 }
0x1427   : > { %v7949_v12 = vpop.permute.xlu1 %7948 }
0x1428   : > { %v7953_v21 = vsel %vm3335_vm7, %v7952_v9, %v7949_v12 }
0x144f   : > { %v5882_v15 = vpop.trf.xlu0 }
0x1450   : > { %v5930_v17 = vcombine.low %v5818_v32, %v5882_v15  ;;  %v5931_v58 = vcombine.high %v5818_v32, %v5882_v15 }
0x1452   : > { %v5938_v63 = vrot.slane %v5930_v17, %v10596_v29  ;;  %v5945_v56 = vrot.slane %v5931_v58, %v10596_v29 }
0x145e   : > { %v5914_v37 = vpop.trf.xlu1 }
0x145f   : > { %v5946_v47 = vcombine.low %v11497_v55, %v5914_v37  ;;  %v5947_v22 = vcombine.high %v11497_v55, %v5914_v37 }
0x1461   : > { %v5954_v23 = vrot.slane %v5946_v47, %v10596_v29  ;;  %v5961_v31 = vrot.slane %v5947_v22, %v10596_v29 }
0x1463   : > { %v5962_v26 = vcombine.low %v5938_v63, %v5954_v23  ;;  %v5963_v28 = vcombine.high %v5938_v63, %v5954_v23  ;;  %v5978_v46 = vcombine.low %v5945_v56, %v5961_v31  ;;  %v5979_v39 = vcombine.high %v5945_v56, %v5961_v31  ;;  %v8827_v31 = vld [vmem:[%s11886_s18] ss:$0 sm:$0xff]  ;;  %s11594_s18 = sshll.u32 %s9958_s11, 8 }
0x1465   : > { %v5970_v32 = vrot.slane %v5962_v26, %v10604_v33  ;;  %v5977_v43 = vrot.slane %v5963_v28, %v10604_v33  ;;  %v5986_v55 = vrot.slane %v5978_v46, %v10604_v33  ;;  %v5993_v3 = vrot.slane %v5979_v39, %v10604_v33  ;;  %v8828_v28 = vld [vmem:[%s11887_s23] ss:$0 sm:$0xff] }
0x1467   : > { %v5998_v35 = vcombine.low %v5970_v32, %v5977_v43  ;;  %v8805_v25 = vcombine.high %v5970_v32, %v5977_v43  ;;  %v6014_v42 = vcombine.low %v5986_v55, %v5993_v3  ;;  %v8806_v41 = vcombine.high %v5986_v55, %v5993_v3  ;;  %v9390_v32 = vld [vmem:[%s11888_s3] sm:$0xff]   ;;  %v9391_v43 = vld [vmem:[%s11888_s3 + $0x8] sm:$0xff]   ;;  %v9392_v55 = vld [vmem:[%s11888_s3 + $0x10] sm:$0xff]  }
0x1468   : > { %v9393_v3 = vld [vmem:[%s11888_s3 + $0x18] sm:$0xff]  }
0x1469   : > { %v6005_v44 = vrot.slane %v5998_v35, %v10596_v29  ;;  %v6013_v45 = vrot.slane %v8805_v25, %v10596_v29  ;;  %v6021_v24 = vrot.slane %v6014_v42, %v10596_v29  ;;  %v6029_v59 = vrot.slane %v8806_v41, %v10596_v29 }
0x146b   : > { %v6031_v7 = vcombine.high %v6005_v44, %v6013_v45  ;;  %v6047_v49 = vcombine.high %v6021_v24, %v6029_v59  ;;  %v6030_v8 = vcombine.low %v6005_v44, %v6013_v45  ;;  %v6046_v52 = vcombine.low %v6021_v24, %v6029_v59 }
0x146d   : > { %v6045_v53 = vrot.slane %v6031_v7, %v10604_v33  ;;  %v6061_v30 = vrot.slane %v6047_v49, %v10604_v33  ;;  %v6038_v51 = vrot.slane %v6030_v8, %v10604_v33  ;;  %v6054_v50 = vrot.slane %v6046_v52, %v10604_v33 }
0x146f   : > { %v6064_v62 = vcombine.low %v6045_v53, %v6061_v30  ;;  %v6063_v11 = vcombine.high %v6038_v51, %v6054_v50  ;;  %v6062_v40 = vcombine.low %v6038_v51, %v6054_v50  ;;  %v6065_v29 = vcombine.high %v6045_v53, %v6061_v30 }
0x1471   : > { %6071 = vrot.lane.b32.xlu1 %v6064_v62, %s11882_s7  ;;  %6067 = vrot.lane.b32.xlu0 %v6063_v11, %s10022_s30  ;;  %s11889_s7 = sld [smem:[#allocation57_spill]] }
0x1475   : > { %6075 = vrot.lane.b32.xlu1 %v6065_v29, %s10023_s0  ;;  %s11884_s0 = sld [smem:[#allocation56_spill]] }
0x1477   : > { %v8829_v35 = vld [vmem:[%s11889_s7] ss:$0 sm:$0xff]  ;;  %s8307_s7 = sshll.u32 %s10769_s26, 4  ;;  %s11601_s7 = int_to_ptr.vmem [resolvable:$true] %s8307_s7 }
0x1478   : > { %s9768_s3 = scalar_lea.vmem %s11601_s7, 256  ;;  %p9775_p6 = scmp.lt.s32.totalorder %s11601_s7, %s9773_s5 }
0x1479   : > { %7955 = vrot.lane.b32.xlu1 %v7953_v21, %s10024_s9  ;;  %s11891_s9 = sld [smem:[#allocation63_spill]]  ;;  %p9769_p9 = scmp.ne.s32.totalorder %s11601_s7, %s9768_s3 }
0x147a   : > { %p9776_p7 = scmp.lt.s32.totalorder %s9774_s6, %s9768_s3 }
0x147b   : > { %s11885_s30 = smov %s11884_s0  ;;  %v9388_v47 = vld [vmem:[%s11884_s0] sm:$0xff]   ;;  %s11892_s0 = sld [smem:[#allocation69_spill]] }
0x147c   : > { %9142 = vmatpush3.bf16.msra.mxu1 %v9388_v47  ;;  %v9389_v22 = vld [vmem:[%s11885_s30 + $0x8] sm:$0xff]   ;;  %p9777_p4 = por %p9776_p7, %p9775_p6 }
0x147d   : > { %9143 = vmatprep.subr.bf16.mxu1 %v10012_v0 }
0x147f   : > { %s11598_s23 = scalar_lea.hbm %s11891_s9, %s11594_s18 }
0x1480   : > { %9144 = vmatpush3.bf16.msra.mxu1 %v9389_v22 }
0x1481   : > { %9149 = vmatprep.subr.bf16.mxu1 %v10012_v0  ;;  %p11893_p3 = scmp.ne.s32.totalorder %s11892_s0, 0 }
0x1483   : > { %p9770_p12 = pnand %p9769_p9, %p11893_p3 }
0x1485   : > { %p9771_p10 = pneg %p9770_p12 }
0x1487   : > { %p9778_p8 = pnand %p9777_p4, %p9771_p10 }
0x14e3   : > { %v6072_v33 = vpop.permute.xlu1 %6071  ;;  %v6068_v19 = vpop.permute.xlu0 %6067 }
0x14e4   : > { %v6078_v18 = vsel %vm2201_vm3, %v6062_v40, %v6068_v19 }
0x14e5   : > { %v6079_v10 = vsel %vm3333_vm6, %v6078_v18, %v6072_v33 }
0x14e7   : > { %v6076_v6 = vpop.permute.xlu1 %6075 }
0x14e8   : > { %v6080_v57 = vsel %vm3335_vm7, %v6079_v10, %v6076_v6 }
0x14eb   : > { %v7956_v13 = vpop.permute.xlu1 %7955 }
0x14ec   : > { %v7958_v61 = vsel %vm1354_vm1, %v6080_v57, %v7956_v13 }
0x14ed   : > { %v7959_v34 = vpack.c.bf16 %v7958_v61, %v7958_v61 }
0x14ef   : > { %9138 = vmatmul.mubr.msk.bf16.vlgmr.msra.gmra.mrb[60].mxu0 %vm7999_vm11, %v7959_v34 }
0x15c2   : > { %v8037_v60 = vpop.f32.mrb[60].mxu0 }
0x15c3   : > { %v8038_v48 = vadd.f32 %v8821_v36, %v8037_v60  ;;  %v9139_v1 = vpop.f32.mrb[61].mxu0 }
0x15c4   : > { %v8040_v2 = vpop.f32.mrb[62].mxu0 }
0x15c5   : > { %v8043_v27 = vadd.f32 %v8038_v48, %v10906_v16  ;;  %v9140_v4 = vpop.f32.mrb[63].mxu0 }
0x15c7   : > { %v8046_v5 = vsel %vm1354_vm1, %v8043_v27, 0.0 }
0x15c8   : > { %8047 = vadd.xlane.f32.xlu0 %v8046_v5 }
0x1655   : > { %v8048_v12 = vpop.xlane.xlu0 %8047 }
0x1656   : > { %v8049_v15 = vmul.f32 0.03125, %v8048_v12 }
0x1658   : > { %v8050_v17 = vsub.f32 %v8043_v27, %v8049_v15 }
0x165a   : > { %v8051_v58 = vmul.f32 %v8050_v17, %v8050_v17 }
0x165c   : > { %v8052_v37 = vsel %vm1354_vm1, %v8051_v58, 0.0 }
0x165d   : > { %8053 = vadd.xlane.f32.xlu1 %v8052_v37 }
0x16ea   : > { %v8054_v16 = vpop.xlane.xlu1 %8053 }
0x16eb   : > { %v8055_v63 = vmul.f32 0.03125, %v8054_v16 }
0x16ed   : > { %v8056_v56 = vadd.f32 1e-05, %v8055_v63 }
0x16ef   : > { %9445 = vrsqrt.f32 %v8056_v56 }
0x16f9   : > { %v9446_v23 = vpop.eup %9445 }
0x16fa   : > { %v8058_v26 = vmul.f32 %v9446_v23, %v8050_v17 }
0x16fc   : > { %v8065_v46 = vmul.f32 %v8827_v31, %v8058_v26 }
0x16fe   : > { %v8072_v39 = vadd.f32 %v8828_v28, %v8065_v46 }
0x1700   : > { %v8073_v14 = vpack.c.bf16 %v8072_v39, %v8072_v39 }
0x1702   : > { %9146 = vmatmul.mubr.msk.bf16.vlgmr.msra.gmra.mrb[60].mxu1 %vm1354_vm1, %v8073_v14 }
0x1703   : > { %9157 = vmatprep.mubr.msk.bf16.mxu1 %vm10013_vm0, %v10012_v0  ;;  %9150 = vmatpush3.bf16.msra.mxu1 %v9390_v32 }
0x1704   : > { %9151 = vmatprep.subr.bf16.mxu1 %v10012_v0 }
0x1707   : > { %9152 = vmatpush3.bf16.msra.mxu1 %v9391_v43 }
0x1708   : > { %9153 = vmatprep.subr.bf16.mxu1 %v10012_v0 }
0x170b   : > { %9154 = vmatpush3.bf16.msra.mxu1 %v9392_v55 }
0x170c   : > { %9155 = vmatprep.subr.bf16.mxu1 %v10012_v0  ;;  %v8833_v0 = vld [vmem:[%s11890_s14] ss:$0 sm:$0xff]  ;;  %s8324_s14 = sshll.u32 %s11250_s20, 4  ;;  %s11629_s14 = int_to_ptr.vmem [resolvable:$true] %s8324_s14 }
0x170f   : > { %9156 = vmatpush3.bf16.msra.mxu1 %v9393_v3 }
0x17d5   : > { %v8134_v25 = vpop.f32.mrb[60].mxu1 }
0x17d6   : > { %v8135_v42 = vadd.f32 %v8829_v35, %v8134_v25  ;;  %v9147_v41 = vpop.f32.mrb[61].mxu1 }
0x17d7   : > { %v8137_v20 = vpop.f32.mrb[62].mxu1 }
0x17d8   : > { %v8141_v44 = vmul.f32 0.044715, %v8135_v42  ;;  %v9148_v45 = vpop.f32.mrb[63].mxu1  ;;  %v8140_v52 = vmul.f32 0.5, %v8135_v42 }
0x17da   : > { %v8142_v24 = vmul.f32 %v8141_v44, %v8135_v42 }
0x17dc   : > { %v8143_v59 = vmul.f32 %v8142_v24, %v8135_v42 }
0x17de   : > { %v8144_v7 = vadd.f32 %v8143_v59, %v8135_v42 }
0x17e0   : > { %v8145_v49 = vmul.f32 0.7978846, %v8144_v7 }
0x17e2   : > { %9447 = vtanh.f32 %v8145_v49 }
0x17ec   : > { %v9448_v8 = vpop.eup %9447 }
0x17ed   : > { %v8147_v53 = vadd.f32 1.0, %v9448_v8 }
0x17ef   : > { %v8148_v30 = vmul.f32 %v8147_v53, %v8140_v52 }
0x17f1   : > { %v8149_v51 = vpack.c.bf16 %v8148_v30, %v8148_v30 }
0x17f3   : > { %9158 = vmatmul.mubr.msk.bf16.vlgmr.msra.gmra.mrb[64].mxu1 %vm7999_vm11, %v8149_v51 }
0x18c6   : > { %v8226_v50 = vpop.f32.mrb[64].mxu1 }
0x18c7   : > { %v8227_v54 = vadd.f32 %v8833_v0, %v8226_v50  ;;  %v9159_v62 = vpop.f32.mrb[65].mxu1 }
0x18c8   : > { %v8229_v11 = vpop.f32.mrb[66].mxu1 }
0x18c9   : > { %v8232_v40 = vadd.f32 %v8227_v54, %v8072_v39  ;;  %v9160_v29 = vpop.f32.mrb[67].mxu1 }
0x18cb   : > { %v8235_v38 = vsel %vm1354_vm1, %v8232_v40, 0.0 }
0x18cc   : > { %8236 = vadd.xlane.f32.xlu0 %v8235_v38 }
0x1959   : > { %v8237_v9 = vpop.xlane.xlu0 %8236 }
0x195a   : > { %v8238_v21 = vmul.f32 0.03125, %v8237_v9 }
0x195c   : > { %v11588_v33 = vsub.f32 %v8232_v40, %v8238_v21 }
0x195e   : > { %v8240_v19 = vmul.f32 %v11588_v33, %v11588_v33 }
0x1960   : > { %v8241_v18 = vsel %vm1354_vm1, %v8240_v19, 0.0 }
0x1961   : > { %8242 = vadd.xlane.f32.xlu0 %v8241_v18 }
0x1962   : > { %9781 = shalt.err (!%p9778_p8)
}
0x1963   : > { %s9782_s26 = scalar_lea.hbm %s11598_s23, 256  ;;  %s9786_s4 = scalar_lea.hbm %s11891_s9, 512 }
0x1964   : > { %p9783_p13 = scmp.ne.s32.totalorder %s11598_s23, %s9782_s26  ;;  %p9787_p11 = scmp.lt.u32.totalorder %s11598_s23, %s11891_s9 }
0x1965   : > { %p9788_p2 = scmp.lt.u32.totalorder %s9786_s4, %s9782_s26  ;;  %p9790_p9 = scmp.lt.u32.totalorder %s9782_s26, %s11598_s23 }
0x1966   : > { %p9784_p1 = pnand %p9783_p13, %p11893_p3 }
0x1967   : > { %p9789_p5 = por %p9788_p2, %p9787_p11 }
0x1968   : > { %p9785_p0 = pneg %p9784_p1 }
0x1969   : > { %p9791_p12 = por %p9790_p9, %p9789_p5 }
0x196b   : > { %p9792_p10 = pnand %p9791_p12, %p9785_p0 }
0x196d   : > { %9795 = shalt.err (!%p9792_p10)
}
0x196e   : > { %s10026_s5 = smov 64   ;;  %s11894_s6 = sld [smem:[#allocation64_spill]] }
0x196f   : > { %s10027_s3 = smov 4   ;;  %s9796_s4 = scalar_lea.vmem %s11629_s14, 256 }
0x1970   : > { %9198 = dma.vmem_to_hbm [thread:$0]  (%p11893_p3), %s11601_s7, 256, %s11598_s23, %s8269_s2, %s10026_s5, %s10026_s5, %s10027_s3  }
0x1971   : > { %p9797_p6 = scmp.ne.s32.totalorder %s11629_s14, %s9796_s4  ;;  %s10028_s8 = smov [#allocation23]  }
0x1972   : > { %s9800_s9 = sshll.u32 %s10028_s8, 4  ;;  %s9801_s9 = int_to_ptr.vmem [resolvable:$false] %s9800_s9 }
0x1973   : > { %p9798_p7 = pnand %p9797_p6, %p11893_p3  ;;  %s9802_s12 = scalar_lea.vmem %s9801_s9, 512 }
0x1974   : > { %s11633_s26 = scalar_lea.hbm %s11894_s6, %s11594_s18  ;;  %p9803_p8 = scmp.lt.s32.totalorder %s11629_s14, %s9801_s9 }
0x1975   : > { %p9799_p4 = pneg %p9798_p7  ;;  %p9804_p13 = scmp.lt.s32.totalorder %s9802_s12, %s9796_s4 }
0x1977   : > { %p9805_p1 = por %p9804_p13, %p9803_p8 }
0x1979   : > { %p9806_p0 = pnand %p9805_p1, %p9799_p4 }
0x197b   : > { %9809 = shalt.err (!%p9806_p0)
}
0x197c   : > { %s9810_s20 = scalar_lea.hbm %s11633_s26, 256  ;;  %s9814_s8 = scalar_lea.hbm %s11894_s6, 512 }
0x197d   : > { %p9811_p11 = scmp.ne.s32.totalorder %s11633_s26, %s9810_s20  ;;  %p9815_p9 = scmp.lt.u32.totalorder %s11633_s26, %s11894_s6 }
0x197e   : > { %p9816_p12 = scmp.lt.u32.totalorder %s9814_s8, %s9810_s20  ;;  %p9818_p6 = scmp.lt.u32.totalorder %s9810_s20, %s11633_s26 }
0x197f   : > { %p9812_p2 = pnand %p9811_p11, %p11893_p3 }
0x1980   : > { %p9817_p10 = por %p9816_p12, %p9815_p9 }
0x1981   : > { %p9813_p5 = pneg %p9812_p2 }
0x1982   : > { %p9819_p7 = por %p9818_p6, %p9817_p10 }
0x1984   : > { %p9820_p4 = pnand %p9819_p7, %p9813_p5 }
0x1986   : > { %9823 = shalt.err (!%p9820_p4)
}
0x1987   : > { %s11895_s12 = sld [smem:[#allocation65_spill]]  ;;  %s8341_s23 = sshll.u32 %s11463_s1, 4  ;;  %s11662_s23 = int_to_ptr.vmem [resolvable:$true] %s8341_s23 }
0x1988   : > { %9199 = dma.vmem_to_hbm [thread:$0]  (%p11893_p3), %s11629_s14, 256, %s11633_s26, %s8269_s2, %s10026_s5, %s10026_s5, %s10027_s3  }
0x1989   : > { %s8279_s7 = scalar_lea.sflag [#allocation25], %s10504_s19  ;;  %s9824_s4 = scalar_lea.vmem %s11662_s23, 256 }
0x198a   : > { %p9825_p8 = scmp.ne.s32.totalorder %s11662_s23, %s9824_s4  ;;  %s10029_s22 = smov [#allocation24]  }
0x198b   : > { %s9828_s20 = sshll.u32 %s10029_s22, 4  ;;  %s9829_s20 = int_to_ptr.vmem [resolvable:$false] %s9828_s20 }
0x198c   : > { %p9826_p13 = pnand %p9825_p8, %p11893_p3  ;;  %s9830_s8 = scalar_lea.vmem %s9829_s20, 512 }
0x198d   : > { %s11659_s9 = scalar_lea.hbm %s11895_s12, %s11594_s18  ;;  %p9831_p0 = scmp.lt.s32.totalorder %s11662_s23, %s9829_s20 }
0x198e   : > { %p9827_p1 = pneg %p9826_p13  ;;  %p9832_p11 = scmp.lt.s32.totalorder %s9830_s8, %s9824_s4 }
0x1990   : > { %p9833_p2 = por %p9832_p11, %p9831_p0 }
0x1992   : > { %p9834_p5 = pnand %p9833_p2, %p9827_p1 }
0x1994   : > { %9837 = shalt.err (!%p9834_p5)
}
0x1995   : > { %s9838_s2 = scalar_lea.hbm %s11659_s9, 256  ;;  %s9842_s1 = scalar_lea.hbm %s11895_s12, 512 }
0x1996   : > { %p9839_p9 = scmp.ne.s32.totalorder %s11659_s9, %s9838_s2  ;;  %p9843_p6 = scmp.lt.u32.totalorder %s11659_s9, %s11895_s12 }
0x1997   : > { %p9844_p7 = scmp.lt.u32.totalorder %s9842_s1, %s9838_s2  ;;  %p9846_p8 = scmp.lt.u32.totalorder %s9838_s2, %s11659_s9 }
0x1998   : > { %p9840_p12 = pnand %p9839_p9, %p11893_p3 }
0x1999   : > { %p9845_p4 = por %p9844_p7, %p9843_p6 }
0x199a   : > { %p9841_p10 = pneg %p9840_p12 }
0x199b   : > { %p9847_p13 = por %p9846_p8, %p9845_p4 }
0x199d   : > { %p9848_p1 = pnand %p9847_p13, %p9841_p10 }
0x199f   : > { %9851 = shalt.err (!%p9848_p1)
}
0x19a0   : > { %s11896_s18 = sld [smem:[#allocation60_spill]]  ;;  %s11897_s14 = sld [smem:[#allocation61_spill]] }
0x19a1   : > { %s11898_s26 = sld [smem:[#allocation62_spill]]  ;;  %s8745_s4 = sshll.u32 %s10504_s19, 3 }
0x19a2   : > { %9200 = dma.vmem_to_hbm [thread:$0]  (%p11893_p3), %s11662_s23, 256, %s11659_s9, %s8279_s7, %s10026_s5, %s10026_s5, %s10027_s3  }
0x19a3   : > { %s8845_s22 = sshll.u32 %s9958_s11, 7  ;;  %s1288_s20 = scalar_lea.vmem [#allocation20], %s8745_s4 }
0x19a4   : > { %s8293_s8 = sshll.u32 %s1288_s20, 4  ;;  %s8264_s5 = scalar_lea.sflag [#allocation4], %s10504_s19  ;;  %s11695_s8 = int_to_ptr.vmem [resolvable:$true] %s8293_s8 }
0x19a5   : > { %s9852_s3 = scalar_lea.vmem %s11695_s8, 128  ;;  %s10030_s11 = smov [#allocation20]  }
0x19a6   : > { %v8839_v61 = vld [vmem:[%s11896_s18] ss:$0 sm:$0xff]  ;;  %p9853_p0 = scmp.ne.s32.totalorder %s11695_s8, %s9852_s3  ;;  %s9856_s9 = sshll.u32 %s10030_s11, 4  ;;  %s9857_s9 = int_to_ptr.vmem [resolvable:$false] %s9856_s9 }
0x19a7   : > { %v8840_v36 = vld [vmem:[%s11897_s14] ss:$0 sm:$0xff]  ;;  %s11693_s2 = scalar_lea.hbm %s11898_s26, %s8845_s22  ;;  %s9858_s23 = scalar_lea.vmem %s9857_s9, 256 }
0x19a8   : > { %p9854_p11 = pnand %p9853_p0, %p11893_p3  ;;  %p9859_p5 = scmp.lt.s32.totalorder %s11695_s8, %s9857_s9 }
0x19a9   : > { %p9860_p9 = scmp.lt.s32.totalorder %s9858_s23, %s9852_s3 }
0x19aa   : > { %p9855_p2 = pneg %p9854_p11 }
0x19ab   : > { %p9861_p12 = por %p9860_p9, %p9859_p5 }
0x19ad   : > { %p9862_p10 = pnand %p9861_p12, %p9855_p2 }
0x19ee   : > { %v8243_v6 = vpop.xlane.xlu0 %8242 }
0x19ef   : > { %v8244_v10 = vmul.f32 0.03125, %v8243_v6 }
0x19f1   : > { %v8245_v57 = vadd.f32 1e-05, %v8244_v10 }
0x19f3   : > { %9449 = vrsqrt.f32 %v8245_v57 }
0x19fd   : > { %v9450_v13 = vpop.eup %9449 }
0x19fe   : > { %v8247_v34 = vmul.f32 %v9450_v13, %v11588_v33 }
0x1a00   : > { %v8254_v60 = vmul.f32 %v8839_v61, %v8247_v34 }
0x1a02   : > { %v8261_v48 = vadd.f32 %v8840_v36, %v8254_v60 }
0x1a04   : > { %8262 = vst.msk [vmem:[%s1288_s20] sm:$0xff] %vm1354_vm1, %v8261_v48 }
0x1a05   : > { %9865 = shalt.err (!%p9862_p10)
}
0x1a06   : > { %s9866_s19 = scalar_lea.hbm %s11693_s2, 128  ;;  %s9870_s7 = scalar_lea.hbm %s11898_s26, 256 }
0x1a07   : > { %p9867_p6 = scmp.ne.s32.totalorder %s11693_s2, %s9866_s19  ;;  %p9871_p8 = scmp.lt.u32.totalorder %s11693_s2, %s11898_s26 }
0x1a08   : > { %p9872_p13 = scmp.lt.u32.totalorder %s9870_s7, %s9866_s19  ;;  %p9874_p0 = scmp.lt.u32.totalorder %s9866_s19, %s11693_s2 }
0x1a09   : > { %p9868_p7 = pnand %p9867_p6, %p11893_p3 }
0x1a0a   : > { %p9873_p1 = por %p9872_p13, %p9871_p8 }
0x1a0b   : > { %p9869_p4 = pneg %p9868_p7 }
0x1a0c   : > { %p9875_p11 = por %p9874_p0, %p9873_p1 }
0x1a0e   : > { %p9876_p2 = pnand %p9875_p11, %p9869_p4 }
0x1a10   : > { %9879 = shalt.err (!%p9876_p2)
}
0x1a11   : > { %9197 = dma.vmem_to_hbm [thread:$0]  (%p11893_p3), %s11695_s8, 128, %s11693_s2, %s8264_s5  }
0x1a12 PF: > { %s11899_s1 = sld [smem:[#allocation66_spill]]  ;;  %s11900_s18 = sld [smem:[#allocation71_spill]] }
0x1a13   : > { %p11902_p9 = scmp.ge.s32.totalorder %s9966_s16, 2 }
0x1a18   : > { %s8356_s14 = sand.u32 1, %s11899_s1   ;;  %p11901_p5 = scmp.ne.s32.totalorder %s11900_s18, 0 }
0x1a19   : > { %s8357_s4 = scalar_lea.sflag [#allocation4], %s8356_s14 }
0x1a1a   : > { %p9241_p12 = pnand %p11902_p9, %p11901_p5 }
0x1a1c   : > { %9933 = dma.done.wait (!%p9241_p12), %s8357_s4, 128  }
0x1a1d   : > { %9935 = vsyncadd (!%p9241_p12), %s8357_s4, 4294967168  ;;  %s11903_s22 = sadd.s32 4294967294, %s9966_s16  }
0x1a1e   : > { %s8365_s20 = sand.u32 1, %s11903_s22  }
0x1a1f   : > { %s8366_s3 = scalar_lea.sflag [#allocation22], %s8365_s20 }
0x1a20   : > { %9937 = dma.done.wait (!%p9241_p12), %s8366_s3, 512  }
0x1a21   : > { %9939 = vsyncadd (!%p9241_p12), %s8366_s3, 4294966784  ;;  %s8384_s0 = scalar_lea.sflag [#allocation25], %s8356_s14 }
0x1a22   : > { %9941 = dma.done.wait (!%p9241_p12), %s8384_s0, 256  }
0x1a23   : > { %9943 = vsyncadd (!%p9241_p12), %s8384_s0, 4294967040  ;;  %s99_s16 = sadd.s32 1, %s9966_s16   ;;  %s11904_s8 = sld [smem:[#allocation67_spill]] }
0x1a24   : > { %p96_p3 = scmp.ge.s32.totalorder %s99_s16, 4   ;;  %s11905_s0 = sld [smem:[#allocation70_spill]] }
0x1a25   : > { %s11906_s2 = sld [smem:[#allocation68_spill]]  ;;  %s11907_s7 = smov %s9950_s10 }
0x1a26   : > { %s11909_s11 = smov %s9962_s15  ;;  %98 = sbr.rel (!%p96_p3) target bundleno = 90 (0x5a), region = 338 }
0x1a29   : > { %s11908_s10 = smov %s11904_s8 }
0x1a2b   : > { %s11910_s15 = smov %s11906_s2 }
0x1a2d   :  { %8389 = vsyncpa [#allocation3], 1 }
0x1a2e   :  { %8391 = vsyncpa [#allocation3 + $0x1], 1 }
0x1a2f   :  { %8392 = vsyncpa [#allocation6], 1 }
0x1a30   :  { %8394 = vsyncpa [#allocation6 + $0x1], 1 }
0x1a31   :  { %8395 = vsyncpa [#allocation9], 1 }
0x1a32   :  { %8397 = vsyncpa [#allocation9 + $0x1], 1 }
0x1a33   :  { %8398 = vsyncpa [#allocation12], 1 }
0x1a34   :  { %8399 = vsyncpa [#allocation15], 1 }
0x1a35   :  { %8400 = vsyncpa [#allocation18], 1 }
0x1a36   :  { %8401 = vsyncpa [#allocation4], 1 }
0x1a37   :  { %8403 = vsyncpa [#allocation4 + $0x1], 1 }
0x1a38   :  { %8404 = vsyncpa [#allocation22], 1 }
0x1a39   :  { %8406 = vsyncpa [#allocation22 + $0x1], 1 }
0x1a3a   :  { %8407 = vsyncpa [#allocation25], 1 }
0x1a3b   :  { %8409 = vsyncpa [#allocation25 + $0x1], 1 }

</bundles_post_ra>
